<compile_context>
chip_gen: v5e
topology: v5e:2x2
jax: 0.10.0
libtpu: 0.0.40
codegen_flags: <defaults>
</compile_context>

<pallas_src>
import jax
import jax.numpy as jnp
from jax.experimental import pallas as pl
from jax.experimental.pallas import tpu as pltpu

HIDDEN = 128            # self.hidden_dim
LSTM_H = 2 * HIDDEN     # LSTM hidden size = 256
GATES = 4 * LSTM_H      # 1024


def _leaky_relu(v):
    # nn.LeakyReLU(0.05)
    return jnp.where(v > 0, v, 0.05 * v)


def _round_up(n, m):
    return ((n + m - 1) // m) * m


def controlnet_kernel(x_ref, w_lstm_ref, w_misc_ref, bias_ref, state_in_ref,
                      y_ref, state_out_ref):
    """One module forward per grid step t.

    Weight/bias slabs have constant index_maps, so Pallas fetches them once and
    keeps them VMEM-resident for all T steps.  The recurrent (h, c) state is
    carried in the resident `state_out_ref` output block (rows: h0, h1, c0, c1).
    """
    t = pl.program_id(0)
    B = y_ref.shape[1]
    in_tot = x_ref.shape[2]

    # row offsets inside the misc weight slab (must match make_params)
    enc_b_row = _round_up(in_tot, 16)
    fc_row = enc_b_row + LSTM_H

    bf = lambda v: v.astype(jnp.bfloat16)

    @pl.when(t == 0)
    def _init_state():
        # broadcast the (possibly batch-1 learned) initial state over the batch
        for s in range(4):                      # 0,1 = h(l0,l1); 2,3 = c(l0,l1)
            state_out_ref[s, :, :] = jnp.broadcast_to(
                state_in_ref[s], (B, LSTM_H))

    h0 = state_out_ref[0]
    h1 = state_out_ref[1]
    c0 = state_out_ref[2]
    c1 = state_out_ref[3]

    # ---- recurrent contributions first: they depend only on the carried
    # state, so the MXU starts on them while the encoder path is produced.
    hh0 = jnp.dot(bf(h0), w_lstm_ref[LSTM_H:2 * LSTM_H, :],
                  preferred_element_type=jnp.float32)
    hh1 = jnp.dot(bf(h1), w_lstm_ref[3 * LSTM_H:4 * LSTM_H, :],
                  preferred_element_type=jnp.float32)

    # ---- fused encoders (block-diagonal weights keep encoder1/2 independent)
    x = x_ref[0]                                          # (B, in_tot) f32
    e = _leaky_relu(
        jnp.dot(bf(x), w_misc_ref[0:in_tot, :],
                preferred_element_type=jnp.float32) + bias_ref[0:1, :])
    x_in = _leaky_relu(
        jnp.dot(bf(e), w_misc_ref[enc_b_row:enc_b_row + LSTM_H, :],
                preferred_element_type=jnp.float32) + bias_ref[1:2, :])
    # TODO(synk): on v5e (128x128 MXU) split this block-diagonal 256x256 second
    # encoder layer into two independent 128x128 matmuls to halve weight pushes.

    def lstm_gates(xw, hw, brow):
        g = xw + hw                                       # (B, 1024) f32
        i = jax.nn.sigmoid(g[:, 0:LSTM_H] + bias_ref[brow:brow + 1, :])
        f = jax.nn.sigmoid(g[:, LSTM_H:2 * LSTM_H] + bias_ref[brow + 1:brow + 2, :])
        gg = jnp.tanh(g[:, 2 * LSTM_H:3 * LSTM_H] + bias_ref[brow + 2:brow + 3, :])
        o = jax.nn.sigmoid(g[:, 3 * LSTM_H:4 * LSTM_H] + bias_ref[brow + 3:brow + 4, :])
        return i, f, gg, o

    # ---- LSTM layer 0 (PyTorch gate order i, f, g, o)
    xw0 = jnp.dot(bf(x_in), w_lstm_ref[0:LSTM_H, :],
                  preferred_element_type=jnp.float32)
    i, f, g, o = lstm_gates(xw0, hh0, 2)
    c0n = f * c0 + i * g
    h0n = o * jnp.tanh(c0n)

    # ---- LSTM layer 1
    xw1 = jnp.dot(bf(h0n), w_lstm_ref[2 * LSTM_H:3 * LSTM_H, :],
                  preferred_element_type=jnp.float32)
    i, f, g, o = lstm_gates(xw1, hh1, 6)
    c1n = f * c1 + i * g
    h1n = o * jnp.tanh(c1n)

    # ---- fc (weights lane-padded to 256 -> unmasked stores)
    y_ref[0, :, :] = jnp.dot(bf(h1n), w_misc_ref[fc_row:fc_row + LSTM_H, :],
                             preferred_element_type=jnp.float32) + bias_ref[10:11, :]

    # carry the state (written back to HBM once, after the last grid step)
    state_out_ref[0, :, :] = h0n
    state_out_ref[1, :, :] = h1n
    state_out_ref[2, :, :] = c0n
    state_out_ref[3, :, :] = c1n


def make_params(key, input_dim_pose, input_dim_control, output_dim):
    keys = jax.random.split(key, 20)
    n = lambda k, shape, s=0.05: (s * jax.random.normal(k, shape)).astype(jnp.float32)

    # "raw" (PyTorch-layout-equivalent, already transposed to [in, out]) weights
    w1a = n(keys[0], (input_dim_pose, HIDDEN));    b1a = n(keys[1], (HIDDEN,))
    w1b = n(keys[2], (HIDDEN, HIDDEN));            b1b = n(keys[3], (HIDDEN,))
    w2a = n(keys[4], (input_dim_control, HIDDEN)); b2a = n(keys[5], (HIDDEN,))
    w2b = n(keys[6], (HIDDEN, HIDDEN));            b2b = n(keys[7], (HIDDEN,))
    wih0 = n(keys[8], (LSTM_H, GATES));  whh0 = n(keys[9], (LSTM_H, GATES))
    bih0 = n(keys[10], (GATES,));        bhh0 = n(keys[11], (GATES,))
    wih1 = n(keys[12], (LSTM_H, GATES)); whh1 = n(keys[13], (LSTM_H, GATES))
    bih1 = n(keys[14], (GATES,));        bhh1 = n(keys[15], (GATES,))
    h0 = n(keys[16], (2, 1, LSTM_H), 0.01)
    c0 = n(keys[17], (2, 1, LSTM_H), 0.01)
    wfc = n(keys[18], (LSTM_H, output_dim))
    bfc = n(keys[19], (output_dim,))

    in_tot = input_dim_pose + input_dim_control
    enc_b_row = _round_up(in_tot, 16)
    fc_row = enc_b_row + LSTM_H
    misc_rows = fc_row + LSTM_H

    # --- bf16 slab #1: the four (256, 1024) LSTM matrices, stacked along rows
    w_lstm = jnp.concatenate([wih0, whh0, wih1, whh1], axis=0)       # (1024, 1024)

    # --- bf16 slab #2: block-diagonal encoder weights + lane-padded fc
    w_misc = jnp.zeros((misc_rows, LSTM_H), jnp.float32)
    w_misc = w_misc.at[:input_dim_pose, :HIDDEN].set(w1a)
    w_misc = w_misc.at[input_dim_pose:in_tot, HIDDEN:].set(w2a)
    w_misc = w_misc.at[enc_b_row:enc_b_row + HIDDEN, :HIDDEN].set(w1b)
    w_misc = w_misc.at[enc_b_row + HIDDEN:enc_b_row + LSTM_H, HIDDEN:].set(w2b)
    w_misc = w_misc.at[fc_row:fc_row + LSTM_H, :output_dim].set(wfc)

    # --- f32 bias slab (11, 256): enc biases, per-gate fused LSTM biases, fc bias
    biases = jnp.zeros((11, LSTM_H), jnp.float32)
    biases = biases.at[0].set(jnp.concatenate([b1a, b2a]))
    biases = biases.at[1].set(jnp.concatenate([b1b, b2b]))
    biases = biases.at[2:6].set((bih0 + bhh0).reshape(4, LSTM_H))
    biases = biases.at[6:10].set((bih1 + bhh1).reshape(4, LSTM_H))
    biases = biases.at[10, :output_dim].set(bfc)

    return {
        "w_lstm": w_lstm.astype(jnp.bfloat16),
        "w_misc": w_misc.astype(jnp.bfloat16),
        "biases": biases,
        "h0": h0, "c0": c0,
        "dims": (input_dim_pose, input_dim_control, output_dim),
        # unfused f32 copies, used only by the pure-JAX reference below
        "_raw": dict(w1a=w1a, b1a=b1a, w1b=w1b, b1b=b1b,
                     w2a=w2a, b2a=b2a, w2b=w2b, b2b=b2b,
                     wih0=wih0, whh0=whh0, bih0=bih0, bhh0=bhh0,
                     wih1=wih1, whh1=whh1, bih1=bih1, bhh1=bhh1,
                     wfc=wfc, bfc=bfc),
    }


def _controlnet_steps(xs, params, h=None, c=None):
    """Run T consecutive module forwards.  xs: (T, B, in_tot)."""
    T, B, in_tot = xs.shape
    if h is None:
        h_in, c_in = params["h0"], params["c0"]      # (2, 1, 256) learned init
    else:
        h_in, c_in = h, c                            # (2, B, 256) user-supplied
    state_in = jnp.concatenate([h_in, c_in], axis=0).astype(jnp.float32)
    Bh = state_in.shape[1]

    w_lstm, w_misc, biases = params["w_lstm"], params["w_misc"], params["biases"]

    flops = 2 * T * B * (in_tot * LSTM_H + LSTM_H * LSTM_H
                         + 4 * LSTM_H * GATES + LSTM_H * LSTM_H)
    bytes_acc = (xs.size * 4 + w_lstm.size * 2 + w_misc.size * 2
                 + biases.size * 4 + state_in.size * 4
                 + T * B * LSTM_H * 4 + 4 * B * LSTM_H * 4)
    cost = pl.CostEstimate(flops=int(flops),
                           transcendentals=int(10 * T * B * LSTM_H),
                           bytes_accessed=int(bytes_acc))

    grid_spec = pltpu.PrefetchScalarGridSpec(
        num_scalar_prefetch=0,
        grid=(T,),
        in_specs=[
            pl.BlockSpec((1, B, in_tot), lambda t: (t, 0, 0)),       # per-step x
            pl.BlockSpec(w_lstm.shape, lambda t: (0, 0)),            # resident
            pl.BlockSpec(w_misc.shape, lambda t: (0, 0)),            # resident
            pl.BlockSpec(biases.shape, lambda t: (0, 0)),            # resident
            pl.BlockSpec((4, Bh, LSTM_H), lambda t: (0, 0, 0)),      # init state
        ],
        out_specs=[
            pl.BlockSpec((1, B, LSTM_H), lambda t: (t, 0, 0)),       # per-step y
            pl.BlockSpec((4, B, LSTM_H), lambda t: (0, 0, 0)),       # carried h/c
        ],
    )
    # TODO(synk): in a tight control loop with user-supplied (2,B,256) state,
    # add input_output_aliases={4: 0+1} to update the state HBM buffer in place.
    ys, state_out = pl.pallas_call(
        controlnet_kernel,
        grid_spec=grid_spec,
        out_shape=(
            jax.ShapeDtypeStruct((T, B, LSTM_H), jnp.float32),
            jax.ShapeDtypeStruct((4, B, LSTM_H), jnp.float32),
        ),
        compiler_params=pltpu.CompilerParams(
            dimension_semantics=("arbitrary",),
            vmem_limit_bytes=32 * 1024 * 1024),
        cost_estimate=cost,
    )(xs, w_lstm, w_misc, biases, state_in)
    return ys, state_out[0:2], state_out[2:4]


def controlnet_forward(x, params, h=None, c=None):
    """Single-step forward matching the PyTorch module (seq_len = 1)."""
    idp, idc, output_dim = params["dims"]
    x = x[:, :idp + idc]
    ys, h_out, c_out = _controlnet_steps(x[None], params, h, c)
    return ys[0, :, :output_dim], h_out, c_out


def controlnet_rollout(xs, params, h=None, c=None):
    """Apply the module forward T times, carrying (h, c); weights stay in VMEM."""
    idp, idc, output_dim = params["dims"]
    xs = xs[:, :, :idp + idc]
    ys, h_out, c_out = _controlnet_steps(xs, params, h, c)
    return ys[:, :, :output_dim], h_out, c_out


# ------------------------- pure-JAX references -------------------------------

def controlnet_reference(x, raw, h_init, c_init,
                         input_dim_pose, input_dim_control,
                         compute_dtype=jnp.float32):
    """Unfused reference of the PyTorch forward.  compute_dtype=bfloat16 mirrors
    the kernel's mixed precision (bf16 matmul operands, f32 accumulation)."""
    cast = lambda a: a.astype(compute_dtype)
    lin = lambda v, w, b: jnp.dot(cast(v), cast(w),
                                  preferred_element_type=jnp.float32) + b
    B = x.shape[0]
    xp = x[:, :input_dim_pose]
    xc = x[:, input_dim_pose:input_dim_pose + input_dim_control]
    e1 = _leaky_relu(lin(xp, raw["w1a"], raw["b1a"]))
    e1 = _leaky_relu(lin(e1, raw["w1b"], raw["b1b"]))
    e2 = _leaky_relu(lin(xc, raw["w2a"], raw["b2a"]))
    e2 = _leaky_relu(lin(e2, raw["w2b"], raw["b2b"]))
    xin = jnp.concatenate([e1, e2], axis=-1)

    h0 = jnp.broadcast_to(h_init[0], (B, LSTM_H))
    h1 = jnp.broadcast_to(h_init[1], (B, LSTM_H))
    c0 = jnp.broadcast_to(c_init[0], (B, LSTM_H))
    c1 = jnp.broadcast_to(c_init[1], (B, LSTM_H))

    def cell(xv, hp, cp, wih, whh, bih, bhh):
        gates = lin(xv, wih, bih) + lin(hp, whh, bhh)
        i = jax.nn.sigmoid(gates[:, 0:LSTM_H])
        f = jax.nn.sigmoid(gates[:, LSTM_H:2 * LSTM_H])
        g = jnp.tanh(gates[:, 2 * LSTM_H:3 * LSTM_H])
        o = jax.nn.sigmoid(gates[:, 3 * LSTM_H:4 * LSTM_H])
        cn = f * cp + i * g
        hn = o * jnp.tanh(cn)
        return hn, cn

    h0n, c0n = cell(xin, h0, c0, raw["wih0"], raw["whh0"], raw["bih0"], raw["bhh0"])
    h1n, c1n = cell(h0n, h1, c1, raw["wih1"], raw["whh1"], raw["bih1"], raw["bhh1"])
    y = lin(h1n, raw["wfc"], raw["bfc"])
    return y, jnp.stack([h0n, h1n], axis=0), jnp.stack([c0n, c1n], axis=0)


def controlnet_reference_rollout(xs, raw, h_init, c_init,
                                 input_dim_pose, input_dim_control,
                                 compute_dtype=jnp.float32):
    h, c = h_init, c_init
    ys = []
    for t in range(xs.shape[0]):
        y, h, c = controlnet_reference(xs[t], raw, h, c,
                                       input_dim_pose, input_dim_control,
                                       compute_dtype)
        ys.append(y)
    return jnp.stack(ys, axis=0), h, c


if __name__ == "__main__":
    # shapes consistent with the module's forward:
    #   args.start_control (pose dims) = 16, args.dim_control = 16,
    #   output_dim = 32, batch = 8, rollout length T = 4
    INPUT_DIM_POSE = 16
    INPUT_DIM_CONTROL = 16
    OUTPUT_DIM = 32
    B = 8
    T = 4

    key = jax.random.PRNGKey(0)
    k_param, k_x = jax.random.split(key)
    params = make_params(k_param, INPUT_DIM_POSE, INPUT_DIM_CONTROL, OUTPUT_DIM)
    raw = params["_raw"]

    xs = jax.random.normal(
        k_x, (T, B, INPUT_DIM_POSE + INPUT_DIM_CONTROL), dtype=jnp.float32)
    x0 = xs[0]

    # ---- single-step forward (the module's forward) ----
    y, h, c = controlnet_forward(x0, params)
    jax.block_until_ready((y, h, c))
    assert y.shape == (B, OUTPUT_DIM)
    assert h.shape == (2, B, LSTM_H) and c.shape == (2, B, LSTM_H)

    y_bf, h_bf, c_bf = controlnet_reference(
        x0, raw, params["h0"], params["c0"],
        INPUT_DIM_POSE, INPUT_DIM_CONTROL, compute_dtype=jnp.bfloat16)
    y_f32, h_f32, c_f32 = controlnet_reference(
        x0, raw, params["h0"], params["c0"],
        INPUT_DIM_POSE, INPUT_DIM_CONTROL, compute_dtype=jnp.float32)

    # tight check vs bf16-matmul reference (same mixed precision as kernel)
    assert jnp.allclose(y, y_bf, atol=2e-3, rtol=2e-3)
    assert jnp.allclose(h, h_bf, atol=2e-3, rtol=2e-3)
    assert jnp.allclose(c, c_bf, atol=2e-3, rtol=2e-3)
    # loose check vs exact f32 PyTorch math (bf16 weight rounding)
    assert jnp.allclose(y, y_f32, atol=5e-2, rtol=5e-2)
    assert jnp.allclose(h, h_f32, atol=5e-2, rtol=5e-2)
    assert jnp.allclose(c, c_f32, atol=5e-2, rtol=5e-2)

    # ---- user-supplied-state path: chain two single-step calls ----
    y1, h1s, c1s = controlnet_forward(xs[1], params, h=h, c=c)
    jax.block_until_ready((y1, h1s, c1s))

    # ---- T-step rollout: weights DMA'd once, VMEM-resident across the grid ----
    ys_k, hT, cT = controlnet_rollout(xs, params)
    jax.block_until_ready((ys_k, hT, cT))
    assert ys_k.shape == (T, B, OUTPUT_DIM)
    assert hT.shape == (2, B, LSTM_H) and cT.shape == (2, B, LSTM_H)

    # rollout steps 0/1 must match the chained single-step calls (the f32 state
    # round-trips exactly), proving per-step semantics are unchanged.
    assert jnp.allclose(ys_k[0], y, atol=1e-5, rtol=1e-5)
    assert jnp.allclose(ys_k[1], y1, atol=1e-5, rtol=1e-5)

    ys_bf, hT_bf, cT_bf = controlnet_reference_rollout(
        xs, raw, params["h0"], params["c0"],
        INPUT_DIM_POSE, INPUT_DIM_CONTROL, compute_dtype=jnp.bfloat16)
    assert jnp.allclose(ys_k, ys_bf, atol=1e-2, rtol=1e-2)
    assert jnp.allclose(hT, hT_bf, atol=1e-2, rtol=1e-2)
    assert jnp.allclose(cT, cT_bf, atol=1e-2, rtol=1e-2)

    print("KERNEL_OK")
</pallas_src>

<mosaic_0001>
module attributes {stable_mosaic.version = 11 : i64} {
  func.func @controlnet_kernel(%arg0: i32, %arg1: memref<1x8x32xf32, #tpu.memory_space<vmem>>, %arg2: memref<1024x1024xbf16, #tpu.memory_space<vmem>>, %arg3: memref<544x256xbf16, #tpu.memory_space<vmem>>, %arg4: memref<11x256xf32, #tpu.memory_space<vmem>>, %arg5: memref<4x1x256xf32, #tpu.memory_space<vmem>>, %arg6: memref<1x8x256xf32, #tpu.memory_space<vmem>>, %arg7: memref<4x8x256xf32, #tpu.memory_space<vmem>>) attributes {dimension_semantics = [#tpu.dimension_semantics<arbitrary>], iteration_bounds = array<i64: 1>, scalar_prefetch = 0 : i64, scratch_operands = 0 : i64, tpu.core_type = #tpu.core_type<tc>, window_params = [{transform_indices = @transform_0, window_bounds = array<i64: 1, 8, 32>}, {pipeline_mode = #tpu.pipeline_mode<synchronous>, transform_indices = @transform_1, window_bounds = array<i64: 1024, 1024>}, {pipeline_mode = #tpu.pipeline_mode<synchronous>, transform_indices = @transform_2, window_bounds = array<i64: 544, 256>}, {pipeline_mode = #tpu.pipeline_mode<synchronous>, transform_indices = @transform_3, window_bounds = array<i64: 11, 256>}, {pipeline_mode = #tpu.pipeline_mode<synchronous>, transform_indices = @transform_4, window_bounds = array<i64: 4, 1, 256>}, {transform_indices = @transform_5, window_bounds = array<i64: 1, 8, 256>}, {pipeline_mode = #tpu.pipeline_mode<synchronous>, transform_indices = @transform_6, window_bounds = array<i64: 4, 8, 256>}]} {
    %c0_i32 = arith.constant 0 : i32
    %0 = arith.cmpi eq, %arg0, %c0_i32 : i32
    %1 = arith.extui %0 : i1 to i32
    %c0_i32_0 = arith.constant 0 : i32
    %2 = arith.cmpi ne, %1, %c0_i32_0 : i32
    scf.if %2 {
      %c0_67 = arith.constant 0 : index
      %c0_68 = arith.constant 0 : index
      %c0_69 = arith.constant 0 : index
      %144 = vector.load %arg5[%c0_67, %c0_68, %c0_69] : memref<4x1x256xf32, #tpu.memory_space<vmem>>, vector<1x1x256xf32>
      %145 = vector.shape_cast %144 : vector<1x1x256xf32> to vector<1x256xf32>
      %146 = vector.shape_cast %145 : vector<1x256xf32> to vector<1x256xf32>
      %147 = vector.broadcast %146 : vector<1x256xf32> to vector<8x256xf32>
      %c0_70 = arith.constant 0 : index
      %c0_71 = arith.constant 0 : index
      %c0_72 = arith.constant 0 : index
      %148 = vector.load %arg7[%c0_70, %c0_71, %c0_72] : memref<4x8x256xf32, #tpu.memory_space<vmem>>, vector<1x8x256xf32>
      %149 = vector.shape_cast %148 : vector<1x8x256xf32> to vector<8x256xf32>
      %150 = vector.shape_cast %147 : vector<8x256xf32> to vector<1x8x256xf32>
      tpu.vector_store %arg7[%c0_70, %c0_71, %c0_72], %150 {strides = array<i32>} : memref<4x8x256xf32, #tpu.memory_space<vmem>>, vector<1x8x256xf32>,
      %c1_73 = arith.constant 1 : index
      %c0_74 = arith.constant 0 : index
      %c0_75 = arith.constant 0 : index
      %151 = vector.load %arg5[%c1_73, %c0_74, %c0_75] : memref<4x1x256xf32, #tpu.memory_space<vmem>>, vector<1x1x256xf32>
      %152 = vector.shape_cast %151 : vector<1x1x256xf32> to vector<1x256xf32>
      %153 = vector.shape_cast %152 : vector<1x256xf32> to vector<1x256xf32>
      %154 = vector.broadcast %153 : vector<1x256xf32> to vector<8x256xf32>
      %c1_76 = arith.constant 1 : index
      %c0_77 = arith.constant 0 : index
      %c0_78 = arith.constant 0 : index
      %155 = vector.load %arg7[%c1_76, %c0_77, %c0_78] : memref<4x8x256xf32, #tpu.memory_space<vmem>>, vector<1x8x256xf32>
      %156 = vector.shape_cast %155 : vector<1x8x256xf32> to vector<8x256xf32>
      %157 = vector.shape_cast %154 : vector<8x256xf32> to vector<1x8x256xf32>
      tpu.vector_store %arg7[%c1_76, %c0_77, %c0_78], %157 {strides = array<i32>} : memref<4x8x256xf32, #tpu.memory_space<vmem>>, vector<1x8x256xf32>,
      %c2_79 = arith.constant 2 : index
      %c0_80 = arith.constant 0 : index
      %c0_81 = arith.constant 0 : index
      %158 = vector.load %arg5[%c2_79, %c0_80, %c0_81] : memref<4x1x256xf32, #tpu.memory_space<vmem>>, vector<1x1x256xf32>
      %159 = vector.shape_cast %158 : vector<1x1x256xf32> to vector<1x256xf32>
      %160 = vector.shape_cast %159 : vector<1x256xf32> to vector<1x256xf32>
      %161 = vector.broadcast %160 : vector<1x256xf32> to vector<8x256xf32>
      %c2_82 = arith.constant 2 : index
      %c0_83 = arith.constant 0 : index
      %c0_84 = arith.constant 0 : index
      %162 = vector.load %arg7[%c2_82, %c0_83, %c0_84] : memref<4x8x256xf32, #tpu.memory_space<vmem>>, vector<1x8x256xf32>
      %163 = vector.shape_cast %162 : vector<1x8x256xf32> to vector<8x256xf32>
      %164 = vector.shape_cast %161 : vector<8x256xf32> to vector<1x8x256xf32>
      tpu.vector_store %arg7[%c2_82, %c0_83, %c0_84], %164 {strides = array<i32>} : memref<4x8x256xf32, #tpu.memory_space<vmem>>, vector<1x8x256xf32>,
      %c3_85 = arith.constant 3 : index
      %c0_86 = arith.constant 0 : index
      %c0_87 = arith.constant 0 : index
      %165 = vector.load %arg5[%c3_85, %c0_86, %c0_87] : memref<4x1x256xf32, #tpu.memory_space<vmem>>, vector<1x1x256xf32>
      %166 = vector.shape_cast %165 : vector<1x1x256xf32> to vector<1x256xf32>
      %167 = vector.shape_cast %166 : vector<1x256xf32> to vector<1x256xf32>
      %168 = vector.broadcast %167 : vector<1x256xf32> to vector<8x256xf32>
      %c3_88 = arith.constant 3 : index
      %c0_89 = arith.constant 0 : index
      %c0_90 = arith.constant 0 : index
      %169 = vector.load %arg7[%c3_88, %c0_89, %c0_90] : memref<4x8x256xf32, #tpu.memory_space<vmem>>, vector<1x8x256xf32>
      %170 = vector.shape_cast %169 : vector<1x8x256xf32> to vector<8x256xf32>
      %171 = vector.shape_cast %168 : vector<8x256xf32> to vector<1x8x256xf32>
      tpu.vector_store %arg7[%c3_88, %c0_89, %c0_90], %171 {strides = array<i32>} : memref<4x8x256xf32, #tpu.memory_space<vmem>>, vector<1x8x256xf32>,
    } else {
    }
    %c0 = arith.constant 0 : index
    %c0_1 = arith.constant 0 : index
    %c0_2 = arith.constant 0 : index
    %3 = vector.load %arg7[%c0, %c0_1, %c0_2] : memref<4x8x256xf32, #tpu.memory_space<vmem>>, vector<1x8x256xf32>
    %4 = vector.shape_cast %3 : vector<1x8x256xf32> to vector<8x256xf32>
    %c1 = arith.constant 1 : index
    %c0_3 = arith.constant 0 : index
    %c0_4 = arith.constant 0 : index
    %5 = vector.load %arg7[%c1, %c0_3, %c0_4] : memref<4x8x256xf32, #tpu.memory_space<vmem>>, vector<1x8x256xf32>
    %6 = vector.shape_cast %5 : vector<1x8x256xf32> to vector<8x256xf32>
    %c2 = arith.constant 2 : index
    %c0_5 = arith.constant 0 : index
    %c0_6 = arith.constant 0 : index
    %7 = vector.load %arg7[%c2, %c0_5, %c0_6] : memref<4x8x256xf32, #tpu.memory_space<vmem>>, vector<1x8x256xf32>
    %8 = vector.shape_cast %7 : vector<1x8x256xf32> to vector<8x256xf32>
    %c3 = arith.constant 3 : index
    %c0_7 = arith.constant 0 : index
    %c0_8 = arith.constant 0 : index
    %9 = vector.load %arg7[%c3, %c0_7, %c0_8] : memref<4x8x256xf32, #tpu.memory_space<vmem>>, vector<1x8x256xf32>
    %10 = vector.shape_cast %9 : vector<1x8x256xf32> to vector<8x256xf32>
    %11 = arith.truncf %4 : vector<8x256xf32> to vector<8x256xbf16>
    %c256 = arith.constant 256 : index
    %c0_9 = arith.constant 0 : index
    %12 = vector.load %arg2[%c256, %c0_9] : memref<1024x1024xbf16, #tpu.memory_space<vmem>>, vector<256x1024xbf16>
    %cst = arith.constant dense<0.000000e+00> : vector<8x1024xf32>
    %13 = tpu.matmul %11, %12, %cst {dimension_numbers = #tpu.dot_dimension_numbers<[1], [0], [0], [1], [0, 0, 1, 1], [], []>} : vector<8x256xbf16>, vector<256x1024xbf16>, vector<8x1024xf32> -> vector<8x1024xf32>
    %14 = arith.truncf %6 : vector<8x256xf32> to vector<8x256xbf16>
    %c768 = arith.constant 768 : index
    %c0_10 = arith.constant 0 : index
    %15 = vector.load %arg2[%c768, %c0_10] : memref<1024x1024xbf16, #tpu.memory_space<vmem>>, vector<256x1024xbf16>
    %cst_11 = arith.constant dense<0.000000e+00> : vector<8x1024xf32>
    %16 = tpu.matmul %14, %15, %cst_11 {dimension_numbers = #tpu.dot_dimension_numbers<[1], [0], [0], [1], [0, 0, 1, 1], [], []>} : vector<8x256xbf16>, vector<256x1024xbf16>, vector<8x1024xf32> -> vector<8x1024xf32>
    %c0_12 = arith.constant 0 : index
    %c0_13 = arith.constant 0 : index
    %c0_14 = arith.constant 0 : index
    %17 = vector.load %arg1[%c0_12, %c0_13, %c0_14] : memref<1x8x32xf32, #tpu.memory_space<vmem>>, vector<1x8x32xf32>
    %18 = vector.shape_cast %17 : vector<1x8x32xf32> to vector<8x32xf32>
    %19 = arith.truncf %18 : vector<8x32xf32> to vector<8x32xbf16>
    %c0_15 = arith.constant 0 : index
    %c0_16 = arith.constant 0 : index
    %20 = vector.load %arg3[%c0_15, %c0_16] : memref<544x256xbf16, #tpu.memory_space<vmem>>, vector<32x256xbf16>
    %cst_17 = arith.constant dense<0.000000e+00> : vector<8x256xf32>
    %21 = tpu.matmul %19, %20, %cst_17 {dimension_numbers = #tpu.dot_dimension_numbers<[1], [0], [0], [1], [0, 0, 1, 1], [], []>} : vector<8x32xbf16>, vector<32x256xbf16>, vector<8x256xf32> -> vector<8x256xf32>
    %c0_18 = arith.constant 0 : index
    %c0_19 = arith.constant 0 : index
    %22 = vector.load %arg4[%c0_18, %c0_19] : memref<11x256xf32, #tpu.memory_space<vmem>>, vector<1x256xf32>
    %23 = vector.broadcast %22 : vector<1x256xf32> to vector<8x256xf32>
    %24 = arith.addf %21, %23 : vector<8x256xf32>
    %cst_20 = arith.constant 0.000000e+00 : f32
    %25 = vector.broadcast %cst_20 : f32 to vector<8x256xf32>
    %26 = arith.cmpf ogt, %24, %25 : vector<8x256xf32>
    %cst_21 = arith.constant 5.000000e-02 : f32
    %27 = vector.broadcast %cst_21 : f32 to vector<8x256xf32>
    %28 = arith.mulf %27, %24 : vector<8x256xf32>
    %29 = arith.select %26, %24, %28 : vector<8x256xi1>, vector<8x256xf32>
    %30 = arith.truncf %29 : vector<8x256xf32> to vector<8x256xbf16>
    %c32 = arith.constant 32 : index
    %c0_22 = arith.constant 0 : index
    %31 = vector.load %arg3[%c32, %c0_22] : memref<544x256xbf16, #tpu.memory_space<vmem>>, vector<256x256xbf16>
    %cst_23 = arith.constant dense<0.000000e+00> : vector<8x256xf32>
    %32 = tpu.matmul %30, %31, %cst_23 {dimension_numbers = #tpu.dot_dimension_numbers<[1], [0], [0], [1], [0, 0, 1, 1], [], []>} : vector<8x256xbf16>, vector<256x256xbf16>, vector<8x256xf32> -> vector<8x256xf32>
    %c1_24 = arith.constant 1 : index
    %c0_25 = arith.constant 0 : index
    %33 = vector.load %arg4[%c1_24, %c0_25] : memref<11x256xf32, #tpu.memory_space<vmem>>, vector<1x256xf32>
    %34 = vector.broadcast %33 : vector<1x256xf32> to vector<8x256xf32>
    %35 = arith.addf %32, %34 : vector<8x256xf32>
    %cst_26 = arith.constant 0.000000e+00 : f32
    %36 = vector.broadcast %cst_26 : f32 to vector<8x256xf32>
    %37 = arith.cmpf ogt, %35, %36 : vector<8x256xf32>
    %cst_27 = arith.constant 5.000000e-02 : f32
    %38 = vector.broadcast %cst_27 : f32 to vector<8x256xf32>
    %39 = arith.mulf %38, %35 : vector<8x256xf32>
    %40 = arith.select %37, %35, %39 : vector<8x256xi1>, vector<8x256xf32>
    %41 = arith.truncf %40 : vector<8x256xf32> to vector<8x256xbf16>
    %c0_28 = arith.constant 0 : index
    %c0_29 = arith.constant 0 : index
    %42 = vector.load %arg2[%c0_28, %c0_29] : memref<1024x1024xbf16, #tpu.memory_space<vmem>>, vector<256x1024xbf16>
    %cst_30 = arith.constant dense<0.000000e+00> : vector<8x1024xf32>
    %43 = tpu.matmul %41, %42, %cst_30 {dimension_numbers = #tpu.dot_dimension_numbers<[1], [0], [0], [1], [0, 0, 1, 1], [], []>} : vector<8x256xbf16>, vector<256x1024xbf16>, vector<8x1024xf32> -> vector<8x1024xf32>
    %44 = arith.addf %43, %13 : vector<8x1024xf32>
    %45 = vector.extract_strided_slice %44 {offsets = [0, 0], sizes = [8, 256], strides = [1, 1]} : vector<8x1024xf32> to vector<8x256xf32>
    %c2_31 = arith.constant 2 : index
    %c0_32 = arith.constant 0 : index
    %46 = vector.load %arg4[%c2_31, %c0_32] : memref<11x256xf32, #tpu.memory_space<vmem>>, vector<1x256xf32>
    %47 = vector.broadcast %46 : vector<1x256xf32> to vector<8x256xf32>
    %48 = arith.addf %45, %47 : vector<8x256xf32>
    %49 = arith.negf %48 : vector<8x256xf32>
    %50 = math.exp %49 : vector<8x256xf32>
    %cst_33 = arith.constant 1.000000e+00 : f32
    %51 = vector.broadcast %cst_33 : f32 to vector<8x256xf32>
    %52 = arith.addf %51, %50 : vector<8x256xf32>
    %53 = arith.divf %51, %52 : vector<8x256xf32>
    %54 = vector.extract_strided_slice %44 {offsets = [0, 256], sizes = [8, 256], strides = [1, 1]} : vector<8x1024xf32> to vector<8x256xf32>
    %c3_34 = arith.constant 3 : index
    %c0_35 = arith.constant 0 : index
    %55 = vector.load %arg4[%c3_34, %c0_35] : memref<11x256xf32, #tpu.memory_space<vmem>>, vector<1x256xf32>
    %56 = vector.broadcast %55 : vector<1x256xf32> to vector<8x256xf32>
    %57 = arith.addf %54, %56 : vector<8x256xf32>
    %58 = arith.negf %57 : vector<8x256xf32>
    %59 = math.exp %58 : vector<8x256xf32>
    %cst_36 = arith.constant 1.000000e+00 : f32
    %60 = vector.broadcast %cst_36 : f32 to vector<8x256xf32>
    %61 = arith.addf %60, %59 : vector<8x256xf32>
    %62 = arith.divf %60, %61 : vector<8x256xf32>
    %63 = vector.extract_strided_slice %44 {offsets = [0, 512], sizes = [8, 256], strides = [1, 1]} : vector<8x1024xf32> to vector<8x256xf32>
    %c4 = arith.constant 4 : index
    %c0_37 = arith.constant 0 : index
    %64 = vector.load %arg4[%c4, %c0_37] : memref<11x256xf32, #tpu.memory_space<vmem>>, vector<1x256xf32>
    %65 = vector.broadcast %64 : vector<1x256xf32> to vector<8x256xf32>
    %66 = arith.addf %63, %65 : vector<8x256xf32>
    %67 = math.tanh %66 : vector<8x256xf32>
    %68 = vector.extract_strided_slice %44 {offsets = [0, 768], sizes = [8, 256], strides = [1, 1]} : vector<8x1024xf32> to vector<8x256xf32>
    %c5 = arith.constant 5 : index
    %c0_38 = arith.constant 0 : index
    %69 = vector.load %arg4[%c5, %c0_38] : memref<11x256xf32, #tpu.memory_space<vmem>>, vector<1x256xf32>
    %70 = vector.broadcast %69 : vector<1x256xf32> to vector<8x256xf32>
    %71 = arith.addf %68, %70 : vector<8x256xf32>
    %72 = arith.negf %71 : vector<8x256xf32>
    %73 = math.exp %72 : vector<8x256xf32>
    %cst_39 = arith.constant 1.000000e+00 : f32
    %74 = vector.broadcast %cst_39 : f32 to vector<8x256xf32>
    %75 = arith.addf %74, %73 : vector<8x256xf32>
    %76 = arith.divf %74, %75 : vector<8x256xf32>
    %77 = arith.mulf %62, %8 : vector<8x256xf32>
    %78 = arith.mulf %53, %67 : vector<8x256xf32>
    %79 = arith.addf %77, %78 : vector<8x256xf32>
    %80 = math.tanh %79 : vector<8x256xf32>
    %81 = arith.mulf %76, %80 : vector<8x256xf32>
    %82 = arith.truncf %81 : vector<8x256xf32> to vector<8x256xbf16>
    %c512 = arith.constant 512 : index
    %c0_40 = arith.constant 0 : index
    %83 = vector.load %arg2[%c512, %c0_40] : memref<1024x1024xbf16, #tpu.memory_space<vmem>>, vector<256x1024xbf16>
    %cst_41 = arith.constant dense<0.000000e+00> : vector<8x1024xf32>
    %84 = tpu.matmul %82, %83, %cst_41 {dimension_numbers = #tpu.dot_dimension_numbers<[1], [0], [0], [1], [0, 0, 1, 1], [], []>} : vector<8x256xbf16>, vector<256x1024xbf16>, vector<8x1024xf32> -> vector<8x1024xf32>
    %85 = arith.addf %84, %16 : vector<8x1024xf32>
    %86 = vector.extract_strided_slice %85 {offsets = [0, 0], sizes = [8, 256], strides = [1, 1]} : vector<8x1024xf32> to vector<8x256xf32>
    %c6 = arith.constant 6 : index
    %c0_42 = arith.constant 0 : index
    %87 = vector.load %arg4[%c6, %c0_42] : memref<11x256xf32, #tpu.memory_space<vmem>>, vector<1x256xf32>
    %88 = vector.broadcast %87 : vector<1x256xf32> to vector<8x256xf32>
    %89 = arith.addf %86, %88 : vector<8x256xf32>
    %90 = arith.negf %89 : vector<8x256xf32>
    %91 = math.exp %90 : vector<8x256xf32>
    %cst_43 = arith.constant 1.000000e+00 : f32
    %92 = vector.broadcast %cst_43 : f32 to vector<8x256xf32>
    %93 = arith.addf %92, %91 : vector<8x256xf32>
    %94 = arith.divf %92, %93 : vector<8x256xf32>
    %95 = vector.extract_strided_slice %85 {offsets = [0, 256], sizes = [8, 256], strides = [1, 1]} : vector<8x1024xf32> to vector<8x256xf32>
    %c7 = arith.constant 7 : index
    %c0_44 = arith.constant 0 : index
    %96 = vector.load %arg4[%c7, %c0_44] : memref<11x256xf32, #tpu.memory_space<vmem>>, vector<1x256xf32>
    %97 = vector.broadcast %96 : vector<1x256xf32> to vector<8x256xf32>
    %98 = arith.addf %95, %97 : vector<8x256xf32>
    %99 = arith.negf %98 : vector<8x256xf32>
    %100 = math.exp %99 : vector<8x256xf32>
    %cst_45 = arith.constant 1.000000e+00 : f32
    %101 = vector.broadcast %cst_45 : f32 to vector<8x256xf32>
    %102 = arith.addf %101, %100 : vector<8x256xf32>
    %103 = arith.divf %101, %102 : vector<8x256xf32>
    %104 = vector.extract_strided_slice %85 {offsets = [0, 512], sizes = [8, 256], strides = [1, 1]} : vector<8x1024xf32> to vector<8x256xf32>
    %c8 = arith.constant 8 : index
    %c0_46 = arith.constant 0 : index
    %105 = vector.load %arg4[%c8, %c0_46] : memref<11x256xf32, #tpu.memory_space<vmem>>, vector<1x256xf32>
    %106 = vector.broadcast %105 : vector<1x256xf32> to vector<8x256xf32>
    %107 = arith.addf %104, %106 : vector<8x256xf32>
    %108 = math.tanh %107 : vector<8x256xf32>
    %109 = vector.extract_strided_slice %85 {offsets = [0, 768], sizes = [8, 256], strides = [1, 1]} : vector<8x1024xf32> to vector<8x256xf32>
    %c9 = arith.constant 9 : index
    %c0_47 = arith.constant 0 : index
    %110 = vector.load %arg4[%c9, %c0_47] : memref<11x256xf32, #tpu.memory_space<vmem>>, vector<1x256xf32>
    %111 = vector.broadcast %110 : vector<1x256xf32> to vector<8x256xf32>
    %112 = arith.addf %109, %111 : vector<8x256xf32>
    %113 = arith.negf %112 : vector<8x256xf32>
    %114 = math.exp %113 : vector<8x256xf32>
    %cst_48 = arith.constant 1.000000e+00 : f32
    %115 = vector.broadcast %cst_48 : f32 to vector<8x256xf32>
    %116 = arith.addf %115, %114 : vector<8x256xf32>
    %117 = arith.divf %115, %116 : vector<8x256xf32>
    %118 = arith.mulf %103, %10 : vector<8x256xf32>
    %119 = arith.mulf %94, %108 : vector<8x256xf32>
    %120 = arith.addf %118, %119 : vector<8x256xf32>
    %121 = math.tanh %120 : vector<8x256xf32>
    %122 = arith.mulf %117, %121 : vector<8x256xf32>
    %123 = arith.truncf %122 : vector<8x256xf32> to vector<8x256xbf16>
    %c288 = arith.constant 288 : index
    %c0_49 = arith.constant 0 : index
    %124 = vector.load %arg3[%c288, %c0_49] : memref<544x256xbf16, #tpu.memory_space<vmem>>, vector<256x256xbf16>
    %cst_50 = arith.constant dense<0.000000e+00> : vector<8x256xf32>
    %125 = tpu.matmul %123, %124, %cst_50 {dimension_numbers = #tpu.dot_dimension_numbers<[1], [0], [0], [1], [0, 0, 1, 1], [], []>} : vector<8x256xbf16>, vector<256x256xbf16>, vector<8x256xf32> -> vector<8x256xf32>
    %c10 = arith.constant 10 : index
    %c0_51 = arith.constant 0 : index
    %126 = vector.load %arg4[%c10, %c0_51] : memref<11x256xf32, #tpu.memory_space<vmem>>, vector<1x256xf32>
    %127 = vector.broadcast %126 : vector<1x256xf32> to vector<8x256xf32>
    %128 = arith.addf %125, %127 : vector<8x256xf32>
    %c0_52 = arith.constant 0 : index
    %c0_53 = arith.constant 0 : index
    %c0_54 = arith.constant 0 : index
    %129 = vector.load %arg6[%c0_52, %c0_53, %c0_54] : memref<1x8x256xf32, #tpu.memory_space<vmem>>, vector<1x8x256xf32>
    %130 = vector.shape_cast %129 : vector<1x8x256xf32> to vector<8x256xf32>
    %131 = vector.shape_cast %128 : vector<8x256xf32> to vector<1x8x256xf32>
    tpu.vector_store %arg6[%c0_52, %c0_53, %c0_54], %131 {strides = array<i32>} : memref<1x8x256xf32, #tpu.memory_space<vmem>>, vector<1x8x256xf32>,
    %c0_55 = arith.constant 0 : index
    %c0_56 = arith.constant 0 : index
    %c0_57 = arith.constant 0 : index
    %132 = vector.load %arg7[%c0_55, %c0_56, %c0_57] : memref<4x8x256xf32, #tpu.memory_space<vmem>>, vector<1x8x256xf32>
    %133 = vector.shape_cast %132 : vector<1x8x256xf32> to vector<8x256xf32>
    %134 = vector.shape_cast %81 : vector<8x256xf32> to vector<1x8x256xf32>
    tpu.vector_store %arg7[%c0_55, %c0_56, %c0_57], %134 {strides = array<i32>} : memref<4x8x256xf32, #tpu.memory_space<vmem>>, vector<1x8x256xf32>,
    %c1_58 = arith.constant 1 : index
    %c0_59 = arith.constant 0 : index
    %c0_60 = arith.constant 0 : index
    %135 = vector.load %arg7[%c1_58, %c0_59, %c0_60] : memref<4x8x256xf32, #tpu.memory_space<vmem>>, vector<1x8x256xf32>
    %136 = vector.shape_cast %135 : vector<1x8x256xf32> to vector<8x256xf32>
    %137 = vector.shape_cast %122 : vector<8x256xf32> to vector<1x8x256xf32>
    tpu.vector_store %arg7[%c1_58, %c0_59, %c0_60], %137 {strides = array<i32>} : memref<4x8x256xf32, #tpu.memory_space<vmem>>, vector<1x8x256xf32>,
    %c2_61 = arith.constant 2 : index
    %c0_62 = arith.constant 0 : index
    %c0_63 = arith.constant 0 : index
    %138 = vector.load %arg7[%c2_61, %c0_62, %c0_63] : memref<4x8x256xf32, #tpu.memory_space<vmem>>, vector<1x8x256xf32>
    %139 = vector.shape_cast %138 : vector<1x8x256xf32> to vector<8x256xf32>
    %140 = vector.shape_cast %79 : vector<8x256xf32> to vector<1x8x256xf32>
    tpu.vector_store %arg7[%c2_61, %c0_62, %c0_63], %140 {strides = array<i32>} : memref<4x8x256xf32, #tpu.memory_space<vmem>>, vector<1x8x256xf32>,
    %c3_64 = arith.constant 3 : index
    %c0_65 = arith.constant 0 : index
    %c0_66 = arith.constant 0 : index
    %141 = vector.load %arg7[%c3_64, %c0_65, %c0_66] : memref<4x8x256xf32, #tpu.memory_space<vmem>>, vector<1x8x256xf32>
    %142 = vector.shape_cast %141 : vector<1x8x256xf32> to vector<8x256xf32>
    %143 = vector.shape_cast %120 : vector<8x256xf32> to vector<1x8x256xf32>
    tpu.vector_store %arg7[%c3_64, %c0_65, %c0_66], %143 {strides = array<i32>} : memref<4x8x256xf32, #tpu.memory_space<vmem>>, vector<1x8x256xf32>,
    return
  }
  func.func @transform_0(%arg0: i32) -> (i32, i32, i32) {
    %c0_i32 = arith.constant 0 : i32
    %c0_i32_0 = arith.constant 0 : i32
    %c0_i32_1 = arith.constant 0 : i32
    return %arg0, %c0_i32, %c0_i32_0 : i32, i32, i32
  }
  func.func @transform_1(%arg0: i32) -> (i32, i32) {
    %c0_i32 = arith.constant 0 : i32
    %c0_i32_0 = arith.constant 0 : i32
    %c0_i32_1 = arith.constant 0 : i32
    return %c0_i32, %c0_i32_0 : i32, i32
  }
  func.func @transform_2(%arg0: i32) -> (i32, i32) {
    %c0_i32 = arith.constant 0 : i32
    %c0_i32_0 = arith.constant 0 : i32
    %c0_i32_1 = arith.constant 0 : i32
    return %c0_i32, %c0_i32_0 : i32, i32
  }
  func.func @transform_3(%arg0: i32) -> (i32, i32) {
    %c0_i32 = arith.constant 0 : i32
    %c0_i32_0 = arith.constant 0 : i32
    %c0_i32_1 = arith.constant 0 : i32
    return %c0_i32, %c0_i32_0 : i32, i32
  }
  func.func @transform_4(%arg0: i32) -> (i32, i32, i32) {
    %c0_i32 = arith.constant 0 : i32
    %c0_i32_0 = arith.constant 0 : i32
    %c0_i32_1 = arith.constant 0 : i32
    %c0_i32_2 = arith.constant 0 : i32
    return %c0_i32, %c0_i32_0, %c0_i32_1 : i32, i32, i32
  }
  func.func @transform_5(%arg0: i32) -> (i32, i32, i32) {
    %c0_i32 = arith.constant 0 : i32
    %c0_i32_0 = arith.constant 0 : i32
    %c0_i32_1 = arith.constant 0 : i32
    return %arg0, %c0_i32, %c0_i32_0 : i32, i32, i32
  }
  func.func @transform_6(%arg0: i32) -> (i32, i32, i32) {
    %c0_i32 = arith.constant 0 : i32
    %c0_i32_0 = arith.constant 0 : i32
    %c0_i32_1 = arith.constant 0 : i32
    %c0_i32_2 = arith.constant 0 : i32
    return %c0_i32, %c0_i32_0, %c0_i32_1 : i32, i32, i32
  }
}

</mosaic_0001>

<bundles_post_ra>
// kernel: tpu_custom_call.1
= control target key start
LH: loop header
LB: loop body
LE: loop exit
PB: predicated region body
PF: predicated region fallthrough
CT: control target
= control target key end

     0   :  { %12 = vsyncpa [#allocation3], 0  ;;  %s8685_s0 = inlined_call_operand.hbm [shape: f32[1,8,32], index: 0, kind: input, shape index: {}]   ;;  %s8686_s1 = inlined_call_operand.hbm [shape: bf16[1024,1024], index: 1, kind: input, shape index: {}]   ;;  %s8687_s2 = inlined_call_operand.hbm [shape: bf16[544,256], index: 2, kind: input, shape index: {}]   ;;  %s8688_s3 = inlined_call_operand.hbm [shape: f32[11,256], index: 3, kind: input, shape index: {}]   ;;  %s8689_s4 = inlined_call_operand.hbm [shape: f32[4,1,256], index: 4, kind: input, shape index: {}]   ;;  %s8690_s5 = inlined_call_operand.hbm [shape: f32[1,8,256], index: 5, kind: output, shape index: {0}]   ;;  %s8691_s6 = inlined_call_operand.hbm [shape: f32[4,8,256], index: 6, kind: output, shape index: {1}]  }
   0x1   :  { %13 = vsyncpa [#allocation6], 0 }
   0x2   :  { %14 = vsyncpa [#allocation9], 0 }
   0x3   :  { %15 = vsyncpa [#allocation4], 0  ;;  %s32_s23 = sshll.u32 %s8686_s1, 4  ;;  %s33_s23 = int_to_ptr.hbm [resolvable:$true] %s32_s23 }
   0x4   :  { %16 = vsyncpa [#allocation13], 0  ;;  %s8187_s24 = smov [#allocation5]   ;;  %s58_s28 = sshll.u32 %s8688_s3, 4  ;;  %s59_s28 = int_to_ptr.hbm [resolvable:$true] %s58_s28 }
   0x5   :  { %s34_s25 = sshll.u32 %s8187_s24, 4  ;;  %s8188_s29 = smov 512   ;;  %s35_s25 = int_to_ptr.vmem [resolvable:$true] %s34_s25 }
   0x6   :  { %s8189_s30 = smov 32   ;;  %s8190_s7 = smov [#allocation8]  }
   0x7   :  { %40 = dma.hbm_to_vmem [thread:$0]  %s33_s23, 65536, %s35_s25, [#allocation6], %s8188_s29, %s8188_s29, %s8189_s30  }
   0x8   :  { %s60_s8 = sshll.u32 %s8190_s7, 4  ;;  %s8191_s9 = smov 256   ;;  %s61_s8 = int_to_ptr.vmem [resolvable:$true] %s60_s8 }
   0x9   :  { %s8192_s10 = smov 16   ;;  %s22_s12 = sshll.u32 %s8685_s0, 4  ;;  %s23_s12 = int_to_ptr.hbm [resolvable:$true] %s22_s12 }
   0xa   :  { %66 = dma.hbm_to_vmem [thread:$0]  %s59_s28, 512, %s61_s8, [#allocation9], %s8191_s9, %s8191_s9, %s8192_s10  }
   0xb   :  { %s8193_s3 = smov [#allocation2]   ;;  %s45_s16 = sshll.u32 %s8687_s2, 4  ;;  %s46_s16 = int_to_ptr.hbm [resolvable:$true] %s45_s16 }
   0xc   :  { %s24_s13 = sshll.u32 %s8193_s3, 4  ;;  %s8194_s17 = smov [#allocation7]   ;;  %s25_s13 = int_to_ptr.vmem [resolvable:$true] %s24_s13 }
   0xd   :  { %27 = dma.hbm_to_vmem [thread:$0]  %s23_s12, 128, %s25_s13, [#allocation3]  }
   0xe   :  { %s47_s18 = sshll.u32 %s8194_s17, 4  ;;  %s8195_s19 = smov 128   ;;  %s48_s18 = int_to_ptr.vmem [resolvable:$true] %s47_s18 }
   0xf   :  { %s8196_s20 = smov 8   ;;  %s71_s0 = sshll.u32 %s8689_s4, 4  ;;  %s72_s0 = int_to_ptr.hbm [resolvable:$true] %s71_s0 }
  0x10   :  { %53 = dma.hbm_to_vmem [thread:$0]  %s46_s16, 8704, %s48_s18, [#allocation6], %s8195_s19, %s8195_s19, %s8196_s20  }
  0x11   :  { %s8197_s23 = smov [#allocation10]   ;;  %s8198_s25 = smov 2  }
  0x12   :  { %s73_s24 = sshll.u32 %s8197_s23, 4  ;;  %s74_s24 = int_to_ptr.vmem [resolvable:$true] %s73_s24 }
  0x13   :  { %79 = dma.hbm_to_vmem [thread:$0]  %s72_s0, 128, %s74_s24, [#allocation9], %s8189_s30, %s8189_s30, %s8198_s25  }
  0x14   :  { %8177 = dma.done.wait [#allocation3], 128  }
  0x15   :  { %8178 = vsyncadd [#allocation3], 4294967168 }
  0x16   :  { %8179 = dma.done.wait [#allocation6], 74240  }
  0x17   :  { %8180 = vsyncadd [#allocation6], 4294893056 }
  0x18   :  { %8181 = dma.done.wait [#allocation9], 640  }
  0x19   :  { %8182 = vsyncadd [#allocation9], 4294966656  ;;  %v5243_v0 = vld [vmem:[#allocation5 + $0x5c0] sm:$0xf]  ;;  %v5251_v47 = vld [vmem:[#allocation5 + $0x5c8] sm:$0xf] }
  0x1a   :  { %v7411_v1 = vld [vmem:[#allocation5 + $0x5dc] sm:$0xf0]  ;;  %v7412_v48 = vld [vmem:[#allocation5 + $0x5e4] sm:$0xf0]  ;;  %vm2142_vm0 = vcmask 261120   ;;  %s8199_s2 = smov [#allocation12]  }
  0x1b   :  { %v5499_v2 = vld [vmem:[#allocation5 + $0x7c0] sm:$0xf]  ;;  %v5244_v3 = vor.u32 %v7411_v1, %v5243_v0  ;;  %v5507_v49 = vld [vmem:[#allocation5 + $0x7c8] sm:$0xf]  ;;  %v5252_v55 = vor.u32 %v7412_v48, %v5251_v47  ;;  %s4995_s4 = sshll.u32 %s8199_s2, 4  ;;  %s4997_s28 = sshll.u32 %s8691_s6, 4  ;;  %s4996_s4 = int_to_ptr.vmem [resolvable:$true] %s4995_s4  ;;  %s4998_s28 = int_to_ptr.hbm [resolvable:$true] %s4997_s28 }
  0x1c   :  { %v7475_v4 = vld [vmem:[#allocation5 + $0x7dc] sm:$0xf0]  ;;  %v7476_v50 = vld [vmem:[#allocation5 + $0x7e4] sm:$0xf0]  ;;  %s8200_s29 = smov [#allocation11]   ;;  %s4987_s8 = sshll.u32 %s8690_s5, 4  ;;  %s4988_s8 = int_to_ptr.hbm [resolvable:$true] %s4987_s8 }
  0x1d   :  { %v5211_v5 = vld [vmem:[#allocation5 + $0x580] sm:$0xf]  ;;  %v5500_v7 = vor.u32 %v7475_v4, %v5499_v2  ;;  %924 = vmatpush.bf16.msra.mxu0 %v5244_v3  ;;  %v5508_v56 = vor.u32 %v7476_v50, %v5507_v49  ;;  %v5219_v57 = vld [vmem:[#allocation5 + $0x588] sm:$0xf]  ;;  %v5195_v49 = vld [vmem:[#allocation5 + $0x550] sm:$0xf] }
  0x1e   :  { %v7403_v6 = vld [vmem:[#allocation5 + $0x59c] sm:$0xf0]  ;;  %v7404_v58 = vld [vmem:[#allocation5 + $0x5a4] sm:$0xf0]  ;;  %v7397_v50 = vld [vmem:[#allocation5 + $0x56c] sm:$0xf0] }
  0x1f   :  { %v5467_v8 = vld [vmem:[#allocation5 + $0x780] sm:$0xf]  ;;  %v5212_v10 = vor.u32 %v7403_v6, %v5211_v5  ;;  %937 = vmatpush.bf16.msra.mxu1 %v5500_v7  ;;  %v5475_v59 = vld [vmem:[#allocation5 + $0x788] sm:$0xf]  ;;  %v5220_v63 = vor.u32 %v7404_v58, %v5219_v57  ;;  %v5419_v57 = vld [vmem:[#allocation5 + $0x710] sm:$0xf] }
  0x20   :  { %v7467_v9 = vld [vmem:[#allocation5 + $0x79c] sm:$0xf0]  ;;  %v7468_v60 = vld [vmem:[#allocation5 + $0x7a4] sm:$0xf0]  ;;  %v7453_v58 = vld [vmem:[#allocation5 + $0x72c] sm:$0xf0] }
  0x21   :  { %v5468_v11 = vor.u32 %v7467_v9, %v5467_v8  ;;  %v5179_v12 = vld [vmem:[#allocation5 + $0x540] sm:$0xf]  ;;  %925 = vmatpush.bf16.msra.mxu0 %v5212_v10  ;;  %v5476_v0 = vor.u32 %v7468_v60, %v5475_v59  ;;  %v5187_v1 = vld [vmem:[#allocation5 + $0x548] sm:$0xf]  ;;  %v5420_v60 = vor.u32 %v7453_v58, %v5419_v57  ;;  %v7391_v57 = vld [vmem:[#allocation5 + $0x544] sm:$0xf] }
  0x22   :  { %v7395_v13 = vld [vmem:[#allocation5 + $0x55c] sm:$0xf0]  ;;  %v7396_v2 = vld [vmem:[#allocation5 + $0x564] sm:$0xf0]  ;;  %v5181_v58 = vld [vmem:[#allocation5 + $0x560] sm:$0xf0] }
  0x23   :  { %v5435_v14 = vld [vmem:[#allocation5 + $0x740] sm:$0xf]  ;;  %v5180_v16 = vor.u32 %v7395_v13, %v5179_v12  ;;  %938 = vmatpush.bf16.msra.mxu1 %v5468_v11  ;;  %v5443_v3 = vld [vmem:[#allocation5 + $0x748] sm:$0xf]  ;;  %v5188_v5 = vor.u32 %v7396_v2, %v5187_v1  ;;  %v5387_v1 = vld [vmem:[#allocation5 + $0x6d0] sm:$0xf] }
  0x24   :  { %v7459_v15 = vld [vmem:[#allocation5 + $0x75c] sm:$0xf0]  ;;  %v7460_v4 = vld [vmem:[#allocation5 + $0x764] sm:$0xf0]  ;;  %v7445_v2 = vld [vmem:[#allocation5 + $0x6ec] sm:$0xf0] }
  0x25   :  { %v5436_v17 = vor.u32 %v7459_v15, %v5435_v14  ;;  %v5147_v18 = vld [vmem:[#allocation5 + $0x500] sm:$0xf]  ;;  %926 = vmatpush.bf16.msra.mxu0 %v5180_v16  ;;  %v5444_v6 = vor.u32 %v7460_v4, %v5443_v3  ;;  %v5155_v7 = vld [vmem:[#allocation5 + $0x508] sm:$0xf]  ;;  %v5388_v4 = vor.u32 %v7445_v2, %v5387_v1  ;;  %v5139_v1 = vld [vmem:[#allocation5 + $0x4d8] sm:$0xf] }
  0x26   :  { %v7387_v19 = vld [vmem:[#allocation5 + $0x51c] sm:$0xf0]  ;;  %v7388_v8 = vld [vmem:[#allocation5 + $0x524] sm:$0xf0]  ;;  %s4985_s30 = sshll.u32 %s8200_s29, 4  ;;  %s4986_s30 = int_to_ptr.vmem [resolvable:$true] %s4985_s30 }
  0x27   :  { %v5403_v20 = vld [vmem:[#allocation5 + $0x700] sm:$0xf]  ;;  %v5148_v22 = vor.u32 %v7387_v19, %v5147_v18  ;;  %939 = vmatpush.bf16.msra.mxu1 %v5436_v17  ;;  %v5411_v9 = vld [vmem:[#allocation5 + $0x708] sm:$0xf]  ;;  %v5156_v11 = vor.u32 %v7388_v8, %v5155_v7  ;;  %v5355_v7 = vld [vmem:[#allocation5 + $0x690] sm:$0xf] }
  0x28   :  { %v7451_v21 = vld [vmem:[#allocation5 + $0x71c] sm:$0xf0]  ;;  %v7452_v10 = vld [vmem:[#allocation5 + $0x724] sm:$0xf0]  ;;  %v7437_v8 = vld [vmem:[#allocation5 + $0x6ac] sm:$0xf0] }
  0x29   :  { %v5404_v23 = vor.u32 %v7451_v21, %v5403_v20  ;;  %v5115_v24 = vld [vmem:[#allocation5 + $0x4c0] sm:$0xf]  ;;  %927 = vmatpush.bf16.msra.mxu0 %v5148_v22  ;;  %v5412_v12 = vor.u32 %v7452_v10, %v5411_v9  ;;  %v5123_v13 = vld [vmem:[#allocation5 + $0x4c8] sm:$0xf]  ;;  %v5356_v10 = vor.u32 %v7437_v8, %v5355_v7  ;;  %v7383_v7 = vld [vmem:[#allocation5 + $0x504] sm:$0xf] }
  0x2a   :  { %v7379_v25 = vld [vmem:[#allocation5 + $0x4dc] sm:$0xf0]  ;;  %v7380_v14 = vld [vmem:[#allocation5 + $0x4e4] sm:$0xf0]  ;;  %v5149_v8 = vld [vmem:[#allocation5 + $0x520] sm:$0xf0] }
  0x2b   :  { %v5371_v26 = vld [vmem:[#allocation5 + $0x6c0] sm:$0xf]  ;;  %v5116_v28 = vor.u32 %v7379_v25, %v5115_v24  ;;  %940 = vmatpush.bf16.msra.mxu1 %v5404_v23  ;;  %v5379_v15 = vld [vmem:[#allocation5 + $0x6c8] sm:$0xf]  ;;  %v5124_v17 = vor.u32 %v7380_v14, %v5123_v13  ;;  %v5323_v13 = vld [vmem:[#allocation5 + $0x650] sm:$0xf] }
  0x2c   :  { %v7443_v27 = vld [vmem:[#allocation5 + $0x6dc] sm:$0xf0]  ;;  %v7444_v16 = vld [vmem:[#allocation5 + $0x6e4] sm:$0xf0]  ;;  %v7429_v14 = vld [vmem:[#allocation5 + $0x66c] sm:$0xf0] }
  0x2d   :  { %v5372_v29 = vor.u32 %v7443_v27, %v5371_v26  ;;  %v5083_v30 = vld [vmem:[#allocation5 + $0x480] sm:$0xf]  ;;  %928 = vmatpush.bf16.msra.mxu0 %v5116_v28  ;;  %v5380_v18 = vor.u32 %v7444_v16, %v5379_v15  ;;  %v5091_v19 = vld [vmem:[#allocation5 + $0x488] sm:$0xf]  ;;  %v5324_v16 = vor.u32 %v7429_v14, %v5323_v13  ;;  %v5107_v13 = vld [vmem:[#allocation5 + $0x498] sm:$0xf] }
  0x2e   :  { %v7371_v31 = vld [vmem:[#allocation5 + $0x49c] sm:$0xf0]  ;;  %v7372_v20 = vld [vmem:[#allocation5 + $0x4a4] sm:$0xf0] }
  0x2f   :  { %v5339_v32 = vld [vmem:[#allocation5 + $0x680] sm:$0xf]  ;;  %v5084_v34 = vor.u32 %v7371_v31, %v5083_v30  ;;  %941 = vmatpush.bf16.msra.mxu1 %v5372_v29  ;;  %v5347_v21 = vld [vmem:[#allocation5 + $0x688] sm:$0xf]  ;;  %v5092_v23 = vor.u32 %v7372_v20, %v5091_v19  ;;  %v5291_v19 = vld [vmem:[#allocation5 + $0x610] sm:$0xf] }
  0x30   :  { %v7435_v33 = vld [vmem:[#allocation5 + $0x69c] sm:$0xf0]  ;;  %v7436_v22 = vld [vmem:[#allocation5 + $0x6a4] sm:$0xf0]  ;;  %v7421_v20 = vld [vmem:[#allocation5 + $0x62c] sm:$0xf0] }
  0x31   :  { %v5340_v35 = vor.u32 %v7435_v33, %v5339_v32  ;;  %v5051_v36 = vld [vmem:[#allocation5 + $0x440] sm:$0xf]  ;;  %929 = vmatpush.bf16.msra.mxu0 %v5084_v34  ;;  %v5348_v24 = vor.u32 %v7436_v22, %v5347_v21  ;;  %v5059_v25 = vld [vmem:[#allocation5 + $0x448] sm:$0xf]  ;;  %v5267_v21 = vld [vmem:[#allocation5 + $0x5d8] sm:$0xf] }
  0x32   :  { %v7363_v37 = vld [vmem:[#allocation5 + $0x45c] sm:$0xf0]  ;;  %v7364_v26 = vld [vmem:[#allocation5 + $0x464] sm:$0xf0]  ;;  %v7414_v22 = vld [vmem:[#allocation5 + $0x5f4] sm:$0xf0] }
  0x33   :  { %v5307_v38 = vld [vmem:[#allocation5 + $0x640] sm:$0xf]  ;;  %v5052_v40 = vor.u32 %v7363_v37, %v5051_v36  ;;  %942 = vmatpush.bf16.msra.mxu1 %v5340_v35  ;;  %v5315_v27 = vld [vmem:[#allocation5 + $0x648] sm:$0xf]  ;;  %v5060_v29 = vor.u32 %v7364_v26, %v5059_v25  ;;  %v5259_v35 = vld [vmem:[#allocation5 + $0x5d0] sm:$0xf]  ;;  %v5292_v26 = vor.u32 %v7421_v20, %v5291_v19 }
  0x34   :  { %v7427_v39 = vld [vmem:[#allocation5 + $0x65c] sm:$0xf0]  ;;  %v7428_v28 = vld [vmem:[#allocation5 + $0x664] sm:$0xf0]  ;;  %v7413_v36 = vld [vmem:[#allocation5 + $0x5ec] sm:$0xf0] }
  0x35   :  { %v105_v41 = vld [vmem:[#allocation10] sm:$0x3]  ;;  %v5308_v42 = vor.u32 %v7427_v39, %v5307_v38  ;;  %930 = vmatpush.bf16.msra.mxu0 %v5052_v40  ;;  %v5316_v30 = vor.u32 %v7428_v28, %v5315_v27  ;;  %v5027_v31 = vld [vmem:[#allocation5 + $0x408] sm:$0xf]  ;;  %v5515_v37 = vld [vmem:[#allocation5 + $0x7d0] sm:$0xf]  ;;  %v5268_v27 = vor.u32 %v7414_v22, %v5267_v21 }
  0x36   :  { %v5019_v43 = vld [vmem:[#allocation5 + $0x400] sm:$0xf]  ;;  %v107_v51 = vperm.slane %v105_v41, 0  ;;  %v108_v53 = vperm.slane %v105_v41, 1  ;;  %v7356_v32 = vld [vmem:[#allocation5 + $0x424] sm:$0xf0]  ;;  %v5260_v41 = vor.u32 %v7413_v36, %v5259_v35 }
  0x37   :  { %v7355_v44 = vld [vmem:[#allocation5 + $0x41c] sm:$0xf0]  ;;  %943 = vmatpush.bf16.msra.mxu1 %v5308_v42  ;;  %v5283_v33 = vld [vmem:[#allocation5 + $0x608] sm:$0xf]  ;;  %v7477_v38 = vld [vmem:[#allocation5 + $0x7ec] sm:$0xf0]  ;;  %v5028_v39 = vor.u32 %v7356_v32, %v5027_v31 }
  0x38   :  { %v5275_v45 = vld [vmem:[#allocation5 + $0x600] sm:$0xf]  ;;  %v5020_v52 = vor.u32 %v7355_v44, %v5019_v43  ;;  %v8257_v61 = vpack.c.bf16 %v107_v51, %v107_v51  ;;  %v8259_v62 = vpack.c.bf16 %v108_v53, %v108_v53  ;;  %v7420_v34 = vld [vmem:[#allocation5 + $0x624] sm:$0xf0]  ;;  %v5516_v42 = vor.u32 %v7477_v38, %v5515_v37  ;;  %v5227_v43 = vld [vmem:[#allocation5 + $0x590] sm:$0xf] }
  0x39   :  { %v7419_v46 = vld [vmem:[#allocation5 + $0x61c] sm:$0xf0]  ;;  %v5284_v40 = vor.u32 %v7420_v34, %v5283_v33  ;;  %v7405_v44 = vld [vmem:[#allocation5 + $0x5ac] sm:$0xf0]  ;;  %v5196_v53 = vor.u32 %v7397_v50, %v5195_v49  ;;  %v5235_v28 = vld [vmem:[#allocation5 + $0x598] sm:$0xf] }
  0x3a   :  { %v5276_v54 = vor.u32 %v7419_v46, %v5275_v45  ;;  %931 = vmatpush.bf16.msra.mxu0 %v5020_v52  ;;  %v5483_v45 = vld [vmem:[#allocation5 + $0x790] sm:$0xf]  ;;  %v5228_v47 = vor.u32 %v7405_v44, %v5227_v43  ;;  %v5491_v31 = vld [vmem:[#allocation5 + $0x798] sm:$0xf]  ;;  %v7407_v33 = vld [vmem:[#allocation5 + $0x5c4] sm:$0xf] }
  0x3b   :  { %v7469_v46 = vld [vmem:[#allocation5 + $0x7ac] sm:$0xf0]  ;;  %v7470_v32 = vld [vmem:[#allocation5 + $0x7b4] sm:$0xf0]  ;;  %v5245_v34 = vld [vmem:[#allocation5 + $0x5e0] sm:$0xf0] }
  0x3c   :  { %944 = vmatpush.bf16.msra.mxu1 %v5276_v54  ;;  %v5484_v48 = vor.u32 %v7469_v46, %v5483_v45  ;;  %v5451_v51 = vld [vmem:[#allocation5 + $0x750] sm:$0xf]  ;;  %v7471_v35 = vld [vmem:[#allocation5 + $0x7c4] sm:$0xf]  ;;  %v5248_v36 = vor.u32 %v7407_v33, %v5245_v34  ;;  %v5459_v43 = vld [vmem:[#allocation5 + $0x758] sm:$0xf] }
  0x3d   :  { %932 = vmatmul.bf16.vlgmr.msra.gmra.mxu0 %v8257_v61  ;;  %v7461_v52 = vld [vmem:[#allocation5 + $0x76c] sm:$0xf0]  ;;  %v5501_v37 = vld [vmem:[#allocation5 + $0x7e0] sm:$0xf0]  ;;  %v7462_v44 = vld [vmem:[#allocation5 + $0x774] sm:$0xf0] }
  0x3e   :  { %976 = vmatpush.bf16.msrb.mxu0 %v5252_v55  ;;  %v5452_v54 = vor.u32 %v7461_v52, %v5451_v51  ;;  %v5163_v55 = vld [vmem:[#allocation5 + $0x510] sm:$0xf]  ;;  %950 = vmatpush.bf16.msra.mxu2 %v5248_v36  ;;  %v7399_v45 = vld [vmem:[#allocation5 + $0x584] sm:$0xf]  ;;  %v5171_v51 = vld [vmem:[#allocation5 + $0x518] sm:$0xf] }
  0x3f   :  { %945 = vmatmul.bf16.vlgmr.msra.gmra.mxu1 %v8259_v62  ;;  %v5213_v46 = vld [vmem:[#allocation5 + $0x5a0] sm:$0xf0] }
  0x40   :  { %989 = vmatpush.bf16.msrb.mxu1 %v5508_v56  ;;  %v7389_v56 = vld [vmem:[#allocation5 + $0x52c] sm:$0xf0]  ;;  %v5469_v49 = vld [vmem:[#allocation5 + $0x7a0] sm:$0xf0] }
  0x41   :  { %v5164_v59 = vor.u32 %v7389_v56, %v5163_v55  ;;  %v5427_v55 = vld [vmem:[#allocation5 + $0x718] sm:$0xf]  ;;  %v7375_v19 = vld [vmem:[#allocation5 + $0x4c4] sm:$0xf] }
  0x42   :  { %977 = vmatpush.bf16.msrb.mxu0 %v5220_v63  ;;  %v5131_v63 = vld [vmem:[#allocation5 + $0x4d0] sm:$0xf]  ;;  %v7454_v56 = vld [vmem:[#allocation5 + $0x734] sm:$0xf0]  ;;  %v5117_v20 = vld [vmem:[#allocation5 + $0x4e0] sm:$0xf0] }
  0x43   :  { %v7439_v21 = vld [vmem:[#allocation5 + $0x6c4] sm:$0xf]  ;;  %v5120_v22 = vor.u32 %v7375_v19, %v5117_v20  ;;  %v7464_v19 = vld [vmem:[#allocation5 + $0x78c] sm:$0xf] }
  0x44   :  { %990 = vmatpush.bf16.msrb.mxu1 %v5476_v0  ;;  %v7381_v0 = vld [vmem:[#allocation5 + $0x4ec] sm:$0xf0]  ;;  %v7431_v33 = vld [vmem:[#allocation5 + $0x684] sm:$0xf] }
  0x45   :  { %v5132_v3 = vor.u32 %v7381_v0, %v5131_v63  ;;  %v5437_v63 = vld [vmem:[#allocation5 + $0x760] sm:$0xf0] }
  0x46   :  { %978 = vmatpush.bf16.msrb.mxu0 %v5188_v5  ;;  %v5099_v5 = vld [vmem:[#allocation5 + $0x490] sm:$0xf] }
  0x48   :  { %991 = vmatpush.bf16.msrb.mxu1 %v5444_v6  ;;  %v7373_v6 = vld [vmem:[#allocation5 + $0x4ac] sm:$0xf0] }
  0x49   :  { %v5100_v9 = vor.u32 %v7373_v6, %v5099_v5  ;;  %v5395_v5 = vld [vmem:[#allocation5 + $0x6d8] sm:$0xf] }
  0x4a   :  { %979 = vmatpush.bf16.msrb.mxu0 %v5156_v11  ;;  %v5067_v11 = vld [vmem:[#allocation5 + $0x450] sm:$0xf]  ;;  %v7446_v6 = vld [vmem:[#allocation5 + $0x6f4] sm:$0xf0] }
  0x4c   :  { %992 = vmatpush.bf16.msrb.mxu1 %v5412_v12  ;;  %v7365_v12 = vld [vmem:[#allocation5 + $0x46c] sm:$0xf0] }
  0x4d   :  { %v5068_v15 = vor.u32 %v7365_v12, %v5067_v11  ;;  %v5405_v11 = vld [vmem:[#allocation5 + $0x720] sm:$0xf0] }
  0x4e   :  { %980 = vmatpush.bf16.msrb.mxu0 %v5124_v17  ;;  %v5035_v17 = vld [vmem:[#allocation5 + $0x410] sm:$0xf] }
  0x50   :  { %993 = vmatpush.bf16.msrb.mxu1 %v5380_v18  ;;  %v7357_v18 = vld [vmem:[#allocation5 + $0x42c] sm:$0xf0] }
  0x51   :  { %v5036_v25 = vor.u32 %v7357_v18, %v5035_v17  ;;  %v5363_v17 = vld [vmem:[#allocation5 + $0x698] sm:$0xf] }
  0x52   :  { %981 = vmatpush.bf16.msrb.mxu0 %v5092_v23  ;;  %v5523_v23 = vld [vmem:[#allocation5 + $0x7d8] sm:$0xf] }
  0x53   :  { %v7438_v18 = vld [vmem:[#allocation5 + $0x6b4] sm:$0xf0] }
  0x54   :  { %994 = vmatpush.bf16.msrb.mxu1 %v5348_v24  ;;  %v7478_v24 = vld [vmem:[#allocation5 + $0x7f4] sm:$0xf0] }
  0x56   :  { %982 = vmatpush.bf16.msrb.mxu0 %v5060_v29  ;;  %v5524_v29 = vor.u32 %v7478_v24, %v5523_v23  ;;  %v5373_v23 = vld [vmem:[#allocation5 + $0x6e0] sm:$0xf0] }
  0x58   :  { %995 = vmatpush.bf16.msrb.mxu1 %v5316_v30  ;;  %v7406_v30 = vld [vmem:[#allocation5 + $0x5b4] sm:$0xf0] }
  0x59   :  { %v5236_v38 = vor.u32 %v7406_v30, %v5235_v28  ;;  %v7366_v28 = vld [vmem:[#allocation5 + $0x474] sm:$0xf0] }
  0x5a   :  { %983 = vmatpush.bf16.msrb.mxu0 %v5028_v39  ;;  %v5203_v39 = vld [vmem:[#allocation5 + $0x558] sm:$0xf] }
  0x5b   :  { %v7430_v30 = vld [vmem:[#allocation5 + $0x674] sm:$0xf0] }
  0x5c   :  { %996 = vmatpush.bf16.msrb.mxu1 %v5284_v40  ;;  %v5504_v40 = vor.u32 %v7471_v35, %v5501_v37  ;;  %v5341_v35 = vld [vmem:[#allocation5 + $0x6a0] sm:$0xf0]  ;;  %v5043_v37 = vld [vmem:[#allocation5 + $0x418] sm:$0xf] }
  0x5d   :  { %984 = vmatmul.bf16.vlgmr.msrb.gmra.mxu0 %v8257_v61 }
  0x5e   :  { %1028 = vmatpush.bf16.msra.mxu0 %v5260_v41  ;;  %v5492_v41 = vor.u32 %v7470_v32, %v5491_v31  ;;  %963 = vmatpush.bf16.msra.mxu3 %v5504_v40  ;;  %v7367_v31 = vld [vmem:[#allocation5 + $0x484] sm:$0xf]  ;;  %v5344_v40 = vor.u32 %v7431_v33, %v5341_v35  ;;  %v5445_v33 = vld [vmem:[#allocation5 + $0x768] sm:$0xf0]  ;;  %v5627_v35 = vld [vmem:[#allocation5 + $0xcc0] sm:$0xf] }
  0x5f   :  { %997 = vmatmul.bf16.vlgmr.msrb.gmra.mxu1 %v8259_v62  ;;  %v5085_v32 = vld [vmem:[#allocation5 + $0x4a0] sm:$0xf0] }
  0x60   :  { %1041 = vmatpush.bf16.msra.mxu1 %v5516_v42  ;;  %v7398_v42 = vld [vmem:[#allocation5 + $0x574] sm:$0xf0]  ;;  %v5088_v34 = vor.u32 %v7367_v31, %v5085_v32  ;;  %v7456_v31 = vld [vmem:[#allocation5 + $0x74c] sm:$0xf] }
  0x61   :  { %v5204_v50 = vor.u32 %v7398_v42, %v5203_v39  ;;  %v5299_v39 = vld [vmem:[#allocation5 + $0x618] sm:$0xf] }
  0x62   :  { %1029 = vmatpush.bf16.msra.mxu0 %v5228_v47  ;;  %v7463_v47 = vld [vmem:[#allocation5 + $0x784] sm:$0xf]  ;;  %v7422_v42 = vld [vmem:[#allocation5 + $0x634] sm:$0xf0] }
  0x63   :  { %v5472_v52 = vor.u32 %v7463_v47, %v5469_v49  ;;  %v7423_v47 = vld [vmem:[#allocation5 + $0x644] sm:$0xf]  ;;  %v7603_v49 = vld [vmem:[#allocation5 + $0xfdc] sm:$0xf0] }
  0x64   :  { %1042 = vmatpush.bf16.msra.mxu1 %v5484_v48  ;;  %v5216_v48 = vor.u32 %v7399_v45, %v5213_v46  ;;  %v7359_v45 = vld [vmem:[#allocation5 + $0x444] sm:$0xf] }
  0x65   :  { %964 = vmatpush.bf16.msra.mxu3 %v5472_v52  ;;  %v5053_v46 = vld [vmem:[#allocation5 + $0x460] sm:$0xf0] }
  0x66   :  { %1030 = vmatpush.bf16.msra.mxu0 %v5196_v53  ;;  %v5460_v53 = vor.u32 %v7462_v44, %v5459_v43  ;;  %951 = vmatpush.bf16.msra.mxu2 %v5216_v48  ;;  %v5755_v43 = vld [vmem:[#allocation5 + $0xdc0] sm:$0xf] }
  0x67   :  { %v7539_v44 = vld [vmem:[#allocation5 + $0xddc] sm:$0xf0] }
  0x68   :  { %1043 = vmatpush.bf16.msra.mxu1 %v5452_v54  ;;  %v7390_v54 = vld [vmem:[#allocation5 + $0x534] sm:$0xf0]  ;;  %v6011_v48 = vld [vmem:[#allocation5 + $0xfc0] sm:$0xf] }
  0x69   :  { %v5172_v0 = vor.u32 %v7390_v54, %v5171_v51  ;;  %v5309_v51 = vld [vmem:[#allocation5 + $0x660] sm:$0xf0]  ;;  %v5300_v54 = vor.u32 %v7422_v42, %v5299_v39  ;;  %v5883_v39 = vld [vmem:[#allocation5 + $0xec0] sm:$0xf]  ;;  %v5157_v42 = vld [vmem:[#allocation5 + $0x528] sm:$0xf0] }
  0x6a   :  { %1031 = vmatpush.bf16.msra.mxu0 %v5164_v59  ;;  %v7455_v59 = vld [vmem:[#allocation5 + $0x744] sm:$0xf] }
  0x6b   :  { %v5440_v2 = vor.u32 %v7455_v59, %v5437_v63  ;;  %v5979_v59 = vld [vmem:[#allocation5 + $0xf80] sm:$0xf]  ;;  %v7351_v63 = vld [vmem:[#allocation5 + $0x404] sm:$0xf] }
  0x6c   :  { %1044 = vmatpush.bf16.msra.mxu1 %v5420_v60  ;;  %v5184_v60 = vor.u32 %v7391_v57, %v5181_v58  ;;  %v6012_v57 = vor.u32 %v7603_v49, %v6011_v48  ;;  %v7531_v58 = vld [vmem:[#allocation5 + $0xd9c] sm:$0xf0] }
  0x6d   :  { %965 = vmatpush.bf16.msra.mxu3 %v5440_v2 }
  0x6e   :  { %1032 = vmatpush.bf16.msra.mxu0 %v5132_v3  ;;  %v5428_v3 = vor.u32 %v7454_v56, %v5427_v55  ;;  %952 = vmatpush.bf16.msra.mxu2 %v5184_v60  ;;  %v5756_v55 = vor.u32 %v7539_v44, %v5755_v43  ;;  %v5723_v56 = vld [vmem:[#allocation5 + $0xd80] sm:$0xf]  ;;  %v7448_v43 = vld [vmem:[#allocation5 + $0x70c] sm:$0xf] }
  0x6f   :  { %v7595_v60 = vld [vmem:[#allocation5 + $0xf9c] sm:$0xf0] }
  0x70   :  { %1045 = vmatpush.bf16.msra.mxu1 %v5388_v4  ;;  %v7382_v4 = vld [vmem:[#allocation5 + $0x4f4] sm:$0xf0] }
  0x71   :  { %v5140_v12 = vor.u32 %v7382_v4, %v5139_v1  ;;  %v7415_v1 = vld [vmem:[#allocation5 + $0x604] sm:$0xf]  ;;  %v7408_v4 = vld [vmem:[#allocation5 + $0x5cc] sm:$0xf] }
  0x72   :  { %1033 = vmatpush.bf16.msra.mxu0 %v5100_v9  ;;  %v7447_v9 = vld [vmem:[#allocation5 + $0x704] sm:$0xf] }
  0x73   :  { %v5408_v14 = vor.u32 %v7447_v9, %v5405_v11  ;;  %v5509_v11 = vld [vmem:[#allocation5 + $0x7e8] sm:$0xf0] }
  0x74   :  { %1046 = vmatpush.bf16.msra.mxu1 %v5356_v10  ;;  %v5152_v10 = vor.u32 %v7383_v7, %v5149_v8  ;;  %v5691_v7 = vld [vmem:[#allocation5 + $0xd40] sm:$0xf] }
  0x75   :  { %966 = vmatpush.bf16.msra.mxu3 %v5408_v14  ;;  %v5947_v14 = vld [vmem:[#allocation5 + $0xf40] sm:$0xf] }
  0x76   :  { %1034 = vmatpush.bf16.msra.mxu0 %v5068_v15  ;;  %v5396_v15 = vor.u32 %v7446_v6, %v5395_v5  ;;  %953 = vmatpush.bf16.msra.mxu2 %v5152_v10  ;;  %v5253_v5 = vld [vmem:[#allocation5 + $0x5e8] sm:$0xf0]  ;;  %v5724_v6 = vor.u32 %v7531_v58, %v5723_v56 }
  0x77   :  { %v5256_v9 = vor.u32 %v7408_v4, %v5253_v5  ;;  %v7472_v10 = vld [vmem:[#allocation5 + $0x7cc] sm:$0xf] }
  0x78   :  { %1047 = vmatpush.bf16.msra.mxu1 %v5324_v16  ;;  %v7374_v16 = vld [vmem:[#allocation5 + $0x4b4] sm:$0xf0]  ;;  %v5093_v4 = vld [vmem:[#allocation5 + $0x4a8] sm:$0xf0] }
  0x79   :  { %v5108_v24 = vor.u32 %v7374_v16, %v5107_v13  ;;  %v7523_v13 = vld [vmem:[#allocation5 + $0xd5c] sm:$0xf0]  ;;  %v5512_v16 = vor.u32 %v7472_v10, %v5509_v11  ;;  %v7432_v5 = vld [vmem:[#allocation5 + $0x68c] sm:$0xf] }
  0x7a   :  { %1035 = vmatpush.bf16.msra.mxu0 %v5036_v25  ;;  %v5075_v25 = vld [vmem:[#allocation5 + $0x458] sm:$0xf]  ;;  %954 = vmatpush.bf16.msra.mxu2 %v5120_v22  ;;  %v5692_v22 = vor.u32 %v7523_v13, %v5691_v7  ;;  %v7483_v7 = vld [vmem:[#allocation5 + $0xc1c] sm:$0xf0] }
  0x7b   :  { %v5076_v36 = vor.u32 %v7366_v28, %v5075_v25  ;;  %v7579_v28 = vld [vmem:[#allocation5 + $0xf1c] sm:$0xf0] }
  0x7c   :  { %1048 = vmatpush.bf16.msra.mxu1 %v5292_v26  ;;  %v5376_v26 = vor.u32 %v7439_v21, %v5373_v23  ;;  %v5477_v21 = vld [vmem:[#allocation5 + $0x7a8] sm:$0xf0]  ;;  %v5659_v23 = vld [vmem:[#allocation5 + $0xd00] sm:$0xf] }
  0x7d   :  { %1036 = vmatmul.bf16.vlgmr.msra.gmra.mxu0 %v8257_v61  ;;  %v5787_v11 = vld [vmem:[#allocation5 + $0xe00] sm:$0xf] }
  0x7e   :  { %1080 = vmatpush.bf16.msrb.mxu0 %v5268_v27  ;;  %v5364_v27 = vor.u32 %v7438_v18, %v5363_v17  ;;  %967 = vmatpush.bf16.msra.mxu3 %v5376_v26  ;;  %v7400_v17 = vld [vmem:[#allocation5 + $0x58c] sm:$0xf]  ;;  %v7515_v26 = vld [vmem:[#allocation5 + $0xd1c] sm:$0xf0] }
  0x7f   :  { %1049 = vmatmul.bf16.vlgmr.msra.gmra.mxu1 %v8259_v62  ;;  %955 = vmatpush.bf16.msra.mxu2 %v5088_v34  ;;  %v5221_v18 = vld [vmem:[#allocation5 + $0x5a8] sm:$0xf0]  ;;  %v5660_v34 = vor.u32 %v7515_v26, %v5659_v23  ;;  %v114_v13 = vld [vmem:[#allocation10 + $0x2] sm:$0x3] }
  0x80   :  { %1093 = vmatpush.bf16.msrb.mxu1 %v5524_v29  ;;  %v5331_v29 = vld [vmem:[#allocation5 + $0x658] sm:$0xf]  ;;  %v5224_v20 = vor.u32 %v7400_v17, %v5221_v18  ;;  %v7540_v17 = vld [vmem:[#allocation5 + $0xde4] sm:$0xf0]  ;;  %v116_v23 = vperm.slane %v114_v13, 0 }
  0x81   :  { %v6019_v18 = vld [vmem:[#allocation5 + $0xfc8] sm:$0xf] }
  0x82   :  { %1081 = vmatpush.bf16.msrb.mxu0 %v5236_v38  ;;  %v7358_v38 = vld [vmem:[#allocation5 + $0x434] sm:$0xf0]  ;;  %968 = vmatpush.bf16.msra.mxu3 %v5344_v40  ;;  %v7571_v40 = vld [vmem:[#allocation5 + $0xedc] sm:$0xf0] }
  0x83   :  { %v5044_v52 = vor.u32 %v7358_v38, %v5043_v37  ;;  %v7507_v38 = vld [vmem:[#allocation5 + $0xcdc] sm:$0xf0]  ;;  %v5884_v49 = vor.u32 %v7571_v40, %v5883_v39  ;;  %v7416_v39 = vld [vmem:[#allocation5 + $0x60c] sm:$0xf] }
  0x84   :  { %1094 = vmatpush.bf16.msrb.mxu1 %v5492_v41  ;;  %v5332_v41 = vor.u32 %v7430_v30, %v5331_v29  ;;  %v7392_v29 = vld [vmem:[#allocation5 + $0x54c] sm:$0xf] }
  0x85   :  { %v5189_v30 = vld [vmem:[#allocation5 + $0x568] sm:$0xf0] }
  0x86   :  { %1082 = vmatpush.bf16.msrb.mxu0 %v5204_v50  ;;  %v5056_v50 = vor.u32 %v7359_v45, %v5053_v46  ;;  %v5192_v32 = vor.u32 %v7392_v29, %v5189_v30  ;;  %v5413_v45 = vld [vmem:[#allocation5 + $0x728] sm:$0xf0]  ;;  %v5628_v46 = vor.u32 %v7507_v38, %v5627_v35  ;;  %v7596_v35 = vld [vmem:[#allocation5 + $0xfa4] sm:$0xf0] }
  0x87   :  { %v5416_v48 = vor.u32 %v7448_v43, %v5413_v45  ;;  %v5029_v38 = vld [vmem:[#allocation5 + $0x428] sm:$0xf0]  ;;  %v7409_v43 = vld [vmem:[#allocation5 + $0x5d4] sm:$0xf] }
  0x88   :  { %1095 = vmatpush.bf16.msrb.mxu1 %v5460_v53  ;;  %v5312_v53 = vor.u32 %v7423_v47, %v5309_v51  ;;  %956 = vmatpush.bf16.msra.mxu2 %v5056_v50  ;;  %v5595_v47 = vld [vmem:[#allocation5 + $0xc80] sm:$0xf] }
  0x89   :  { %v7499_v50 = vld [vmem:[#allocation5 + $0xc9c] sm:$0xf0] }
  0x8a   :  { %1083 = vmatpush.bf16.msrb.mxu0 %v5172_v0  ;;  %969 = vmatpush.bf16.msra.mxu3 %v5312_v53  ;;  %v5021_v0 = vld [vmem:[#allocation5 + $0x420] sm:$0xf0]  ;;  %v5851_v51 = vld [vmem:[#allocation5 + $0xe80] sm:$0xf]  ;;  %v7376_v53 = vld [vmem:[#allocation5 + $0x4cc] sm:$0xf]  ;;  %v5596_v58 = vor.u32 %v7499_v50, %v5595_v47 }
  0x8b   :  { %v5024_v2 = vor.u32 %v7351_v63, %v5021_v0  ;;  %v7491_v0 = vld [vmem:[#allocation5 + $0xc5c] sm:$0xf0]  ;;  %v5517_v50 = vld [vmem:[#allocation5 + $0x7f0] sm:$0xf0] }
  0x8c   :  { %1096 = vmatpush.bf16.msrb.mxu1 %v5428_v3  ;;  %v5277_v3 = vld [vmem:[#allocation5 + $0x620] sm:$0xf0] }
  0x8d   :  { %v5280_v8 = vor.u32 %v7415_v1, %v5277_v3  ;;  %957 = vmatpush.bf16.msra.mxu2 %v5024_v2  ;;  %v5819_v1 = vld [vmem:[#allocation5 + $0xe40] sm:$0xf]  ;;  %v7368_v3 = vld [vmem:[#allocation5 + $0x48c] sm:$0xf] }
  0x8e   :  { %1084 = vmatpush.bf16.msrb.mxu0 %v5140_v12  ;;  %v5980_v12 = vor.u32 %v7595_v60, %v5979_v59  ;;  %v5563_v59 = vld [vmem:[#allocation5 + $0xc40] sm:$0xf] }
  0x8f   :  { %970 = vmatpush.bf16.msra.mxu3 %v5280_v8  ;;  %v7555_v2 = vld [vmem:[#allocation5 + $0xe5c] sm:$0xf0]  ;;  %v5096_v8 = vor.u32 %v7368_v3, %v5093_v4  ;;  %v5564_v10 = vor.u32 %v7491_v0, %v5563_v59  ;;  %v5485_v59 = vld [vmem:[#allocation5 + $0x7b0] sm:$0xf0]  ;;  %v5923_v3 = vld [vmem:[#allocation5 + $0xf08] sm:$0xf] }
  0x90   :  { %1097 = vmatpush.bf16.msrb.mxu1 %v5396_v15  ;;  %v7587_v15 = vld [vmem:[#allocation5 + $0xf5c] sm:$0xf0]  ;;  %958 = vmatmul.bf16.vlgmr.msra.gmra.mxu2 %v8257_v61  ;;  %v7580_v4 = vld [vmem:[#allocation5 + $0xf24] sm:$0xf0] }
  0x91   :  { %1002 = vmatpush.bf16.msrb.mxu2 %v5256_v9  ;;  %v5948_v25 = vor.u32 %v7587_v15, %v5947_v14  ;;  %v5349_v9 = vld [vmem:[#allocation5 + $0x6a8] sm:$0xf0]  ;;  %v5820_v15 = vor.u32 %v7555_v2, %v5819_v1  ;;  %v7516_v2 = vld [vmem:[#allocation5 + $0xd24] sm:$0xf0] }
  0x92   :  { %1085 = vmatpush.bf16.msrb.mxu0 %v5108_v24  ;;  %v5480_v24 = vor.u32 %v7464_v19, %v5477_v21  ;;  %971 = vmatmul.bf16.vlgmr.msra.gmra.mxu3 %v8259_v62  ;;  %v5352_v14 = vor.u32 %v7432_v5, %v5349_v9  ;;  %v7360_v19 = vld [vmem:[#allocation5 + $0x44c] sm:$0xf]  ;;  %v5453_v9 = vld [vmem:[#allocation5 + $0x770] sm:$0xf0] }
  0x93   :  { %1015 = vmatpush.bf16.msrb.mxu3 %v5512_v16  ;;  %v5763_v16 = vld [vmem:[#allocation5 + $0xdc8] sm:$0xf]  ;;  %v7424_v21 = vld [vmem:[#allocation5 + $0x64c] sm:$0xf] }
  0x94   :  { %1098 = vmatpush.bf16.msrb.mxu1 %v5364_v27  ;;  %v5915_v27 = vld [vmem:[#allocation5 + $0xf00] sm:$0xf]  ;;  %v5764_v30 = vor.u32 %v7540_v17, %v5763_v16  ;;  %v7572_v16 = vld [vmem:[#allocation5 + $0xee4] sm:$0xf0] }
  0x95   :  { %1003 = vmatpush.bf16.msrb.mxu2 %v5224_v20  ;;  %v5916_v37 = vor.u32 %v7579_v28, %v5915_v27  ;;  %v5061_v20 = vld [vmem:[#allocation5 + $0x468] sm:$0xf0]  ;;  %v117_v27 = vperm.slane %v114_v13, 1  ;;  %v5924_v13 = vor.u32 %v7580_v4, %v5923_v3  ;;  %v5069_v3 = vld [vmem:[#allocation5 + $0x470] sm:$0xf0] }
  0x96   :  { %1086 = vmatpush.bf16.msrb.mxu0 %v5076_v36  ;;  %v5448_v36 = vor.u32 %v7456_v31, %v5445_v33  ;;  %v5731_v31 = vld [vmem:[#allocation5 + $0xd88] sm:$0xf]  ;;  %v7605_v4 = vld [vmem:[#allocation5 + $0xfec] sm:$0xf0] }
  0x97   :  { %1016 = vmatpush.bf16.msrb.mxu3 %v5480_v24  ;;  %v5064_v24 = vor.u32 %v7360_v19, %v5061_v20  ;;  %v7532_v33 = vld [vmem:[#allocation5 + $0xda4] sm:$0xf0]  ;;  %v8273_v40 = vpack.c.bf16 %v117_v27, %v117_v27  ;;  %v5165_v19 = vld [vmem:[#allocation5 + $0x530] sm:$0xf0] }
  0x98   :  { %1099 = vmatpush.bf16.msrb.mxu1 %v5332_v41  ;;  %v7384_v41 = vld [vmem:[#allocation5 + $0x50c] sm:$0xf]  ;;  %v5732_v45 = vor.u32 %v7532_v33, %v5731_v31  ;;  %v7449_v20 = vld [vmem:[#allocation5 + $0x714] sm:$0xf] }
  0x99   :  { %1004 = vmatpush.bf16.msrb.mxu2 %v5192_v32  ;;  %v5160_v44 = vor.u32 %v7384_v41, %v5157_v42  ;;  %v5285_v42 = vld [vmem:[#allocation5 + $0x628] sm:$0xf0]  ;;  %v7377_v33 = vld [vmem:[#allocation5 + $0x4d4] sm:$0xf] }
  0x9a   :  { %1087 = vmatpush.bf16.msrb.mxu0 %v5044_v52  ;;  %v7563_v52 = vld [vmem:[#allocation5 + $0xe9c] sm:$0xf0]  ;;  %v5288_v47 = vor.u32 %v7416_v39, %v5285_v42  ;;  %v5571_v39 = vld [vmem:[#allocation5 + $0xc48] sm:$0xf] }
  0x9b   :  { %1017 = vmatpush.bf16.msrb.mxu3 %v5448_v36  ;;  %v5852_v63 = vor.u32 %v7563_v52, %v5851_v51  ;;  %v8271_v36 = vpack.c.bf16 %v116_v23, %v116_v23  ;;  %v7524_v52 = vld [vmem:[#allocation5 + $0xd64] sm:$0xf0] }
  0x9c   :  { %1100 = vmatpush.bf16.msrb.mxu1 %v5300_v54  ;;  %v5125_v54 = vld [vmem:[#allocation5 + $0x4e8] sm:$0xf0] }
  0x9d   :  { %1088 = vmatmul.bf16.vlgmr.msrb.gmra.mxu0 %v8257_v61  ;;  %1005 = vmatpush.bf16.msrb.mxu2 %v5160_v44  ;;  %v5128_v56 = vor.u32 %v7376_v53, %v5125_v54  ;;  %v5261_v44 = vld [vmem:[#allocation5 + $0x5f0] sm:$0xf0]  ;;  %v5955_v53 = vld [vmem:[#allocation5 + $0xf48] sm:$0xf] }
  0x9e   :  { %1902 = vmatpush.bf16.msra.mxu0 %v5756_v55  ;;  %v7440_v55 = vld [vmem:[#allocation5 + $0x6cc] sm:$0xf]  ;;  %v7588_v54 = vld [vmem:[#allocation5 + $0xf64] sm:$0xf0] }
  0x9f   :  { %1101 = vmatmul.bf16.vlgmr.msrb.gmra.mxu1 %v8259_v62  ;;  %1018 = vmatpush.bf16.msrb.mxu3 %v5416_v48  ;;  %v5264_v48 = vor.u32 %v7409_v43, %v5261_v44  ;;  %v5956_v1 = vor.u32 %v7588_v54, %v5955_v53  ;;  %v7492_v43 = vld [vmem:[#allocation5 + $0xc64] sm:$0xf0] }
  0xa0   :  { %1915 = vmatpush.bf16.msra.mxu1 %v6012_v57  ;;  %v5381_v57 = vld [vmem:[#allocation5 + $0x6e8] sm:$0xf0]  ;;  %v5827_v44 = vld [vmem:[#allocation5 + $0xe48] sm:$0xf] }
  0xa1   :  { %v5384_v60 = vor.u32 %v7440_v55, %v5381_v57  ;;  %1006 = vmatpush.bf16.msrb.mxu2 %v5128_v56  ;;  %v7401_v56 = vld [vmem:[#allocation5 + $0x594] sm:$0xf]  ;;  %v5539_v53 = vld [vmem:[#allocation5 + $0xc08] sm:$0xf] }
  0xa2   :  { %1903 = vmatpush.bf16.msra.mxu0 %v5724_v6  ;;  %v5531_v6 = vld [vmem:[#allocation5 + $0xc00] sm:$0xf]  ;;  %v5229_v57 = vld [vmem:[#allocation5 + $0x5b0] sm:$0xf0]  ;;  %v7484_v54 = vld [vmem:[#allocation5 + $0xc24] sm:$0xf0] }
  0xa3   :  { %1019 = vmatpush.bf16.msrb.mxu3 %v5384_v60  ;;  %v5532_v26 = vor.u32 %v7483_v7, %v5531_v6  ;;  %v5232_v0 = vor.u32 %v7401_v56, %v5229_v57  ;;  %v7393_v6 = vld [vmem:[#allocation5 + $0x554] sm:$0xf] }
  0xa4   :  { %1916 = vmatpush.bf16.msra.mxu1 %v5980_v12  ;;  %v7547_v12 = vld [vmem:[#allocation5 + $0xe1c] sm:$0xf0]  ;;  %v5197_v7 = vld [vmem:[#allocation5 + $0x570] sm:$0xf0] }
  0xa5   :  { %1007 = vmatpush.bf16.msrb.mxu2 %v5096_v8  ;;  %v5788_v29 = vor.u32 %v7547_v12, %v5787_v11  ;;  %v7457_v8 = vld [vmem:[#allocation5 + $0x754] sm:$0xf]  ;;  %v5635_v11 = vld [vmem:[#allocation5 + $0xcc8] sm:$0xf]  ;;  %v5200_v12 = vor.u32 %v7393_v6, %v5197_v7  ;;  %v5540_v7 = vor.u32 %v7484_v54, %v5539_v53  ;;  %v5461_v53 = vld [vmem:[#allocation5 + $0x778] sm:$0xf0] }
  0xa6   :  { %1904 = vmatpush.bf16.msra.mxu0 %v5692_v22  ;;  %v7604_v22 = vld [vmem:[#allocation5 + $0xfe4] sm:$0xf0]  ;;  %v5456_v17 = vor.u32 %v7457_v8, %v5453_v9  ;;  %v5325_v6 = vld [vmem:[#allocation5 + $0x670] sm:$0xf0] }
  0xa7   :  { %1020 = vmatpush.bf16.msrb.mxu3 %v5352_v14  ;;  %v6020_v32 = vor.u32 %v7604_v22, %v6019_v18  ;;  %v7508_v14 = vld [vmem:[#allocation5 + $0xce4] sm:$0xf0]  ;;  %v7385_v18 = vld [vmem:[#allocation5 + $0x514] sm:$0xf] }
  0xa8   :  { %1917 = vmatpush.bf16.msra.mxu1 %v5948_v25  ;;  %v5317_v25 = vld [vmem:[#allocation5 + $0x668] sm:$0xf0]  ;;  %v5421_v22 = vld [vmem:[#allocation5 + $0x730] sm:$0xf0]  ;;  %v5636_v23 = vor.u32 %v7508_v14, %v5635_v11  ;;  %v5739_v11 = vld [vmem:[#allocation5 + $0xd90] sm:$0xf] }
  0xa9   :  { %v5320_v28 = vor.u32 %v7424_v21, %v5317_v25  ;;  %1008 = vmatpush.bf16.msrb.mxu2 %v5064_v24  ;;  %v5603_v24 = vld [vmem:[#allocation5 + $0xc88] sm:$0xf]  ;;  %v5995_v14 = vld [vmem:[#allocation5 + $0xf90] sm:$0xf] }
  0xaa   :  { %1905 = vmatpush.bf16.msra.mxu0 %v5660_v34  ;;  %v5987_v34 = vld [vmem:[#allocation5 + $0xf88] sm:$0xf] }
  0xab   :  { %1021 = vmatpush.bf16.msrb.mxu3 %v5320_v28  ;;  %v5988_v51 = vor.u32 %v7596_v35, %v5987_v34  ;;  %v7500_v28 = vld [vmem:[#allocation5 + $0xca4] sm:$0xf0]  ;;  %v5133_v34 = vld [vmem:[#allocation5 + $0x4f0] sm:$0xf0] }
  0xac   :  { %1918 = vmatpush.bf16.msra.mxu1 %v5916_v37  ;;  %v7352_v37 = vld [vmem:[#allocation5 + $0x40c] sm:$0xf]  ;;  %v7441_v35 = vld [vmem:[#allocation5 + $0x6d4] sm:$0xf] }
  0xad   :  { %v5032_v41 = vor.u32 %v7352_v37, %v5029_v38  ;;  %v5389_v37 = vld [vmem:[#allocation5 + $0x6f0] sm:$0xf0]  ;;  %v5604_v38 = vor.u32 %v7500_v28, %v5603_v24 }
  0xae   :  { %1906 = vmatpush.bf16.msra.mxu0 %v5628_v46  ;;  %v5699_v46 = vld [vmem:[#allocation5 + $0xd48] sm:$0xf] }
  0xaf   :  { %1009 = vmatpush.bf16.msrb.mxu2 %v5032_v41  ;;  %1022 = vmatpush.bf16.msrb.mxu3 %v5288_v47  ;;  %v5700_v60 = vor.u32 %v7524_v52, %v5699_v46  ;;  %v5136_v41 = vor.u32 %v7377_v33, %v5133_v34  ;;  %v5392_v46 = vor.u32 %v7441_v35, %v5389_v37  ;;  %v7369_v47 = vld [vmem:[#allocation5 + $0x494] sm:$0xf]  ;;  %v7589_v34 = vld [vmem:[#allocation5 + $0xf6c] sm:$0xf0]  ;;  %v7402_v37 = vld [vmem:[#allocation5 + $0x59c] sm:$0xf] }
  0xb0   :  { %1919 = vmatpush.bf16.msra.mxu1 %v5884_v49  ;;  %v7473_v49 = vld [vmem:[#allocation5 + $0x7d4] sm:$0xf]  ;;  %v5572_v52 = vor.u32 %v7492_v43, %v5571_v39  ;;  %v7466_v39 = vld [vmem:[#allocation5 + $0x79c] sm:$0xf] }
  0xb1   :  { %v5520_v55 = vor.u32 %v7473_v49, %v5517_v50  ;;  %v7433_v49 = vld [vmem:[#allocation5 + $0x694] sm:$0xf] }
  0xb2   :  { %1907 = vmatpush.bf16.msra.mxu0 %v5596_v58  ;;  %v7465_v58 = vld [vmem:[#allocation5 + $0x794] sm:$0xf]  ;;  %1010 = vmatmul.bf16.vlgmr.msrb.gmra.mxu2 %v8257_v61 }
  0xb3   :  { %1054 = vmatpush.bf16.msra.mxu2 %v5264_v48  ;;  %1067 = vmatpush.bf16.msra.mxu3 %v5520_v55  ;;  %v5488_v5 = vor.u32 %v7465_v58, %v5485_v59  ;;  %v5101_v48 = vld [vmem:[#allocation5 + $0x4b0] sm:$0xf0]  ;;  %v5795_v55 = vld [vmem:[#allocation5 + $0xe08] sm:$0xf] }
  0xb4   :  { %1920 = vmatpush.bf16.msra.mxu1 %v5852_v63  ;;  %v5667_v63 = vld [vmem:[#allocation5 + $0xd08] sm:$0xf]  ;;  %1023 = vmatmul.bf16.vlgmr.msrb.gmra.mxu3 %v8259_v62  ;;  %v5104_v57 = vor.u32 %v7369_v47, %v5101_v48  ;;  %v5931_v47 = vld [vmem:[#allocation5 + $0xf10] sm:$0xf] }
  0xb5   :  { %v7548_v59 = vld [vmem:[#allocation5 + $0xe24] sm:$0xf0]  ;;  %v7581_v48 = vld [vmem:[#allocation5 + $0xf2c] sm:$0xf0] }
  0xb6   :  { %1908 = vmatpush.bf16.msra.mxu0 %v5564_v10  ;;  %v5668_v10 = vor.u32 %v7516_v2, %v5667_v63  ;;  %v7541_v63 = vld [vmem:[#allocation5 + $0xdec] sm:$0xf0]  ;;  %v7361_v2 = vld [vmem:[#allocation5 + $0x454] sm:$0xf]  ;;  %v5796_v9 = vor.u32 %v7548_v59, %v5795_v55 }
  0xb7   :  { %1055 = vmatpush.bf16.msra.mxu2 %v5232_v0  ;;  %1068 = vmatpush.bf16.msra.mxu3 %v5488_v5  ;;  %v7425_v5 = vld [vmem:[#allocation5 + $0x654] sm:$0xf]  ;;  %v5072_v8 = vor.u32 %v7361_v2, %v5069_v3  ;;  %v5899_v59 = vld [vmem:[#allocation5 + $0xed0] sm:$0xf]  ;;  %v7450_v3 = vld [vmem:[#allocation5 + $0x71c] sm:$0xf] }
  0xb8   :  { %1921 = vmatpush.bf16.msra.mxu1 %v5820_v15  ;;  %v5891_v15 = vld [vmem:[#allocation5 + $0xec8] sm:$0xf] }
  0xb9   :  { %v5892_v27 = vor.u32 %v7572_v16, %v5891_v15  ;;  %v7597_v15 = vld [vmem:[#allocation5 + $0xfac] sm:$0xf0]  ;;  %v5328_v16 = vor.u32 %v7425_v5, %v5325_v6 }
  0xba   :  { %1909 = vmatpush.bf16.msra.mxu0 %v5532_v26  ;;  %v933_v21 = vpop.f32.mrf.mxu0  ;;  %v5168_v26 = vor.u32 %v7385_v18, %v5165_v19  ;;  %v5037_v18 = vld [vmem:[#allocation5 + $0x430] sm:$0xf0]  ;;  %v5996_v28 = vor.u32 %v7597_v15, %v5995_v14  ;;  %v7378_v15 = vld [vmem:[#allocation5 + $0x4dc] sm:$0xf] }
  0xbb   :  { %1056 = vmatpush.bf16.msra.mxu2 %v5200_v12  ;;  %1069 = vmatpush.bf16.msra.mxu3 %v5456_v17  ;;  %v7353_v17 = vld [vmem:[#allocation5 + $0x414] sm:$0xf] }
  0xbc   :  { %1922 = vmatpush.bf16.msra.mxu1 %v5788_v29  ;;  %v946_v25 = vpop.f32.mrf.mxu1  ;;  %v5859_v29 = vld [vmem:[#allocation5 + $0xe88] sm:$0xf]  ;;  %v7417_v19 = vld [vmem:[#allocation5 + $0x614] sm:$0xf] }
  0xbd   :  { %1910 = vmatmul.bf16.vlgmr.msra.gmra.mxu0 %v8271_v36  ;;  %v8279_v31 = vadd.f32 %v946_v25, %v933_v21  ;;  %v5293_v21 = vld [vmem:[#allocation5 + $0x630] sm:$0xf0] }
  0xbe   :  { %1954 = vmatpush.bf16.msrb.mxu0 %v5764_v30  ;;  %v7564_v30 = vld [vmem:[#allocation5 + $0xea4] sm:$0xf0]  ;;  %v5296_v33 = vor.u32 %v7417_v19, %v5293_v21 }
  0xbf   :  { %1923 = vmatmul.bf16.vlgmr.msra.gmra.mxu1 %v8273_v40  ;;  %1057 = vmatpush.bf16.msra.mxu2 %v5168_v26  ;;  %v5860_v42 = vor.u32 %v7564_v30, %v5859_v29  ;;  %v7474_v26 = vld [vmem:[#allocation5 + $0x7dc] sm:$0xf]  ;;  %v5707_v29 = vld [vmem:[#allocation5 + $0xd50] sm:$0xf] }
  0xc0   :  { %1967 = vmatpush.bf16.msrb.mxu1 %v6020_v32  ;;  %v5424_v32 = vor.u32 %v7449_v20, %v5421_v22  ;;  %v5040_v20 = vor.u32 %v7353_v17, %v5037_v18  ;;  %v7410_v22 = vld [vmem:[#allocation5 + $0x5dc] sm:$0xf]  ;;  %v7525_v30 = vld [vmem:[#allocation5 + $0xd6c] sm:$0xf0] }
  0xc1   :  { %v7442_v17 = vld [vmem:[#allocation5 + $0x6dc] sm:$0xf] }
  0xc2   :  { %1955 = vmatpush.bf16.msrb.mxu0 %v5732_v45  ;;  %v7556_v45 = vld [vmem:[#allocation5 + $0xe64] sm:$0xf0]  ;;  %1070 = vmatpush.bf16.msra.mxu3 %v5424_v32  ;;  %v935_v50 = vpop.f32.mrf.mxu0  ;;  %v5963_v32 = vld [vmem:[#allocation5 + $0xf50] sm:$0xf]  ;;  %v5397_v18 = vld [vmem:[#allocation5 + $0x6f8] sm:$0xf0] }
  0xc3   :  { %1058 = vmatpush.bf16.msra.mxu2 %v5136_v41  ;;  %v5828_v58 = vor.u32 %v7556_v45, %v5827_v44  ;;  %v5493_v41 = vld [vmem:[#allocation5 + $0x7b8] sm:$0xf0]  ;;  %v5964_v44 = vor.u32 %v7589_v34, %v5963_v32  ;;  %v5675_v45 = vld [vmem:[#allocation5 + $0xd10] sm:$0xf] }
  0xc4   :  { %1968 = vmatpush.bf16.msrb.mxu1 %v5988_v51  ;;  %v5357_v51 = vld [vmem:[#allocation5 + $0x6b0] sm:$0xf0]  ;;  %v948_v56 = vpop.f32.mrf.mxu1  ;;  %v7394_v50 = vld [vmem:[#allocation5 + $0x55c] sm:$0xf]  ;;  %v5547_v34 = vld [vmem:[#allocation5 + $0xc10] sm:$0xf] }
  0xc5   :  { %v5360_v0 = vor.u32 %v7433_v49, %v5357_v51  ;;  %v5496_v49 = vor.u32 %v7466_v39, %v5493_v41  ;;  %v5205_v51 = vld [vmem:[#allocation5 + $0x578] sm:$0xf0]  ;;  %v5932_v56 = vor.u32 %v7581_v48, %v5931_v47 }
  0xc6   :  { %1956 = vmatpush.bf16.msrb.mxu0 %v5700_v60  ;;  %v5771_v60 = vld [vmem:[#allocation5 + $0xdd0] sm:$0xf]  ;;  %1071 = vmatpush.bf16.msra.mxu3 %v5392_v46  ;;  %v5208_v55 = vor.u32 %v7394_v50, %v5205_v51  ;;  %v5365_v32 = vld [vmem:[#allocation5 + $0x6b8] sm:$0xf0] }
  0xc7   :  { %1059 = vmatpush.bf16.msra.mxu2 %v5104_v57  ;;  %v7517_v46 = vld [vmem:[#allocation5 + $0xd2c] sm:$0xf0]  ;;  %v7362_v47 = vld [vmem:[#allocation5 + $0x45c] sm:$0xf] }
  0xc8   :  { %1969 = vmatpush.bf16.msrb.mxu1 %v5956_v1  ;;  %v6027_v1 = vld [vmem:[#allocation5 + $0xfd0] sm:$0xf]  ;;  %v5676_v54 = vor.u32 %v7517_v46, %v5675_v45  ;;  %v6035_v45 = vld [vmem:[#allocation5 + $0xfd8] sm:$0xf]  ;;  %v5077_v48 = vld [vmem:[#allocation5 + $0x478] sm:$0xf0] }
  0xc9   :  { %v6028_v12 = vor.u32 %v7605_v4, %v6027_v1  ;;  %v5643_v57 = vld [vmem:[#allocation5 + $0xcd0] sm:$0xf]  ;;  %v5173_v1 = vld [vmem:[#allocation5 + $0x538] sm:$0xf0] }
  0xca   :  { %1957 = vmatpush.bf16.msrb.mxu0 %v5668_v10  ;;  %v5772_v10 = vor.u32 %v7541_v63, %v5771_v60  ;;  %1072 = vmatpush.bf16.msra.mxu3 %v5360_v0  ;;  %v7573_v60 = vld [vmem:[#allocation5 + $0xeec] sm:$0xf0]  ;;  %v7386_v0 = vld [vmem:[#allocation5 + $0x51c] sm:$0xf] }
  0xcb   :  { %1060 = vmatpush.bf16.msra.mxu2 %v5072_v8  ;;  %v5429_v4 = vld [vmem:[#allocation5 + $0x738] sm:$0xf0]  ;;  %v5900_v8 = vor.u32 %v7573_v60, %v5899_v59  ;;  %v6003_v59 = vld [vmem:[#allocation5 + $0xf98] sm:$0xf] }
  0xcc   :  { %1970 = vmatpush.bf16.msrb.mxu1 %v5924_v13  ;;  %v7533_v13 = vld [vmem:[#allocation5 + $0xdac] sm:$0xf0]  ;;  %v5432_v14 = vor.u32 %v7450_v3, %v5429_v4  ;;  %v7426_v50 = vld [vmem:[#allocation5 + $0x65c] sm:$0xf]  ;;  %v7598_v60 = vld [vmem:[#allocation5 + $0xfb4] sm:$0xf0] }
  0xcd   :  { %v5740_v24 = vor.u32 %v7533_v13, %v5739_v11  ;;  %v5867_v11 = vld [vmem:[#allocation5 + $0xe90] sm:$0xf]  ;;  %v5333_v51 = vld [vmem:[#allocation5 + $0x678] sm:$0xf0] }
  0xce   :  { %1958 = vmatpush.bf16.msrb.mxu0 %v5636_v23  ;;  %v5269_v23 = vld [vmem:[#allocation5 + $0x5f8] sm:$0xf0]  ;;  %1073 = vmatpush.bf16.msra.mxu3 %v5328_v16  ;;  %v7565_v13 = vld [vmem:[#allocation5 + $0xeac] sm:$0xf0] }
  0xcf   :  { %v5272_v25 = vor.u32 %v7410_v22, %v5269_v23  ;;  %1061 = vmatpush.bf16.msra.mxu2 %v5040_v20  ;;  %v5141_v16 = vld [vmem:[#allocation5 + $0x4f8] sm:$0xf0]  ;;  %v5868_v21 = vor.u32 %v7565_v13, %v5867_v11  ;;  %v5579_v22 = vld [vmem:[#allocation5 + $0xc50] sm:$0xf]  ;;  %v6013_v11 = vld [vmem:[#allocation5 + $0xfe0] sm:$0xf0]  ;;  %v6004_v13 = vor.u32 %v7598_v60, %v6003_v59 }
  0xd0   :  { %1971 = vmatpush.bf16.msrb.mxu1 %v5892_v27  ;;  %v5525_v27 = vld [vmem:[#allocation5 + $0x7f8] sm:$0xf0]  ;;  %v5144_v20 = vor.u32 %v7378_v15, %v5141_v16  ;;  %v7493_v23 = vld [vmem:[#allocation5 + $0xc6c] sm:$0xf0]  ;;  %v7527_v16 = vld [vmem:[#allocation5 + $0xd84] sm:$0xf] }
  0xd1   :  { %v5528_v35 = vor.u32 %v7474_v26, %v5525_v27  ;;  %v5400_v26 = vor.u32 %v7442_v17, %v5397_v18  ;;  %v7370_v27 = vld [vmem:[#allocation5 + $0x49c] sm:$0xf]  ;;  %v5725_v17 = vld [vmem:[#allocation5 + $0xda0] sm:$0xf0]  ;;  %v5971_v18 = vld [vmem:[#allocation5 + $0xf58] sm:$0xf] }
  0xd2   :  { %1959 = vmatpush.bf16.msrb.mxu0 %v5604_v38  ;;  %v5237_v38 = vld [vmem:[#allocation5 + $0x5b8] sm:$0xf0]  ;;  %1074 = vmatpush.bf16.msra.mxu3 %v5296_v33  ;;  %v5580_v33 = vor.u32 %v7493_v23, %v5579_v22  ;;  %v5981_v22 = vld [vmem:[#allocation5 + $0xfa0] sm:$0xf0] }
  0xd3   :  { %1106 = vmatpush.bf16.msrb.mxu2 %v5272_v25  ;;  %v5240_v43 = vor.u32 %v7402_v37, %v5237_v38  ;;  %v7557_v25 = vld [vmem:[#allocation5 + $0xe6c] sm:$0xf0]  ;;  %v5301_v4 = vld [vmem:[#allocation5 + $0x638] sm:$0xf0]  ;;  %v7503_v59 = vld [vmem:[#allocation5 + $0xcc4] sm:$0xf] }
  0xd4   :  { %1972 = vmatpush.bf16.msrb.mxu1 %v5860_v42  ;;  %v5708_v42 = vor.u32 %v7525_v30, %v5707_v29  ;;  %1062 = vmatmul.bf16.vlgmr.msra.gmra.mxu2 %v8257_v61  ;;  %v7434_v30 = vld [vmem:[#allocation5 + $0x69c] sm:$0xf]  ;;  %v5803_v37 = vld [vmem:[#allocation5 + $0xe10] sm:$0xf]  ;;  %v5629_v60 = vld [vmem:[#allocation5 + $0xce0] sm:$0xf0] }
  0xd5   :  { %1075 = vmatmul.bf16.vlgmr.msra.gmra.mxu3 %v8259_v62  ;;  %v5368_v46 = vor.u32 %v7434_v30, %v5365_v32  ;;  %v5939_v30 = vld [vmem:[#allocation5 + $0xf18] sm:$0xf] }
  0xd6   :  { %1960 = vmatpush.bf16.msrb.mxu0 %v5572_v52  ;;  %1119 = vmatpush.bf16.msrb.mxu3 %v5528_v35  ;;  %v7458_v52 = vld [vmem:[#allocation5 + $0x75c] sm:$0xf]  ;;  %v7485_v35 = vld [vmem:[#allocation5 + $0xc2c] sm:$0xf0]  ;;  %v7582_v32 = vld [vmem:[#allocation5 + $0xf34] sm:$0xf0] }
  0xd7   :  { %1107 = vmatpush.bf16.msrb.mxu2 %v5240_v43  ;;  %v5464_v63 = vor.u32 %v7458_v52, %v5461_v53  ;;  %v5779_v43 = vld [vmem:[#allocation5 + $0xdd8] sm:$0xf]  ;;  %v5548_v52 = vor.u32 %v7485_v35, %v5547_v34  ;;  %v5080_v53 = vor.u32 %v7362_v47, %v5077_v48  ;;  %v7583_v34 = vld [vmem:[#allocation5 + $0xf44] sm:$0xf] }
  0xd8   :  { %1973 = vmatpush.bf16.msrb.mxu1 %v5828_v58  ;;  %v7509_v58 = vld [vmem:[#allocation5 + $0xcec] sm:$0xf0]  ;;  %v5949_v35 = vld [vmem:[#allocation5 + $0xf60] sm:$0xf0] }
  0xd9   :  { %v5644_v5 = vor.u32 %v7509_v58, %v5643_v57  ;;  %v7534_v58 = vld [vmem:[#allocation5 + $0xdb4] sm:$0xf0]  ;;  %v5952_v47 = vor.u32 %v7583_v34, %v5949_v35  ;;  %v6043_v34 = vld [vmem:[#allocation7] sm:$0xf] }
  0xda   :  { %1961 = vmatpush.bf16.msrb.mxu0 %v5540_v7  ;;  %1120 = vmatpush.bf16.msrb.mxu3 %v5496_v49  ;;  %v985_v2 = vpop.f32.mrf.mxu0  ;;  %v5176_v7 = vor.u32 %v7386_v0, %v5173_v1  ;;  %v7606_v49 = vld [vmem:[#allocation5 + $0xff4] sm:$0xf0]  ;;  %v7354_v0 = vld [vmem:[#allocation5 + $0x41c] sm:$0xf] }
  0xdb   :  { %1108 = vmatpush.bf16.msrb.mxu2 %v5208_v55  ;;  %v6036_v57 = vor.u32 %v7606_v49, %v6035_v45  ;;  %v5045_v1 = vld [vmem:[#allocation5 + $0x438] sm:$0xf0]  ;;  %v5907_v45 = vld [vmem:[#allocation5 + $0xed8] sm:$0xf]  ;;  %v5917_v49 = vld [vmem:[#allocation5 + $0xf20] sm:$0xf0] }
  0xdc   :  { %1974 = vmatpush.bf16.msrb.mxu1 %v5796_v9  ;;  %v998_v6 = vpop.f32.mrf.mxu1  ;;  %v5611_v9 = vld [vmem:[#allocation5 + $0xc90] sm:$0xf]  ;;  %v5048_v3 = vor.u32 %v7354_v0, %v5045_v1  ;;  %v5587_v1 = vld [vmem:[#allocation5 + $0xc58] sm:$0xf] }
  0xdd   :  { %1962 = vmatmul.bf16.vlgmr.msrb.gmra.mxu0 %v8271_v36 }
  0xde   :  { %2006 = vmatpush.bf16.msra.mxu0 %v5772_v10  ;;  %v7501_v10 = vld [vmem:[#allocation5 + $0xcac] sm:$0xf0]  ;;  %1121 = vmatpush.bf16.msrb.mxu3 %v5464_v63  ;;  %v5336_v63 = vor.u32 %v7426_v50, %v5333_v51 }
  0xdf   :  { %1975 = vmatmul.bf16.vlgmr.msrb.gmra.mxu1 %v8273_v40  ;;  %v5612_v19 = vor.u32 %v7501_v10, %v5611_v9  ;;  %1109 = vmatpush.bf16.msrb.mxu2 %v5176_v7  ;;  %v7599_v10 = vld [vmem:[#allocation5 + $0xfc4] sm:$0xf] }
  0xe0   :  { %2019 = vmatpush.bf16.msra.mxu1 %v6028_v12  ;;  %v8285_v12 = vadd.f32 %v998_v6, %v985_v2  ;;  %v7418_v2 = vld [vmem:[#allocation5 + $0x61c] sm:$0xf]  ;;  %v5757_v6 = vld [vmem:[#allocation5 + $0xde0] sm:$0xf0] }
  0xe1   :  { %v5304_v15 = vor.u32 %v7418_v2, %v5301_v4  ;;  %v5632_v2 = vor.u32 %v7503_v59, %v5629_v60  ;;  %v7592_v60 = vld [vmem:[#allocation5 + $0xf8c] sm:$0xf] }
  0xe2   :  { %2007 = vmatpush.bf16.msra.mxu0 %v5740_v24  ;;  %v5835_v24 = vld [vmem:[#allocation5 + $0xe50] sm:$0xf]  ;;  %1122 = vmatpush.bf16.msrb.mxu3 %v5432_v14  ;;  %v987_v29 = vpop.f32.mrf.mxu0  ;;  %v7526_v14 = vld [vmem:[#allocation5 + $0xd74] sm:$0xf0] }
  0xe3   :  { %1110 = vmatpush.bf16.msrb.mxu2 %v5144_v20  ;;  %v5836_v41 = vor.u32 %v7557_v25, %v5835_v24  ;;  %v6016_v20 = vor.u32 %v7599_v10, %v6013_v11  ;;  %v5683_v24 = vld [vmem:[#allocation5 + $0xd18] sm:$0xf]  ;;  %v5728_v25 = vor.u32 %v7527_v16, %v5725_v17  ;;  %v5693_v29 = vld [vmem:[#allocation5 + $0xd60] sm:$0xf0] }
  0xe4   :  { %2020 = vmatpush.bf16.msra.mxu1 %v5996_v28  ;;  %v5109_v28 = vld [vmem:[#allocation5 + $0x4b8] sm:$0xf0]  ;;  %v1000_v38 = vpop.f32.mrf.mxu1  ;;  %v5555_v16 = vld [vmem:[#allocation5 + $0xc18] sm:$0xf] }
  0xe5   :  { %v5112_v39 = vor.u32 %v7370_v27, %v5109_v28  ;;  %v7518_v27 = vld [vmem:[#allocation5 + $0xd34] sm:$0xf0]  ;;  %v7519_v28 = vld [vmem:[#allocation5 + $0xd44] sm:$0xf] }
  0xe6   :  { %2008 = vmatpush.bf16.msra.mxu0 %v5708_v42  ;;  %v7549_v42 = vld [vmem:[#allocation5 + $0xe2c] sm:$0xf0]  ;;  %1123 = vmatpush.bf16.msrb.mxu3 %v5400_v26  ;;  %v5651_v38 = vld [vmem:[#allocation5 + $0xcd8] sm:$0xf] }
  0xe7   :  { %1111 = vmatpush.bf16.msrb.mxu2 %v5112_v39  ;;  %v5696_v39 = vor.u32 %v7519_v28, %v5693_v29  ;;  %v7486_v17 = vld [vmem:[#allocation5 + $0xc34] sm:$0xf0]  ;;  %v6053_v29 = vld [vmem:[#allocation7 + $0x18] sm:$0xf0] }
  0xe8   :  { %2021 = vmatpush.bf16.msra.mxu1 %v5964_v44  ;;  %v7542_v44 = vld [vmem:[#allocation5 + $0xdf4] sm:$0xf0] }
  0xe9   :  { %v5780_v55 = vor.u32 %v7542_v44, %v5779_v43  ;;  %v7511_v43 = vld [vmem:[#allocation5 + $0xd04] sm:$0xf] }
  0xea   :  { %2009 = vmatpush.bf16.msra.mxu0 %v5676_v54  ;;  %v5804_v54 = vor.u32 %v7549_v42, %v5803_v37  ;;  %1124 = vmatpush.bf16.msrb.mxu3 %v5368_v46  ;;  %v5684_v37 = vor.u32 %v7518_v27, %v5683_v24  ;;  %v7510_v42 = vld [vmem:[#allocation5 + $0xcf4] sm:$0xf0]  ;;  %v5661_v44 = vld [vmem:[#allocation5 + $0xd20] sm:$0xf0]  ;;  %v7609_v27 = vld [vmem:[#allocation7 + $0x14] sm:$0xf] }
  0xeb   :  { %1112 = vmatpush.bf16.msrb.mxu2 %v5080_v53  ;;  %v7574_v46 = vld [vmem:[#allocation5 + $0xef4] sm:$0xf0]  ;;  %v5652_v50 = vor.u32 %v7510_v42, %v5651_v38  ;;  %v5565_v24 = vld [vmem:[#allocation5 + $0xc60] sm:$0xf0] }
  0xec   :  { %2022 = vmatpush.bf16.msra.mxu1 %v5932_v56  ;;  %v5747_v56 = vld [vmem:[#allocation5 + $0xd98] sm:$0xf]  ;;  %v5908_v53 = vor.u32 %v7574_v46, %v5907_v45  ;;  %v5533_v42 = vld [vmem:[#allocation5 + $0xc20] sm:$0xf0]  ;;  %v7536_v46 = vld [vmem:[#allocation5 + $0xdcc] sm:$0xf] }
  0xed   :  { %v5748_v7 = vor.u32 %v7534_v58, %v5747_v56 }
  0xee   :  { %2010 = vmatpush.bf16.msra.mxu0 %v5644_v5  ;;  %v7535_v5 = vld [vmem:[#allocation5 + $0xdc4] sm:$0xf]  ;;  %1125 = vmatpush.bf16.msrb.mxu3 %v5336_v63 }
  0xef   :  { %v5760_v9 = vor.u32 %v7535_v5, %v5757_v6  ;;  %1113 = vmatpush.bf16.msrb.mxu2 %v5048_v3  ;;  %v7567_v63 = vld [vmem:[#allocation5 + $0xec4] sm:$0xf]  ;;  %v7494_v5 = vld [vmem:[#allocation5 + $0xc74] sm:$0xf0] }
  0xf0   :  { %2023 = vmatpush.bf16.msra.mxu1 %v5900_v8  ;;  %v5715_v8 = vld [vmem:[#allocation5 + $0xd58] sm:$0xf]  ;;  %v5885_v3 = vld [vmem:[#allocation5 + $0xee0] sm:$0xf0] }
  0xf1   :  { %v5716_v23 = vor.u32 %v7526_v14, %v5715_v8  ;;  %v7495_v6 = vld [vmem:[#allocation5 + $0xc84] sm:$0xf]  ;;  %v5843_v8 = vld [vmem:[#allocation5 + $0xe58] sm:$0xf]  ;;  %v5888_v10 = vor.u32 %v7567_v63, %v5885_v3  ;;  %v5989_v63 = vld [vmem:[#allocation5 + $0xfa8] sm:$0xf0] }
  0xf2   :  { %2011 = vmatpush.bf16.msra.mxu0 %v5612_v19  ;;  %v7590_v19 = vld [vmem:[#allocation5 + $0xf74] sm:$0xf0]  ;;  %1126 = vmatpush.bf16.msrb.mxu3 %v5304_v15  ;;  %v5853_v14 = vld [vmem:[#allocation5 + $0xea0] sm:$0xf0]  ;;  %v5588_v15 = vor.u32 %v7494_v5, %v5587_v1  ;;  %v7520_v1 = vld [vmem:[#allocation5 + $0xd4c] sm:$0xf]  ;;  %v5992_v3 = vor.u32 %v7592_v60, %v5989_v63 }
  0xf3   :  { %1928 = vmatpush.bf16.msra.mxu2 %v5760_v9  ;;  %v5972_v26 = vor.u32 %v7590_v19, %v5971_v18  ;;  %v7558_v9 = vld [vmem:[#allocation5 + $0xe74] sm:$0xf0]  ;;  %v5957_v5 = vld [vmem:[#allocation5 + $0xf68] sm:$0xf0]  ;;  %v7593_v63 = vld [vmem:[#allocation5 + $0xf94] sm:$0xf] }
  0xf4   :  { %2024 = vmatpush.bf16.msra.mxu1 %v5868_v21  ;;  %v7591_v21 = vld [vmem:[#allocation5 + $0xf84] sm:$0xf]  ;;  %1114 = vmatmul.bf16.vlgmr.msrb.gmra.mxu2 %v8257_v61  ;;  %v5811_v18 = vld [vmem:[#allocation5 + $0xe18] sm:$0xf] }
  0xf5   :  { %1127 = vmatmul.bf16.vlgmr.msrb.gmra.mxu3 %v8259_v62  ;;  %v7575_v61 = vld [vmem:[#allocation5 + $0xf04] sm:$0xf]  ;;  %v7566_v62 = vld [vmem:[#allocation5 + $0xeb4] sm:$0xf0] }
  0xf6   :  { %2012 = vmatpush.bf16.msra.mxu0 %v5580_v33  ;;  %1941 = vmatpush.bf16.msra.mxu3 %v6016_v20  ;;  %v5984_v33 = vor.u32 %v7591_v21, %v5981_v22  ;;  %v5920_v58 = vor.u32 %v7575_v61, %v5917_v49  ;;  %v5844_v21 = vor.u32 %v7558_v9, %v5843_v8  ;;  %v7550_v22 = vld [vmem:[#allocation5 + $0xe34] sm:$0xf0]  ;;  %v7543_v61 = vld [vmem:[#allocation5 + $0xe04] sm:$0xf]  ;;  %v5669_v8 = vld [vmem:[#allocation5 + $0xd28] sm:$0xf0] }
  0xf7   :  { %1929 = vmatpush.bf16.msra.mxu2 %v5728_v25  ;;  %v6051_v25 = vld [vmem:[#allocation7 + $0x10] sm:$0xf]  ;;  %v5789_v49 = vld [vmem:[#allocation5 + $0xe20] sm:$0xf0] }
  0xf8   :  { %2025 = vmatpush.bf16.msra.mxu1 %v5836_v41  ;;  %v5940_v41 = vor.u32 %v7582_v32, %v5939_v30  ;;  %v7551_v30 = vld [vmem:[#allocation5 + $0xe44] sm:$0xf] }
  0xf9   :  { %v5821_v32 = vld [vmem:[#allocation5 + $0xe60] sm:$0xf0] }
  0xfa   :  { %2013 = vmatpush.bf16.msra.mxu0 %v5548_v52  ;;  %1942 = vmatpush.bf16.msra.mxu3 %v5984_v33  ;;  %v1037_v48 = vpop.f32.mrf.mxu0  ;;  %v5664_v52 = vor.u32 %v7511_v43, %v5661_v44  ;;  %v5556_v33 = vor.u32 %v7486_v17, %v5555_v16  ;;  %v6056_v43 = vor.u32 %v7609_v27, %v6053_v29  ;;  %v7607_v44 = vld [vmem:[#allocation7 + $0x4] sm:$0xf]  ;;  %v7560_v29 = vld [vmem:[#allocation5 + $0xe8c] sm:$0xf] }
  0xfb   :  { %1930 = vmatpush.bf16.msra.mxu2 %v5696_v39  ;;  %v7608_v39 = vld [vmem:[#allocation7 + $0x4] sm:$0xf0]  ;;  %v5824_v45 = vor.u32 %v7551_v30, %v5821_v32  ;;  %v5861_v30 = vld [vmem:[#allocation5 + $0xea8] sm:$0xf0] }
  0xfc   :  { %2026 = vmatpush.bf16.msra.mxu1 %v5804_v54  ;;  %v1050_v51 = vpop.f32.mrf.mxu1  ;;  %v5619_v54 = vld [vmem:[#allocation5 + $0xc98] sm:$0xf] }
  0xfd   :  { %2014 = vmatmul.bf16.vlgmr.msra.gmra.mxu0 %v8271_v36  ;;  %v8291_v56 = vadd.f32 %v1050_v51, %v1037_v48  ;;  %v6045_v48 = vld [vmem:[#allocation7 + $0x8] sm:$0xf0] }
  0xfe   :  { %2058 = vmatpush.bf16.msrb.mxu0 %v5780_v55  ;;  %v7502_v55 = vld [vmem:[#allocation5 + $0xcb4] sm:$0xf0]  ;;  %1943 = vmatpush.bf16.msra.mxu3 %v5952_v47  ;;  %v5765_v47 = vld [vmem:[#allocation5 + $0xde8] sm:$0xf0] }
  0xff   :  { %2027 = vmatmul.bf16.vlgmr.msra.gmra.mxu1 %v8273_v40  ;;  %v5620_v0 = vor.u32 %v7502_v55, %v5619_v54  ;;  %1931 = vmatpush.bf16.msra.mxu2 %v5664_v52  ;;  %v7600_v51 = vld [vmem:[#allocation5 + $0xfcc] sm:$0xf]  ;;  %v5768_v54 = vor.u32 %v7536_v46, %v5765_v47  ;;  %v6048_v55 = vor.u32 %v7607_v44, %v6045_v48  ;;  %v7537_v48 = vld [vmem:[#allocation5 + $0xdd4] sm:$0xf] }
 0x100   :  { %2071 = vmatpush.bf16.msrb.mxu1 %v6036_v57  ;;  %v5875_v57 = vld [vmem:[#allocation5 + $0xe98] sm:$0xf]  ;;  %v6021_v52 = vld [vmem:[#allocation5 + $0xfe8] sm:$0xf0] }
 0x101   :  { %v5876_v4 = vor.u32 %v7566_v62, %v5875_v57  ;;  %v5792_v57 = vor.u32 %v7543_v61, %v5789_v49  ;;  %v7528_v62 = vld [vmem:[#allocation5 + $0xd8c] sm:$0xf]  ;;  %v6024_v59 = vor.u32 %v7600_v51, %v6021_v52  ;;  %v5773_v61 = vld [vmem:[#allocation5 + $0xdf0] sm:$0xf0] }
 0x102   :  { %2059 = vmatpush.bf16.msrb.mxu0 %v5748_v7  ;;  %v5597_v7 = vld [vmem:[#allocation5 + $0xca0] sm:$0xf0]  ;;  %1944 = vmatpush.bf16.msra.mxu3 %v5920_v58  ;;  %v1039_v11 = vpop.f32.mrf.mxu0  ;;  %v5733_v58 = vld [vmem:[#allocation5 + $0xda8] sm:$0xf0]  ;;  %v7601_v52 = vld [vmem:[#allocation5 + $0xfd4] sm:$0xf] }
 0x103   :  { %1932 = vmatpush.bf16.msra.mxu2 %v5632_v2  ;;  %v5600_v20 = vor.u32 %v7495_v6, %v5597_v7  ;;  %v5701_v2 = vld [vmem:[#allocation5 + $0xd68] sm:$0xf0] }
 0x104   :  { %2072 = vmatpush.bf16.msrb.mxu1 %v6004_v13  ;;  %v7559_v13 = vld [vmem:[#allocation5 + $0xe84] sm:$0xf]  ;;  %v1052_v19 = vpop.f32.mrf.mxu1  ;;  %v5704_v6 = vor.u32 %v7520_v1, %v5701_v2  ;;  %v7512_v7 = vld [vmem:[#allocation5 + $0xd0c] sm:$0xf]  ;;  %v7521_v2 = vld [vmem:[#allocation5 + $0xd54] sm:$0xf] }
 0x105   :  { %v5856_v28 = vor.u32 %v7559_v13, %v5853_v14  ;;  %v7576_v13 = vld [vmem:[#allocation5 + $0xf0c] sm:$0xf]  ;;  %v5672_v16 = vor.u32 %v7512_v7, %v5669_v8  ;;  %v7513_v8 = vld [vmem:[#allocation5 + $0xd14] sm:$0xf] }
 0x106   :  { %2060 = vmatpush.bf16.msrb.mxu0 %v5716_v23  ;;  %v7487_v23 = vld [vmem:[#allocation5 + $0xc44] sm:$0xf]  ;;  %1945 = vmatpush.bf16.msra.mxu3 %v5888_v10  ;;  %v2110_v10 = vld [vmem:[#allocation2] sm:$0xff]  ;;  %v5925_v14 = vld [vmem:[#allocation5 + $0xf28] sm:$0xf0] }
 0x107   :  { %1933 = vmatpush.bf16.msra.mxu2 %v5600_v20  ;;  %v5568_v35 = vor.u32 %v7487_v23, %v5565_v24  ;;  %v5637_v19 = vld [vmem:[#allocation5 + $0xce8] sm:$0xf0]  ;;  %v2111_v20 = vpack.c.bf16 %v2110_v10, %v2110_v10 }
 0x108   :  { %2073 = vmatpush.bf16.msrb.mxu1 %v5972_v26  ;;  %v7610_v26 = vld [vmem:[#allocation7 + $0x14] sm:$0xf0]  ;;  %v5893_v23 = vld [vmem:[#allocation5 + $0xee8] sm:$0xf0] }
 0x109   :  { %v6052_v38 = vor.u32 %v7610_v26, %v6051_v25  ;;  %v7496_v25 = vld [vmem:[#allocation5 + $0xc8c] sm:$0xf] }
 0x10a   :  { %2061 = vmatpush.bf16.msrb.mxu0 %v5684_v37  ;;  %v5812_v37 = vor.u32 %v7550_v22, %v5811_v18  ;;  %1946 = vmatpush.bf16.msra.mxu3 %v5856_v28  ;;  %v7504_v18 = vld [vmem:[#allocation5 + $0xccc] sm:$0xf] }
 0x10b   :  { %1934 = vmatpush.bf16.msra.mxu2 %v5568_v35  ;;  %v7568_v22 = vld [vmem:[#allocation5 + $0xecc] sm:$0xf]  ;;  %v5640_v24 = vor.u32 %v7504_v18, %v5637_v19  ;;  %v7505_v19 = vld [vmem:[#allocation5 + $0xcd4] sm:$0xf] }
 0x10c   :  { %2074 = vmatpush.bf16.msrb.mxu1 %v5940_v41  ;;  %v7479_v41 = vld [vmem:[#allocation5 + $0xc04] sm:$0xf]  ;;  %v5605_v26 = vld [vmem:[#allocation5 + $0xca8] sm:$0xf0]  ;;  %v5896_v27 = vor.u32 %v7568_v22, %v5893_v23  ;;  %v7569_v22 = vld [vmem:[#allocation5 + $0xed4] sm:$0xf] }
 0x10d   :  { %v7488_v35 = vld [vmem:[#allocation5 + $0xc4c] sm:$0xf]  ;;  %v5901_v23 = vld [vmem:[#allocation5 + $0xef0] sm:$0xf0] }
 0x10e   :  { %2062 = vmatpush.bf16.msrb.mxu0 %v5652_v50  ;;  %v5536_v50 = vor.u32 %v7479_v41, %v5533_v42  ;;  %1947 = vmatpush.bf16.msra.mxu3 %v5824_v45  ;;  %v7552_v42 = vld [vmem:[#allocation5 + $0xe4c] sm:$0xf] }
 0x10f   :  { %v7480_v45 = vld [vmem:[#allocation5 + $0xc0c] sm:$0xf] }
 0x110   :  { %2075 = vmatpush.bf16.msrb.mxu1 %v5908_v53  ;;  %v6044_v53 = vor.u32 %v7608_v39, %v6043_v34  ;;  %1935 = vmatpush.bf16.msra.mxu2 %v5536_v50  ;;  %v5864_v39 = vor.u32 %v7560_v29, %v5861_v30  ;;  %v5541_v46 = vld [vmem:[#allocation5 + $0xc28] sm:$0xf0]  ;;  %v7561_v29 = vld [vmem:[#allocation5 + $0xe94] sm:$0xf] }
 0x111   :  { %v7544_v49 = vld [vmem:[#allocation5 + $0xe0c] sm:$0xf]  ;;  %v5544_v51 = vor.u32 %v7480_v45, %v5541_v46  ;;  %v5869_v30 = vld [vmem:[#allocation5 + $0xeb0] sm:$0xf0] }
 0x112   :  { %2063 = vmatpush.bf16.msrb.mxu0 %v5620_v0  ;;  %v5736_v0 = vor.u32 %v7528_v62, %v5733_v58  ;;  %1948 = vmatpush.bf16.msra.mxu3 %v5792_v57  ;;  %v5797_v50 = vld [vmem:[#allocation5 + $0xe28] sm:$0xf0]  ;;  %v7529_v58 = vld [vmem:[#allocation5 + $0xd94] sm:$0xf] }
 0x113   :  { %1936 = vmatmul.bf16.vlgmr.msra.gmra.mxu2 %v8271_v36  ;;  %v959_v34 = vpop.f32.mrf.mxu2  ;;  %v5800_v62 = vor.u32 %v7544_v49, %v5797_v50  ;;  %v7481_v46 = vld [vmem:[#allocation5 + $0xc14] sm:$0xf]  ;;  %v5781_v49 = vld [vmem:[#allocation5 + $0xdf8] sm:$0xf0] }
 0x114   :  { %2076 = vmatpush.bf16.msrb.mxu1 %v5876_v4  ;;  %1980 = vmatpush.bf16.msrb.mxu2 %v5768_v54  ;;  %v7584_v4 = vld [vmem:[#allocation5 + $0xf4c] sm:$0xf]  ;;  %v7545_v50 = vld [vmem:[#allocation5 + $0xe14] sm:$0xf] }
 0x115   :  { %1949 = vmatmul.bf16.vlgmr.msra.gmra.mxu3 %v8273_v40  ;;  %v5960_v9 = vor.u32 %v7584_v4, %v5957_v5  ;;  %v7585_v5 = vld [vmem:[#allocation5 + $0xf54] sm:$0xf] }
 0x116   :  { %2064 = vmatpush.bf16.msrb.mxu0 %v5588_v15  ;;  %1993 = vmatpush.bf16.msrb.mxu3 %v6024_v59  ;;  %v5741_v59 = vld [vmem:[#allocation5 + $0xdb0] sm:$0xf0] }
 0x117   :  { %v5744_v1 = vor.u32 %v7529_v58, %v5741_v59  ;;  %v7530_v59 = vld [vmem:[#allocation5 + $0xd9c] sm:$0xf] }
 0x118   :  { %2077 = vmatpush.bf16.msrb.mxu1 %v5844_v21  ;;  %1981 = vmatpush.bf16.msrb.mxu2 %v5736_v0  ;;  %v5928_v21 = vor.u32 %v7576_v13, %v5925_v14  ;;  %v5997_v0 = vld [vmem:[#allocation5 + $0xfb0] sm:$0xf0] }
 0x119   :  { %v6000_v4 = vor.u32 %v7593_v63, %v5997_v0  ;;  %v7577_v13 = vld [vmem:[#allocation5 + $0xf14] sm:$0xf]  ;;  %v7594_v0 = vld [vmem:[#allocation5 + $0xf9c] sm:$0xf] }
 0x11a   :  { %2065 = vmatpush.bf16.msrb.mxu0 %v5556_v33  ;;  %1994 = vmatpush.bf16.msrb.mxu3 %v5992_v3  ;;  %v1089_v11 = vpop.f32.mrf.mxu0  ;;  %v5608_v33 = vor.u32 %v7496_v25, %v5605_v26  ;;  %v5709_v3 = vld [vmem:[#allocation5 + $0xd70] sm:$0xf0] }
 0x11b   :  { %v961_v54 = vpop.f32.mrf.mxu2  ;;  %v5712_v7 = vor.u32 %v7521_v2, %v5709_v3  ;;  %v5933_v14 = vld [vmem:[#allocation5 + $0xf30] sm:$0xf0]  ;;  %v7522_v3 = vld [vmem:[#allocation5 + $0xd5c] sm:$0xf] }
 0x11c   :  { %2078 = vmatpush.bf16.msrb.mxu1 %v5812_v37  ;;  %v1102_v15 = vpop.f32.mrf.mxu1  ;;  %1982 = vmatpush.bf16.msrb.mxu2 %v5704_v6  ;;  %v5573_v37 = vld [vmem:[#allocation5 + $0xc68] sm:$0xf0]  ;;  %v5965_v6 = vld [vmem:[#allocation5 + $0xf70] sm:$0xf0]  ;;  %v6037_v54 = vld [vmem:[#allocation5 + $0xff8] sm:$0xf0] }
 0x11d   :  { %2066 = vmatmul.bf16.vlgmr.msrb.gmra.mxu0 %v8271_v36  ;;  %v8297_v17 = vadd.f32 %v1102_v15, %v1089_v11  ;;  %v5576_v44 = vor.u32 %v7488_v35, %v5573_v37  ;;  %v5968_v10 = vor.u32 %v7585_v5, %v5965_v6  ;;  %v7497_v25 = vld [vmem:[#allocation5 + $0xc94] sm:$0xf]  ;;  %v7586_v6 = vld [vmem:[#allocation5 + $0xf5c] sm:$0xf] }
 0x11e   :  { %2152 = vmatpush.bf16.msra.mxu0 %v6052_v38  ;;  %1995 = vmatpush.bf16.msrb.mxu3 %v5960_v9  ;;  %v972_v38 = vpop.f32.mrf.mxu3  ;;  %v5677_v9 = vld [vmem:[#allocation5 + $0xd30] sm:$0xf0] }
 0x11f   :  { %2079 = vmatmul.bf16.vlgmr.msrb.gmra.mxu1 %v8273_v40  ;;  %v8299_v41 = vadd.f32 %v972_v38, %v959_v34  ;;  %v5613_v26 = vld [vmem:[#allocation5 + $0xcb0] sm:$0xf0] }
 0x120   :  { %2165 = vmatpush.bf16.msra.mxu1 %v6056_v43  ;;  %1983 = vmatpush.bf16.msrb.mxu2 %v5672_v16  ;;  %v5829_v43 = vld [vmem:[#allocation5 + $0xe68] sm:$0xf0]  ;;  %v5680_v16 = vor.u32 %v7513_v8, %v5677_v9  ;;  %v7489_v34 = vld [vmem:[#allocation5 + $0xc54] sm:$0xf]  ;;  %v7514_v9 = vld [vmem:[#allocation5 + $0xd1c] sm:$0xf] }
 0x121   :  { %v5832_v47 = vor.u32 %v7552_v42, %v5829_v43  ;;  %v5581_v35 = vld [vmem:[#allocation5 + $0xc70] sm:$0xf0] }
 0x122   :  { %2153 = vmatpush.bf16.msra.mxu0 %v6044_v53  ;;  %1996 = vmatpush.bf16.msrb.mxu3 %v5928_v21  ;;  %v1091_v28 = vpop.f32.mrf.mxu0  ;;  %v6029_v53 = vld [vmem:[#allocation5 + $0xff0] sm:$0xf0]  ;;  %v5936_v21 = vor.u32 %v7577_v13, %v5933_v14  ;;  %v5584_v45 = vor.u32 %v7489_v34, %v5581_v35  ;;  %v7578_v14 = vld [vmem:[#allocation5 + $0xf1c] sm:$0xf] }
 0x123   :  { %v6032_v60 = vor.u32 %v7601_v52, %v6029_v53  ;;  %v7553_v43 = vld [vmem:[#allocation5 + $0xe54] sm:$0xf]  ;;  %v7602_v53 = vld [vmem:[#allocation5 + $0xfdc] sm:$0xf] }
 0x124   :  { %2166 = vmatpush.bf16.msra.mxu1 %v6048_v55  ;;  %v1104_v32 = vpop.f32.mrf.mxu1  ;;  %1984 = vmatpush.bf16.msrb.mxu2 %v5640_v24  ;;  %v5776_v55 = vor.u32 %v7537_v48, %v5773_v61  ;;  %v7538_v61 = vld [vmem:[#allocation5 + $0xddc] sm:$0xf]  ;;  %v6040_v63 = vor.u32 %v7602_v53, %v6037_v54  ;;  %v6111_v53 = vld [vmem:[#allocation7 + $0x88] sm:$0xf0]  ;;  %v7639_v54 = vld [vmem:[#allocation7 + $0x104] sm:$0xf] }
 0x126   :  { %1997 = vmatpush.bf16.msrb.mxu3 %v5896_v27  ;;  %v974_v57 = vpop.f32.mrf.mxu3  ;;  %v5904_v27 = vor.u32 %v7569_v22, %v5901_v23  ;;  %v5653_v22 = vld [vmem:[#allocation5 + $0xcf8] sm:$0xf0] }
 0x128   :  { %1985 = vmatpush.bf16.msrb.mxu2 %v5608_v33  ;;  %v5616_v33 = vor.u32 %v7497_v25, %v5613_v26  ;;  %v5909_v25 = vld [vmem:[#allocation5 + $0xef8] sm:$0xf0] }
 0x12a   :  { %1998 = vmatpush.bf16.msrb.mxu3 %v5864_v39  ;;  %v5872_v39 = vor.u32 %v7561_v29, %v5869_v30 }
 0x12c   :  { %1986 = vmatpush.bf16.msrb.mxu2 %v5576_v44  ;;  %v5837_v44 = vld [vmem:[#allocation5 + $0xe70] sm:$0xf0] }
 0x12d   :  { %6057 = vmatmul.msk.bf16.vlgmr.msra.gmra.mxu0 %vm2142_vm0, %v2111_v20  ;;  %v5840_v48 = vor.u32 %v7553_v43, %v5837_v44  ;;  %v6119_v43 = vld [vmem:[#allocation7 + $0x98] sm:$0xf0] }
 0x12e   :  { %1999 = vmatpush.bf16.msrb.mxu3 %v5832_v47  ;;  %v5549_v47 = vld [vmem:[#allocation5 + $0xc30] sm:$0xf0] }
 0x12f   :  { %6058 = vmatmul.msk.bf16.vlgmr.msra.gmra.mxu1 %vm2142_vm0, %v2111_v20  ;;  %v5645_v20 = vld [vmem:[#allocation5 + $0xcf0] sm:$0xf0]  ;;  %v5552_v52 = vor.u32 %v7481_v46, %v5549_v47 }
 0x130   :  { %1987 = vmatpush.bf16.msrb.mxu2 %v5544_v51  ;;  %v5648_v24 = vor.u32 %v7505_v19, %v5645_v20  ;;  %v5805_v51 = vld [vmem:[#allocation5 + $0xe30] sm:$0xf0] }
 0x131   :  { %v5808_v58 = vor.u32 %v7545_v50, %v5805_v51  ;;  %v7641_v47 = vld [vmem:[#allocation7 + $0x114] sm:$0xf] }
 0x132   :  { %2000 = vmatpush.bf16.msrb.mxu3 %v5800_v62 }
 0x133   :  { %1988 = vmatmul.bf16.vlgmr.msrb.gmra.mxu2 %v8271_v36 }
 0x134   :  { %2032 = vmatpush.bf16.msra.mxu2 %v5776_v55  ;;  %v5784_v55 = vor.u32 %v7538_v61, %v5781_v49  ;;  %v7554_v61 = vld [vmem:[#allocation5 + $0xe5c] sm:$0xf] }
 0x135   :  { %2001 = vmatmul.bf16.vlgmr.msrb.gmra.mxu3 %v8273_v40  ;;  %v1011_v37 = vpop.f32.mrf.mxu2  ;;  %v5845_v49 = vld [vmem:[#allocation5 + $0xe78] sm:$0xf0] }
 0x136   :  { %2045 = vmatpush.bf16.msra.mxu3 %v6032_v60  ;;  %v5749_v60 = vld [vmem:[#allocation5 + $0xdb8] sm:$0xf0] }
 0x137   :  { %v1024_v38 = vpop.f32.mrf.mxu3  ;;  %v5752_v2 = vor.u32 %v7530_v59, %v5749_v60  ;;  %v5848_v59 = vor.u32 %v7554_v61, %v5845_v49  ;;  %v6117_v60 = vld [vmem:[#allocation7 + $0x90] sm:$0xf]  ;;  %v6159_v61 = vld [vmem:[#allocation7 + $0xe8] sm:$0xf0] }
 0x138   :  { %2033 = vmatpush.bf16.msra.mxu2 %v5744_v1  ;;  %v8305_v42 = vadd.f32 %v1024_v38, %v1011_v37  ;;  %v6005_v1 = vld [vmem:[#allocation5 + $0xfb8] sm:$0xf0] }
 0x139   :  { %v6008_v5 = vor.u32 %v7594_v0, %v6005_v1  ;;  %v7490_v37 = vld [vmem:[#allocation5 + $0xc5c] sm:$0xf] }
 0x13a   :  { %2046 = vmatpush.bf16.msra.mxu3 %v6000_v4  ;;  %v1911_v11 = vpop.f32.mrf.mxu0  ;;  %v5717_v4 = vld [vmem:[#allocation5 + $0xd78] sm:$0xf0] }
 0x13b   :  { %v5720_v8 = vor.u32 %v7522_v3, %v5717_v4  ;;  %v5589_v38 = vld [vmem:[#allocation5 + $0xc78] sm:$0xf0]  ;;  %v6181_v4 = vld [vmem:[#allocation7 + $0x110] sm:$0xf] }
 0x13c   :  { %v1924_v15 = vpop.f32.mrf.mxu1  ;;  %2034 = vmatpush.bf16.msra.mxu2 %v5712_v7  ;;  %v5973_v7 = vld [vmem:[#allocation5 + $0xf78] sm:$0xf0]  ;;  %v5592_v51 = vor.u32 %v7490_v37, %v5589_v38 }
 0x13d   :  { %v8303_v18 = vadd.f32 %v1924_v15, %v1911_v11  ;;  %v1013_v57 = vpop.f32.mrf.mxu2  ;;  %v5976_v11 = vor.u32 %v7586_v6, %v5973_v7  ;;  %v5941_v15 = vld [vmem:[#allocation5 + $0xf38] sm:$0xf0] }
 0x13e   :  { %2047 = vmatpush.bf16.msra.mxu3 %v5968_v10  ;;  %v5685_v10 = vld [vmem:[#allocation5 + $0xd38] sm:$0xf0]  ;;  %v5944_v23 = vor.u32 %v7578_v14, %v5941_v15  ;;  %v7640_v14 = vld [vmem:[#allocation7 + $0x104] sm:$0xf0] }
 0x13f   :  { %v1026_v62 = vpop.f32.mrf.mxu3  ;;  %v5688_v19 = vor.u32 %v7514_v9, %v5685_v10  ;;  %v5557_v57 = vld [vmem:[#allocation5 + $0xc38] sm:$0xf0]  ;;  %v6109_v9 = vld [vmem:[#allocation7 + $0x80] sm:$0xf]  ;;  %v7624_v10 = vld [vmem:[#allocation7 + $0x84] sm:$0xf0] }
 0x140   :  { %2035 = vmatpush.bf16.msra.mxu2 %v5680_v16  ;;  %v7546_v1 = vld [vmem:[#allocation5 + $0xe1c] sm:$0xf]  ;;  %v6110_v15 = vor.u32 %v7624_v10, %v6109_v9  ;;  %v7631_v9 = vld [vmem:[#allocation7 + $0xc4] sm:$0xf] }
 0x142   :  { %2048 = vmatpush.bf16.msra.mxu3 %v5936_v21  ;;  %v1913_v28 = vpop.f32.mrf.mxu0  ;;  %v7506_v21 = vld [vmem:[#allocation5 + $0xcdc] sm:$0xf] }
 0x143   :  { %v5656_v26 = vor.u32 %v7506_v21, %v5653_v22  ;;  %v5621_v28 = vld [vmem:[#allocation5 + $0xcb8] sm:$0xf0]  ;;  %v7622_v21 = vld [vmem:[#allocation7 + $0x74] sm:$0xf0]  ;;  %v6165_v22 = vld [vmem:[#allocation7 + $0xf0] sm:$0xf] }
 0x144   :  { %v1926_v32 = vpop.f32.mrf.mxu1  ;;  %2036 = vmatpush.bf16.msra.mxu2 %v5648_v24  ;;  %v7570_v24 = vld [vmem:[#allocation5 + $0xedc] sm:$0xf] }
 0x145   :  { %v5912_v29 = vor.u32 %v7570_v24, %v5909_v25  ;;  %v7562_v32 = vld [vmem:[#allocation5 + $0xe9c] sm:$0xf]  ;;  %v7638_v24 = vld [vmem:[#allocation7 + $0xf4] sm:$0xf0]  ;;  %v7621_v25 = vld [vmem:[#allocation7 + $0x74] sm:$0xf] }
 0x146   :  { %2049 = vmatpush.bf16.msra.mxu3 %v5904_v27  ;;  %v7498_v27 = vld [vmem:[#allocation5 + $0xc9c] sm:$0xf] }
 0x147   :  { %v5624_v35 = vor.u32 %v7498_v27, %v5621_v28  ;;  %v7637_v28 = vld [vmem:[#allocation7 + $0xf4] sm:$0xf] }
 0x148   :  { %2037 = vmatpush.bf16.msra.mxu2 %v5616_v33  ;;  %v5877_v33 = vld [vmem:[#allocation5 + $0xeb8] sm:$0xf0] }
 0x14a   :  { %2050 = vmatpush.bf16.msra.mxu3 %v5872_v39  ;;  %v7625_v39 = vld [vmem:[#allocation7 + $0x94] sm:$0xf] }
 0x14b   :  { %v6122_v46 = vor.u32 %v7625_v39, %v6119_v43  ;;  %v7636_v39 = vld [vmem:[#allocation7 + $0xe4] sm:$0xf0]  ;;  %v7619_v43 = vld [vmem:[#allocation7 + $0x64] sm:$0xf] }
 0x14c   :  { %2038 = vmatpush.bf16.msra.mxu2 %v5584_v45  ;;  %v5880_v45 = vor.u32 %v7562_v32, %v5877_v33 }
 0x14d   :  { %2405 = vmatpush.bf16.msrb.mxu0 %v6122_v46 }
 0x14e   :  { %2051 = vmatpush.bf16.msra.mxu3 %v5840_v48  ;;  %v6183_v48 = vld [vmem:[#allocation7 + $0x118] sm:$0xf0] }
 0x14f   :  { %v6186_v50 = vor.u32 %v7641_v47, %v6183_v48  ;;  %v7635_v48 = vld [vmem:[#allocation7 + $0xe4] sm:$0xf] }
 0x150   :  { %2039 = vmatpush.bf16.msra.mxu2 %v5552_v52  ;;  %v7623_v52 = vld [vmem:[#allocation7 + $0x84] sm:$0xf] }
 0x151   :  { %2418 = vmatpush.bf16.msrb.mxu1 %v6186_v50  ;;  %v6114_v62 = vor.u32 %v7623_v52, %v6111_v53  ;;  %v6162_v50 = vor.u32 %v7635_v48, %v6159_v61  ;;  %v6085_v52 = vld [vmem:[#allocation7 + $0x50] sm:$0xf]  ;;  %v7618_v53 = vld [vmem:[#allocation7 + $0x54] sm:$0xf0] }
 0x152   :  { %2052 = vmatpush.bf16.msra.mxu3 %v5808_v58  ;;  %v6175_v58 = vld [vmem:[#allocation7 + $0x108] sm:$0xf0] }
 0x153   :  { %2040 = vmatmul.bf16.vlgmr.msra.gmra.mxu2 %v8271_v36  ;;  %v6178_v0 = vor.u32 %v7639_v54, %v6175_v58  ;;  %2406 = vmatpush.bf16.msrb.mxu0 %v6114_v62  ;;  %v6086_v54 = vor.u32 %v7618_v53, %v6085_v52  ;;  %v6087_v62 = vld [vmem:[#allocation7 + $0x58] sm:$0xf0] }
 0x154   :  { %2084 = vmatpush.bf16.msrb.mxu2 %v5784_v55  ;;  %v7482_v55 = vld [vmem:[#allocation5 + $0xc1c] sm:$0xf] }
 0x155   :  { %2053 = vmatmul.bf16.vlgmr.msra.gmra.mxu3 %v8273_v40  ;;  %v5560_v3 = vor.u32 %v7482_v55, %v5557_v57  ;;  %2419 = vmatpush.bf16.msrb.mxu1 %v6178_v0  ;;  %v7634_v55 = vld [vmem:[#allocation7 + $0xd4] sm:$0xf0]  ;;  %v7617_v57 = vld [vmem:[#allocation7 + $0x54] sm:$0xf] }
 0x156   :  { %2097 = vmatpush.bf16.msrb.mxu3 %v6040_v63  ;;  %v7626_v63 = vld [vmem:[#allocation7 + $0x94] sm:$0xf0]  ;;  %v6090_v58 = vor.u32 %v7617_v57, %v6087_v62 }
 0x157   :  { %v8311_v44 = vpop.f32.mrf.mxu2  ;;  %v6118_v6 = vor.u32 %v7626_v63, %v6117_v60  ;;  %v6151_v60 = vld [vmem:[#allocation7 + $0xd8] sm:$0xf0]  ;;  %v6077_v63 = vld [vmem:[#allocation7 + $0x40] sm:$0xf] }
 0x158   :  { %2085 = vmatpush.bf16.msrb.mxu2 %v5752_v2  ;;  %v5813_v2 = vld [vmem:[#allocation5 + $0xe38] sm:$0xf0]  ;;  %v1076_v33 = vpop.f32.mrf.mxu3 }
 0x159   :  { %v8316_v38 = vadd.f32 %v1076_v33, %v8311_v44  ;;  %v6149_v44 = vld [vmem:[#allocation7 + $0xd0] sm:$0xf]  ;;  %v6061_v33 = vld [vmem:[#allocation7 + $0x20] sm:$0xf] }
 0x15a   :  { %2098 = vmatpush.bf16.msrb.mxu3 %v6008_v5  ;;  %v1963_v13 = vpop.f32.mrf.mxu0  ;;  %v7642_v5 = vld [vmem:[#allocation7 + $0x114] sm:$0xf0]  ;;  %v6150_v0 = vor.u32 %v7634_v55, %v6149_v44 }
 0x15c   :  { %v1976_v16 = vpop.f32.mrf.mxu1  ;;  %2086 = vmatpush.bf16.msrb.mxu2 %v5720_v8  ;;  %v5816_v8 = vor.u32 %v7546_v1, %v5813_v2 }
 0x15d   :  { %v8309_v20 = vadd.f32 %v1976_v16, %v1963_v13  ;;  %v6173_v13 = vld [vmem:[#allocation7 + $0x100] sm:$0xf] }
 0x15e   :  { %2099 = vmatpush.bf16.msrb.mxu3 %v5976_v11  ;;  %v6182_v11 = vor.u32 %v7642_v5, %v6181_v4  ;;  %v6174_v16 = vor.u32 %v7640_v14, %v6173_v13  ;;  %v6141_v4 = vld [vmem:[#allocation7 + $0xc0] sm:$0xf]  ;;  %v7632_v5 = vld [vmem:[#allocation7 + $0xc4] sm:$0xf0]  ;;  %v6143_v14 = vld [vmem:[#allocation7 + $0xc8] sm:$0xf0] }
 0x15f   :  { %v1065_v7 = vpop.f32.mrf.mxu2 }
 0x160   :  { %2087 = vmatpush.bf16.msrb.mxu2 %v5688_v19  ;;  %v6101_v19 = vld [vmem:[#allocation7 + $0x70] sm:$0xf]  ;;  %v1078_v2 = vpop.f32.mrf.mxu3  ;;  %v7615_v7 = vld [vmem:[#allocation7 + $0x44] sm:$0xf] }
 0x162   :  { %2100 = vmatpush.bf16.msrb.mxu3 %v5944_v23  ;;  %v1965_v30 = vpop.f32.mrf.mxu0  ;;  %v6102_v23 = vor.u32 %v7622_v21, %v6101_v19  ;;  %v6069_v19 = vld [vmem:[#allocation7 + $0x30] sm:$0xf]  ;;  %v7614_v21 = vld [vmem:[#allocation7 + $0x34] sm:$0xf0] }
 0x163   :  { %v6166_v30 = vor.u32 %v7638_v24, %v6165_v22  ;;  %v6133_v22 = vld [vmem:[#allocation7 + $0xb0] sm:$0xf]  ;;  %v7630_v24 = vld [vmem:[#allocation7 + $0xb4] sm:$0xf0] }
 0x164   :  { %v1978_v34 = vpop.f32.mrf.mxu1  ;;  %2088 = vmatpush.bf16.msrb.mxu2 %v5656_v26  ;;  %v6103_v26 = vld [vmem:[#allocation7 + $0x78] sm:$0xf0] }
 0x165   :  { %v6106_v27 = vor.u32 %v7621_v25, %v6103_v26  ;;  %v6093_v34 = vld [vmem:[#allocation7 + $0x60] sm:$0xf]  ;;  %v7613_v25 = vld [vmem:[#allocation7 + $0x34] sm:$0xf]  ;;  %v6071_v26 = vld [vmem:[#allocation7 + $0x38] sm:$0xf0] }
 0x166   :  { %2101 = vmatpush.bf16.msrb.mxu3 %v5912_v29  ;;  %v6167_v29 = vld [vmem:[#allocation7 + $0xf8] sm:$0xf0] }
 0x167   :  { %v6170_v32 = vor.u32 %v7637_v28, %v6167_v29  ;;  %2407 = vmatpush.bf16.msrb.mxu0 %v6106_v27  ;;  %v7629_v27 = vld [vmem:[#allocation7 + $0xb4] sm:$0xf]  ;;  %v6135_v28 = vld [vmem:[#allocation7 + $0xb8] sm:$0xf0]  ;;  %v6134_v29 = vor.u32 %v7630_v24, %v6133_v22 }
 0x168   :  { %2089 = vmatpush.bf16.msrb.mxu2 %v5624_v35  ;;  %v7620_v35 = vld [vmem:[#allocation7 + $0x64] sm:$0xf0] }
 0x169   :  { %2420 = vmatpush.bf16.msrb.mxu1 %v6170_v32  ;;  %v6138_v32 = vor.u32 %v7629_v27, %v6135_v28  ;;  %v7699_v27 = vld [vmem:[#allocation5 + $0x1c4] sm:$0xf] }
 0x16a   :  { %2102 = vmatpush.bf16.msrb.mxu3 %v5880_v45  ;;  %v6095_v45 = vld [vmem:[#allocation7 + $0x68] sm:$0xf0] }
 0x16b   :  { %v6098_v47 = vor.u32 %v7619_v43, %v6095_v45  ;;  %v6063_v43 = vld [vmem:[#allocation7 + $0x28] sm:$0xf0] }
 0x16c   :  { %2090 = vmatpush.bf16.msrb.mxu2 %v5592_v51 }
 0x16d   :  { %2408 = vmatpush.bf16.msrb.mxu0 %v6098_v47  ;;  %2421 = vmatpush.bf16.msrb.mxu1 %v6162_v50 }
 0x16e   :  { %2103 = vmatpush.bf16.msrb.mxu3 %v5848_v59  ;;  %v7633_v59 = vld [vmem:[#allocation7 + $0xd4] sm:$0xf] }
 0x16f   :  { %v6154_v1 = vor.u32 %v7633_v59, %v6151_v60 }
 0x170   :  { %2091 = vmatpush.bf16.msrb.mxu2 %v5560_v3  ;;  %v7616_v3 = vld [vmem:[#allocation7 + $0x44] sm:$0xf0] }
 0x171   :  { %2409 = vmatpush.bf16.msrb.mxu0 %v6090_v58  ;;  %2422 = vmatpush.bf16.msrb.mxu1 %v6154_v1  ;;  %v2116_v58 = vld [vmem:[#allocation8] ss:$8 sm:$0x3] }
 0x172   :  { %2104 = vmatpush.bf16.msrb.mxu3 %v5816_v8  ;;  %v6079_v8 = vld [vmem:[#allocation7 + $0x48] sm:$0xf0]  ;;  %v2119_v1 = vperm.slane %v2116_v58, 1 }
 0x173   :  { %2092 = vmatmul.bf16.vlgmr.msrb.gmra.mxu2 %v8271_v36  ;;  %v6157_v36 = vld [vmem:[#allocation7 + $0xe0] sm:$0xf]  ;;  %v6082_v13 = vor.u32 %v7615_v7, %v6079_v8  ;;  %v7763_v7 = vld [vmem:[#allocation5 + $0x3c4] sm:$0xf] }
 0x174   :  { %2379 = vmatpush.bf16.msra.mxu2 %v6118_v6  ;;  %v6158_v51 = vor.u32 %v7636_v39, %v6157_v36  ;;  %v7611_v39 = vld [vmem:[#allocation7 + $0x24] sm:$0xf] }
 0x175   :  { %2105 = vmatmul.bf16.vlgmr.msrb.gmra.mxu3 %v8273_v40  ;;  %v6094_v40 = vor.u32 %v7620_v35, %v6093_v34  ;;  %2410 = vmatpush.bf16.msrb.mxu0 %v6082_v13  ;;  %v7612_v34 = vld [vmem:[#allocation7 + $0x24] sm:$0xf0]  ;;  %v6125_v35 = vld [vmem:[#allocation7 + $0xa0] sm:$0xf]  ;;  %v6066_v45 = vor.u32 %v7611_v39, %v6063_v43  ;;  %v7747_v43 = vld [vmem:[#allocation5 + $0x344] sm:$0xf] }
 0x176   :  { %2392 = vmatpush.bf16.msra.mxu3 %v6182_v11  ;;  %v6078_v11 = vor.u32 %v7616_v3, %v6077_v63  ;;  %v6062_v36 = vor.u32 %v7612_v34, %v6061_v33  ;;  %v2118_v63 = vperm.slane %v2116_v58, 0  ;;  %v6637_v13 = vld [vmem:[#allocation5 + $0x380] sm:$0xf]  ;;  %v6415_v33 = vld [vmem:[#allocation5 + $0x1e0] sm:$0xf0] }
 0x177   :  { %v1115_v61 = vpop.f32.mrf.mxu2  ;;  %v6605_v34 = vld [vmem:[#allocation5 + $0x340] sm:$0xf]  ;;  %v6418_v39 = vor.u32 %v7699_v27, %v6415_v33  ;;  %v7739_v58 = vld [vmem:[#allocation5 + $0x304] sm:$0xf] }
 0x178   :  { %2380 = vmatpush.bf16.msra.mxu2 %v6110_v15  ;;  %v6146_v15 = vor.u32 %v7631_v9, %v6143_v14  ;;  %v1128_v50 = vpop.f32.mrf.mxu3  ;;  %v7759_v14 = vld [vmem:[#allocation5 + $0x39c] sm:$0xf0] }
 0x179   :  { %v7727_v27 = vld [vmem:[#allocation5 + $0x29c] sm:$0xf0] }
 0x17a   :  { %2393 = vmatpush.bf16.msra.mxu3 %v6174_v16  ;;  %v2015_v37 = vpop.f32.mrf.mxu0  ;;  %v6142_v16 = vor.u32 %v7632_v5, %v6141_v4  ;;  %2423 = vmatpush.bf16.msrb.mxu1 %v6146_v15  ;;  %v6669_v5 = vld [vmem:[#allocation5 + $0x3c0] sm:$0xf] }
 0x17b   :  { %v6285_v33 = vld [vmem:[#allocation5 + $0xc0] sm:$0xf] }
 0x17c   :  { %v2028_v46 = vpop.f32.mrf.mxu1  ;;  %2381 = vmatpush.bf16.msra.mxu2 %v6102_v23  ;;  %v6070_v23 = vor.u32 %v7614_v21, %v6069_v19  ;;  %v7755_v19 = vld [vmem:[#allocation5 + $0x384] sm:$0xf] }
 0x17d   :  { %v8318_v49 = vadd.f32 %v2028_v46, %v2015_v37  ;;  %v7628_v37 = vld [vmem:[#allocation7 + $0xa4] sm:$0xf0]  ;;  %v7627_v46 = vld [vmem:[#allocation7 + $0xa4] sm:$0xf] }
 0x17e   :  { %2394 = vmatpush.bf16.msra.mxu3 %v6166_v30  ;;  %v6074_v30 = vor.u32 %v7613_v25, %v6071_v26  ;;  %2424 = vmatpush.bf16.msrb.mxu1 %v6138_v32  ;;  %v6126_v47 = vor.u32 %v7628_v37, %v6125_v35  ;;  %v6413_v25 = vld [vmem:[#allocation5 + $0x1c0] sm:$0xf] }
 0x17f   :  { %v1117_v44 = vpop.f32.mrf.mxu2  ;;  %v7703_v26 = vld [vmem:[#allocation5 + $0x1dc] sm:$0xf0] }
 0x180   :  { %2382 = vmatpush.bf16.msra.mxu2 %v6094_v40  ;;  %2411 = vmatpush.bf16.msrb.mxu0 %v6074_v30  ;;  %v6127_v40 = vld [vmem:[#allocation7 + $0xa8] sm:$0xf0]  ;;  %v1130_v55 = vpop.f32.mrf.mxu3  ;;  %v6638_v30 = vor.u32 %v7759_v14, %v6637_v13  ;;  %v7751_v35 = vld [vmem:[#allocation5 + $0x35c] sm:$0xf0]  ;;  %v6414_v37 = vor.u32 %v7703_v26, %v6413_v25  ;;  %v6543_v13 = vld [vmem:[#allocation5 + $0x2e0] sm:$0xf0] }
 0x181   :  { %v6130_v48 = vor.u32 %v7627_v46, %v6127_v40  ;;  %v6381_v46 = vld [vmem:[#allocation5 + $0x180] sm:$0xf] }
 0x182   :  { %2395 = vmatpush.bf16.msra.mxu3 %v6158_v51  ;;  %v2017_v6 = vpop.f32.mrf.mxu0  ;;  %v8320_v51 = vadd.f32 %v1128_v50, %v1115_v61  ;;  %v6383_v61 = vld [vmem:[#allocation5 + $0x1a0] sm:$0xf0]  ;;  %v6573_v44 = vld [vmem:[#allocation5 + $0x300] sm:$0xf] }
 0x183   :  { %2425 = vmatpush.bf16.msrb.mxu1 %v6130_v48  ;;  %v7767_v6 = vld [vmem:[#allocation5 + $0x3dc] sm:$0xf0]  ;;  %v7691_v48 = vld [vmem:[#allocation5 + $0x184] sm:$0xf] }
 0x184   :  { %v2030_v10 = vpop.f32.mrf.mxu1  ;;  %2383 = vmatpush.bf16.msra.mxu2 %v6086_v54  ;;  %2412 = vmatpush.bf16.msrb.mxu0 %v6066_v45  ;;  %v6607_v45 = vld [vmem:[#allocation5 + $0x360] sm:$0xf0]  ;;  %v6317_v14 = vld [vmem:[#allocation5 + $0x100] sm:$0xf] }
 0x185   :  { %v6670_v10 = vor.u32 %v7767_v6, %v6669_v5  ;;  %v6351_v5 = vld [vmem:[#allocation5 + $0x160] sm:$0xf0] }
 0x186   :  { %2396 = vmatpush.bf16.msra.mxu3 %v6150_v0 }
 0x188   :  { %2384 = vmatpush.bf16.msra.mxu2 %v6078_v11  ;;  %v6671_v11 = vld [vmem:[#allocation5 + $0x3e0] sm:$0xf0]  ;;  %3233 = vmatpush.bf16.msra.mxu0 %v6418_v39 }
 0x18a   :  { %2397 = vmatpush.bf16.msra.mxu3 %v6142_v16  ;;  %v6674_v16 = vor.u32 %v7763_v7, %v6671_v11 }
 0x18c   :  { %2385 = vmatpush.bf16.msra.mxu2 %v6070_v23  ;;  %v6639_v23 = vld [vmem:[#allocation5 + $0x3a0] sm:$0xf0]  ;;  %3246 = vmatpush.bf16.msra.mxu1 %v6674_v16 }
 0x18d   :  { %v6642_v32 = vor.u32 %v7755_v19, %v6639_v23  ;;  %v6319_v23 = vld [vmem:[#allocation5 + $0x120] sm:$0xf0] }
 0x18e   :  { %2398 = vmatpush.bf16.msra.mxu3 %v6134_v29 }
 0x190   :  { %2386 = vmatpush.bf16.msra.mxu2 %v6062_v36  ;;  %3247 = vmatpush.bf16.msra.mxu1 %v6642_v32 }
 0x192   :  { %2399 = vmatpush.bf16.msra.mxu3 %v6126_v47  ;;  %v7695_v47 = vld [vmem:[#allocation5 + $0x19c] sm:$0xf0] }
 0x193   :  { %v6382_v55 = vor.u32 %v7695_v47, %v6381_v46  ;;  %v7715_v46 = vld [vmem:[#allocation5 + $0x244] sm:$0xf] }
 0x194   :  { %3207 = vmatpush.bf16.msrb.mxu2 %v6414_v37  ;;  %v6287_v37 = vld [vmem:[#allocation5 + $0xe0] sm:$0xf0] }
 0x196   :  { %v1937_v59 = vpop.f32.mrf.mxu2  ;;  %3220 = vmatpush.bf16.msrb.mxu3 %v6670_v10  ;;  %v7731_v10 = vld [vmem:[#allocation5 + $0x2c4] sm:$0xf] }
 0x197   :  { %v6546_v19 = vor.u32 %v7731_v10, %v6543_v13  ;;  %v7655_v10 = vld [vmem:[#allocation5 + $0x5c] sm:$0xf0] }
 0x198   :  { %v1950_v60 = vpop.f32.mrf.mxu3  ;;  %3208 = vmatpush.bf16.msrb.mxu2 %v6382_v55  ;;  %v6255_v55 = vld [vmem:[#allocation5 + $0xa0] sm:$0xf0] }
 0x199   :  { %v8324_v0 = vadd.f32 %v1950_v60, %v1937_v59  ;;  %v6575_v59 = vld [vmem:[#allocation5 + $0x320] sm:$0xf0] }
 0x19a   :  { %v2067_v52 = vpop.f32.mrf.mxu0  ;;  %3221 = vmatpush.bf16.msrb.mxu3 %v6638_v30 }
 0x19c   :  { %v2080_v53 = vpop.f32.mrf.mxu1 }
 0x19d   :  { %v8322_v54 = vadd.f32 %v2080_v53, %v2067_v52  ;;  %v6606_v52 = vor.u32 %v7751_v35, %v6605_v34  ;;  %v6610_v53 = vor.u32 %v7747_v43, %v6607_v45  ;;  %v7671_v34 = vld [vmem:[#allocation5 + $0xdc] sm:$0xf0]  ;;  %v7667_v35 = vld [vmem:[#allocation5 + $0xc4] sm:$0xf] }
 0x19e   :  { %v1939_v9 = vpop.f32.mrf.mxu2  ;;  %v6290_v39 = vor.u32 %v7667_v35, %v6287_v37  ;;  %v6477_v43 = vld [vmem:[#allocation5 + $0x240] sm:$0xf]  ;;  %v7704_v37 = vld [vmem:[#allocation5 + $0x1e4] sm:$0xf0] }
 0x19f   :  { %3222 = vmatpush.bf16.msrb.mxu3 %v6606_v52  ;;  %3248 = vmatpush.bf16.msra.mxu1 %v6610_v53  ;;  %v7735_v9 = vld [vmem:[#allocation5 + $0x2dc] sm:$0xf0] }
 0x1a0   :  { %v1952_v22 = vpop.f32.mrf.mxu3  ;;  %v7719_v45 = vld [vmem:[#allocation5 + $0x25c] sm:$0xf0] }
 0x1a1   :  { %v7675_v22 = vld [vmem:[#allocation5 + $0x104] sm:$0xf]  ;;  %v6478_v47 = vor.u32 %v7719_v45, %v6477_v43  ;;  %v6423_v43 = vld [vmem:[#allocation5 + $0x1e8] sm:$0xf0] }
 0x1a2   :  { %v2069_v57 = vpop.f32.mrf.mxu0  ;;  %v6322_v26 = vor.u32 %v7675_v22, %v6319_v23  ;;  %v7756_v22 = vld [vmem:[#allocation5 + $0x38c] sm:$0xf] }
 0x1a3   :  { %v6386_v57 = vor.u32 %v7691_v48, %v6383_v61  ;;  %v6479_v48 = vld [vmem:[#allocation5 + $0x260] sm:$0xf0]  ;;  %v6253_v61 = vld [vmem:[#allocation5 + $0x80] sm:$0xf] }
 0x1a4   :  { %v2082_v62 = vpop.f32.mrf.mxu1  ;;  %v6482_v52 = vor.u32 %v7715_v46, %v6479_v48  ;;  %v7748_v48 = vld [vmem:[#allocation5 + $0x34c] sm:$0xf] }
 0x1a5   :  { %v7743_v62 = vld [vmem:[#allocation5 + $0x31c] sm:$0xf0]  ;;  %3234 = vmatpush.bf16.msra.mxu0 %v6386_v57 }
 0x1a6   :  { %v6574_v60 = vor.u32 %v7743_v62, %v6573_v44  ;;  %v7659_v44 = vld [vmem:[#allocation5 + $0x84] sm:$0xf]  ;;  %v6445_v57 = vld [vmem:[#allocation5 + $0x200] sm:$0xf] }
 0x1a8   :  { %3223 = vmatpush.bf16.msrb.mxu3 %v6574_v60  ;;  %v7707_v60 = vld [vmem:[#allocation5 + $0x204] sm:$0xf] }
 0x1aa   :  { %v2155_v2 = vpop.f32.mrf.mxu0 }
 0x1ab   :  { %v2156_v3 = vadd.f32 %v2155_v2, %v2118_v63  ;;  %v6578_v63 = vor.u32 %v7739_v58, %v6575_v59  ;;  %v7687_v2 = vld [vmem:[#allocation5 + $0x15c] sm:$0xf0]  ;;  %v6258_v58 = vor.u32 %v7659_v44, %v6255_v55 }
 0x1ac   :  { %v2168_v4 = vpop.f32.mrf.mxu1  ;;  %v7711_v59 = vld [vmem:[#allocation5 + $0x21c] sm:$0xf0] }
 0x1ad   :  { %v2169_v8 = vadd.f32 %v2168_v4, %v2119_v1  ;;  %vm2172_vm1 = vcmp.gt.f32.partialorder %v2156_v3, 0.0  ;;  %v2174_v15 = vmul.f32 0.05, %v2156_v3  ;;  %3249 = vmatpush.bf16.msra.mxu1 %v6578_v63  ;;  %v6349_v1 = vld [vmem:[#allocation5 + $0x140] sm:$0xf] }
 0x1ae   :  { %v6350_v4 = vor.u32 %v7687_v2, %v6349_v1  ;;  %v6447_v63 = vld [vmem:[#allocation5 + $0x220] sm:$0xf0]  ;;  %v6446_v1 = vor.u32 %v7711_v59, %v6445_v57  ;;  %v6677_v2 = vld [vmem:[#allocation5 + $0x3c8] sm:$0xf]  ;;  %v7692_v57 = vld [vmem:[#allocation5 + $0x18c] sm:$0xf] }
 0x1af   :  { %vm2173_vm2 = vcmp.gt.f32.partialorder %v2169_v8, 0.0  ;;  %v2175_v21 = vmul.f32 0.05, %v2169_v8  ;;  %v2176_v24 = vsel %vm2172_vm1, %v2156_v3, %v2174_v15  ;;  %v7683_v3 = vld [vmem:[#allocation5 + $0x144] sm:$0xf] }
 0x1b0   :  { %v2178_v28 = vpack.c.bf16 %v2176_v24, %v2176_v24  ;;  %v6354_v6 = vor.u32 %v7683_v3, %v6351_v5  ;;  %3209 = vmatpush.bf16.msrb.mxu2 %v6350_v4  ;;  %v7679_v15 = vld [vmem:[#allocation5 + $0x11c] sm:$0xf0]  ;;  %v7768_v3 = vld [vmem:[#allocation5 + $0x3e4] sm:$0xf0]  ;;  %v7764_v4 = vld [vmem:[#allocation5 + $0x3cc] sm:$0xf]  ;;  %v6450_v5 = vor.u32 %v7707_v60, %v6447_v63 }
 0x1b1   :  { %v2177_v29 = vsel %vm2173_vm2, %v2169_v8, %v2175_v21  ;;  %v6541_v8 = vld [vmem:[#allocation5 + $0x2c0] sm:$0xf]  ;;  %v6318_v21 = vor.u32 %v7679_v15, %v6317_v14  ;;  %3250 = vmatpush.bf16.msra.mxu1 %v6546_v19  ;;  %v6223_v14 = vld [vmem:[#allocation5 + $0x60] sm:$0xf0]  ;;  %v6645_v19 = vld [vmem:[#allocation5 + $0x388] sm:$0xf] }
 0x1b2   :  { %v2179_v36 = vpack.c.bf16 %v2177_v29, %v2177_v29  ;;  %v2157_v40 = vpop.f32.mrf.mxu0  ;;  %2387 = vmatmul.bf16.vlgmr.msra.gmra.mxu2 %v2178_v28  ;;  %2413 = vmatmul.bf16.vlgmr.msrb.gmra.mxu0 %v2178_v28  ;;  %v6542_v11 = vor.u32 %v7735_v9, %v6541_v8  ;;  %v6509_v24 = vld [vmem:[#allocation5 + $0x280] sm:$0xf]  ;;  %v7723_v28 = vld [vmem:[#allocation5 + $0x284] sm:$0xf]  ;;  %v6581_v59 = vld [vmem:[#allocation5 + $0x308] sm:$0xf] }
 0x1b3   :  { %3235 = vmatpush.bf16.msra.mxu0 %v6354_v6  ;;  %v6511_v29 = vld [vmem:[#allocation5 + $0x2a0] sm:$0xf0]  ;;  %v6510_v30 = vor.u32 %v7727_v27, %v6509_v24  ;;  %v6678_v6 = vor.u32 %v7768_v3, %v6677_v2  ;;  %v6221_v9 = vld [vmem:[#allocation5 + $0x40] sm:$0xf]  ;;  %v6647_v24 = vld [vmem:[#allocation5 + $0x3a8] sm:$0xf0] }
 0x1b4   :  { %v2170_v50 = vpop.f32.mrf.mxu1  ;;  %2400 = vmatmul.bf16.vlgmr.msra.gmra.mxu3 %v2179_v36  ;;  %2426 = vmatmul.bf16.vlgmr.msrb.gmra.mxu1 %v2179_v36  ;;  %v6514_v32 = vor.u32 %v7723_v28, %v6511_v29  ;;  %v6286_v36 = vor.u32 %v7671_v34, %v6285_v33  ;;  %v6222_v13 = vor.u32 %v7655_v10, %v6221_v9  ;;  %v7647_v27 = vld [vmem:[#allocation5 + $0x1c] sm:$0xf0]  ;;  %v6191_v33 = vld [vmem:[#allocation5 + $0x20] sm:$0xf0]  ;;  %v6421_v34 = vld [vmem:[#allocation5 + $0x1c8] sm:$0xf] }
 0x1b5   :  { %3224 = vmatpush.bf16.msrb.mxu3 %v6542_v11  ;;  %3210 = vmatpush.bf16.msrb.mxu2 %v6318_v21  ;;  %v7663_v50 = vld [vmem:[#allocation5 + $0x9c] sm:$0xf0]  ;;  %v7651_v11 = vld [vmem:[#allocation5 + $0x44] sm:$0xf]  ;;  %v7760_v21 = vld [vmem:[#allocation5 + $0x3a4] sm:$0xf0]  ;;  %v6650_v29 = vor.u32 %v7756_v22, %v6647_v24  ;;  %v6422_v45 = vor.u32 %v7704_v37, %v6421_v34 }
 0x1b6   :  { %v1989_v7 = vpop.f32.mrf.mxu2  ;;  %3251 = vmatpush.bf16.msra.mxu1 %v6514_v32  ;;  %v6254_v53 = vor.u32 %v7663_v50, %v6253_v61  ;;  %v6226_v15 = vor.u32 %v7651_v11, %v6223_v14  ;;  %v6646_v23 = vor.u32 %v7760_v21, %v6645_v19  ;;  %v7643_v32 = vld [vmem:[#allocation5 + $0x4] sm:$0xf]  ;;  %v6615_v50 = vld [vmem:[#allocation5 + $0x368] sm:$0xf0]  ;;  %v7744_v60 = vld [vmem:[#allocation5 + $0x324] sm:$0xf0] }
 0x1b7   :  { %3236 = vmatpush.bf16.msra.mxu0 %v6322_v26  ;;  %v6189_v26 = vld [vmem:[#allocation5] sm:$0xf]  ;;  %v6618_v44 = vor.u32 %v7748_v48, %v6615_v50  ;;  %v7740_v63 = vld [vmem:[#allocation5 + $0x30c] sm:$0xf]  ;;  %v6582_v2 = vor.u32 %v7744_v60, %v6581_v59  ;;  %v6549_v9 = vld [vmem:[#allocation5 + $0x2c8] sm:$0xf] }
 0x1b8   :  { %v2002_v16 = vpop.f32.mrf.mxu3  ;;  %v6583_v3 = vld [vmem:[#allocation5 + $0x328] sm:$0xf0]  ;;  %v7736_v14 = vld [vmem:[#allocation5 + $0x2e4] sm:$0xf0] }
 0x1b9   :  { %v8326_v25 = vadd.f32 %v2002_v16, %v1989_v7  ;;  %3225 = vmatpush.bf16.msrb.mxu3 %v6510_v30  ;;  %3211 = vmatpush.bf16.msrb.mxu2 %v6286_v36  ;;  %v6679_v7 = vld [vmem:[#allocation5 + $0x3e8] sm:$0xf0]  ;;  %v6190_v30 = vor.u32 %v7647_v27, %v6189_v26  ;;  %v6194_v36 = vor.u32 %v7643_v32, %v6191_v33  ;;  %v6325_v21 = vld [vmem:[#allocation5 + $0x108] sm:$0xf] }
 0x1ba   :  { %3252 = vmatpush.bf16.msra.mxu1 %v6482_v52  ;;  %v6682_v8 = vor.u32 %v7764_v4, %v6679_v7  ;;  %v6389_v52 = vld [vmem:[#allocation5 + $0x188] sm:$0xf]  ;;  %v7684_v7 = vld [vmem:[#allocation5 + $0x14c] sm:$0xf]  ;;  %v6550_v19 = vor.u32 %v7736_v14, %v6549_v9 }
 0x1bb   :  { %3237 = vmatpush.bf16.msra.mxu0 %v6290_v39  ;;  %v7700_v39 = vld [vmem:[#allocation5 + $0x1cc] sm:$0xf]  ;;  %v6357_v4 = vld [vmem:[#allocation5 + $0x148] sm:$0xf] }
 0x1bc   :  { %v6426_v46 = vor.u32 %v7700_v39, %v6423_v43  ;;  %v7680_v22 = vld [vmem:[#allocation5 + $0x124] sm:$0xf0]  ;;  %v6327_v26 = vld [vmem:[#allocation5 + $0x128] sm:$0xf0] }
 0x1bd   :  { %3226 = vmatpush.bf16.msrb.mxu3 %v6478_v47  ;;  %3212 = vmatpush.bf16.msrb.mxu2 %v6254_v53  ;;  %v7752_v47 = vld [vmem:[#allocation5 + $0x364] sm:$0xf0]  ;;  %v6326_v27 = vor.u32 %v7680_v22, %v6325_v21  ;;  %v7724_v39 = vld [vmem:[#allocation5 + $0x28c] sm:$0xf] }
 0x1be   :  { %v1991_v40 = vpop.f32.mrf.mxu2  ;;  %3253 = vmatpush.bf16.msra.mxu1 %v6450_v5  ;;  %v7696_v53 = vld [vmem:[#allocation5 + $0x1a4] sm:$0xf0]  ;;  %v7668_v48 = vld [vmem:[#allocation5 + $0xcc] sm:$0xf] }
 0x1bf   :  { %3238 = vmatpush.bf16.msra.mxu0 %v6258_v58  ;;  %v6613_v40 = vld [vmem:[#allocation5 + $0x348] sm:$0xf]  ;;  %v6390_v55 = vor.u32 %v7696_v53, %v6389_v52  ;;  %v6295_v50 = vld [vmem:[#allocation5 + $0xe8] sm:$0xf0] }
 0x1c0   :  { %v2004_v62 = vpop.f32.mrf.mxu3  ;;  %v6614_v61 = vor.u32 %v7752_v47, %v6613_v40  ;;  %v7688_v5 = vld [vmem:[#allocation5 + $0x164] sm:$0xf0]  ;;  %v6298_v52 = vor.u32 %v7668_v48, %v6295_v50  ;;  %v6231_v14 = vld [vmem:[#allocation5 + $0x68] sm:$0xf0] }
 0x1c1   :  { %3227 = vmatpush.bf16.msrb.mxu3 %v6446_v1  ;;  %3213 = vmatpush.bf16.msrb.mxu2 %v6222_v13  ;;  %v6391_v62 = vld [vmem:[#allocation5 + $0x1a8] sm:$0xf0]  ;;  %v6358_v11 = vor.u32 %v7688_v5, %v6357_v4  ;;  %v7728_v37 = vld [vmem:[#allocation5 + $0x2a4] sm:$0xf0] }
 0x1c2   :  { %3298 = vmatpush.bf16.msrb.mxu1 %v6682_v8  ;;  %v6394_v58 = vor.u32 %v7692_v57, %v6391_v62  ;;  %v6359_v8 = vld [vmem:[#allocation5 + $0x168] sm:$0xf0]  ;;  %v6293_v40 = vld [vmem:[#allocation5 + $0xc8] sm:$0xf] }
 0x1c3   :  { %3239 = vmatpush.bf16.msra.mxu0 %v6226_v15  ;;  %v6362_v13 = vor.u32 %v7684_v7, %v6359_v8  ;;  %v7732_v15 = vld [vmem:[#allocation5 + $0x2cc] sm:$0xf]  ;;  %v7672_v47 = vld [vmem:[#allocation5 + $0xe4] sm:$0xf0] }
 0x1c4   :  { %v6485_v53 = vld [vmem:[#allocation5 + $0x248] sm:$0xf]  ;;  %v6487_v62 = vld [vmem:[#allocation5 + $0x268] sm:$0xf0] }
 0x1c5   :  { %3272 = vmatpush.bf16.msra.mxu3 %v6678_v6  ;;  %3214 = vmatpush.bf16.msrb.mxu2 %v6190_v30  ;;  %v6586_v6 = vor.u32 %v7740_v63, %v6583_v3  ;;  %v6261_v59 = vld [vmem:[#allocation5 + $0x88] sm:$0xf]  ;;  %v7660_v63 = vld [vmem:[#allocation5 + $0x8c] sm:$0xf] }
 0x1c6   :  { %3299 = vmatpush.bf16.msrb.mxu1 %v6650_v29  ;;  %v7664_v60 = vld [vmem:[#allocation5 + $0xa4] sm:$0xf0]  ;;  %v6455_v8 = vld [vmem:[#allocation5 + $0x228] sm:$0xf0] }
 0x1c7   :  { %3240 = vmatpush.bf16.msra.mxu0 %v6194_v36  ;;  %v6517_v36 = vld [vmem:[#allocation5 + $0x288] sm:$0xf] }
 0x1c8   :  { %v6518_v43 = vor.u32 %v7728_v37, %v6517_v36  ;;  %v6453_v4 = vld [vmem:[#allocation5 + $0x208] sm:$0xf]  ;;  %v6685_v37 = vld [vmem:[#allocation5 + $0x3d0] sm:$0xf] }
 0x1c9   :  { %3273 = vmatpush.bf16.msra.mxu3 %v6646_v23  ;;  %3259 = vmatpush.bf16.msra.mxu2 %v6422_v45  ;;  %v7676_v23 = vld [vmem:[#allocation5 + $0x10c] sm:$0xf]  ;;  %v7712_v5 = vld [vmem:[#allocation5 + $0x224] sm:$0xf0] }
 0x1ca   :  { %3300 = vmatpush.bf16.msrb.mxu1 %v6618_v44  ;;  %v6519_v45 = vld [vmem:[#allocation5 + $0x2a8] sm:$0xf0]  ;;  %v7720_v44 = vld [vmem:[#allocation5 + $0x264] sm:$0xf0]  ;;  %v6454_v7 = vor.u32 %v7712_v5, %v6453_v4 }
 0x1cb   :  { %3285 = vmatpush.bf16.msrb.mxu0 %v6426_v46  ;;  %v6522_v46 = vor.u32 %v7724_v39, %v6519_v45  ;;  %v6486_v57 = vor.u32 %v7720_v44, %v6485_v53  ;;  %v7648_v21 = vld [vmem:[#allocation5 + $0x24] sm:$0xf0]  ;;  %v7769_v39 = vld [vmem:[#allocation5 + $0x3ec] sm:$0xf0]  ;;  %v6687_v45 = vld [vmem:[#allocation5 + $0x3f0] sm:$0xf0] }
 0x1cc   :  { %v6686_v50 = vor.u32 %v7769_v39, %v6685_v37  ;;  %v6653_v53 = vld [vmem:[#allocation5 + $0x390] sm:$0xf] }
 0x1cd   :  { %3274 = vmatpush.bf16.msra.mxu3 %v6614_v61  ;;  %3260 = vmatpush.bf16.msra.mxu2 %v6390_v55  ;;  %v6294_v61 = vor.u32 %v7672_v47, %v6293_v40  ;;  %v7716_v55 = vld [vmem:[#allocation5 + $0x24c] sm:$0xf]  ;;  %v6365_v37 = vld [vmem:[#allocation5 + $0x150] sm:$0xf] }
 0x1ce   :  { %3301 = vmatpush.bf16.msrb.mxu1 %v6586_v6  ;;  %v7708_v6 = vld [vmem:[#allocation5 + $0x20c] sm:$0xf]  ;;  %v7689_v39 = vld [vmem:[#allocation5 + $0x16c] sm:$0xf0] }
 0x1cf   :  { %3286 = vmatpush.bf16.msrb.mxu0 %v6394_v58  ;;  %v6490_v58 = vor.u32 %v7716_v55, %v6487_v62  ;;  %v6458_v9 = vor.u32 %v7708_v6, %v6455_v8  ;;  %v7757_v62 = vld [vmem:[#allocation5 + $0x394] sm:$0xf]  ;;  %v7753_v8 = vld [vmem:[#allocation5 + $0x36c] sm:$0xf0] }
 0x1d1   :  { %3275 = vmatpush.bf16.msra.mxu3 %v6582_v2  ;;  %3261 = vmatpush.bf16.msra.mxu2 %v6358_v11  ;;  %v6263_v2 = vld [vmem:[#allocation5 + $0xa8] sm:$0xf0]  ;;  %v7656_v11 = vld [vmem:[#allocation5 + $0x64] sm:$0xf0] }
 0x1d2   :  { %v6266_v3 = vor.u32 %v7660_v63, %v6263_v2  ;;  %v6429_v63 = vld [vmem:[#allocation5 + $0x1d0] sm:$0xf]  ;;  %v7701_v2 = vld [vmem:[#allocation5 + $0x1d4] sm:$0xf] }
 0x1d3   :  { %3287 = vmatpush.bf16.msrb.mxu0 %v6362_v13  ;;  %v7652_v13 = vld [vmem:[#allocation5 + $0x4c] sm:$0xf] }
 0x1d5   :  { %3276 = vmatpush.bf16.msra.mxu3 %v6550_v19  ;;  %3262 = vmatpush.bf16.msra.mxu2 %v6326_v27  ;;  %v6197_v19 = vld [vmem:[#allocation5 + $0x8] sm:$0xf] }
 0x1d6   :  { %v2041_v16 = vpop.f32.mrf.mxu2  ;;  %v6198_v22 = vor.u32 %v7648_v21, %v6197_v19  ;;  %v2213_v27 = vld [vmem:[#allocation8 + $0x1] ss:$8 sm:$0x3]  ;;  %v7697_v21 = vld [vmem:[#allocation5 + $0x1ac] sm:$0xf0] }
 0x1d7   :  { %v2215_v36 = vperm.slane %v2213_v27, 0 }
 0x1d8   :  { %v2054_v28 = vpop.f32.mrf.mxu3 }
 0x1d9   :  { %v8328_v35 = vadd.f32 %v2054_v28, %v2041_v16  ;;  %v6551_v16 = vld [vmem:[#allocation5 + $0x2e8] sm:$0xf0]  ;;  %v6330_v28 = vor.u32 %v7676_v23, %v6327_v26  ;;  %3277 = vmatpush.bf16.msra.mxu3 %v6518_v43  ;;  %3263 = vmatpush.bf16.msra.mxu2 %v6294_v61  ;;  %v7765_v43 = vld [vmem:[#allocation5 + $0x3d4] sm:$0xf] }
 0x1da   :  { %v6554_v24 = vor.u32 %v7732_v15, %v6551_v16  ;;  %v6234_v16 = vor.u32 %v7652_v13, %v6231_v14  ;;  %v7644_v23 = vld [vmem:[#allocation5 + $0xc] sm:$0xf] }
 0x1db   :  { %3288 = vmatpush.bf16.msrb.mxu0 %v6330_v28  ;;  %v2216_v28 = vperm.slane %v2213_v27, 1 }
 0x1dc   :  { %3302 = vmatpush.bf16.msrb.mxu1 %v6554_v24  ;;  %v6199_v24 = vld [vmem:[#allocation5 + $0x28] sm:$0xf0] }
 0x1dd   :  { %3278 = vmatpush.bf16.msra.mxu3 %v6486_v57  ;;  %v6202_v26 = vor.u32 %v7644_v23, %v6199_v24  ;;  %v7761_v57 = vld [vmem:[#allocation5 + $0x3ac] sm:$0xf0]  ;;  %v6399_v23 = vld [vmem:[#allocation5 + $0x1b0] sm:$0xf0] }
 0x1de   :  { %v2043_v1 = vpop.f32.mrf.mxu2  ;;  %v6654_v5 = vor.u32 %v7761_v57, %v6653_v53  ;;  %v7681_v57 = vld [vmem:[#allocation5 + $0x12c] sm:$0xf0] }
 0x1df   :  { %3289 = vmatpush.bf16.msrb.mxu0 %v6298_v52  ;;  %v6262_v1 = vor.u32 %v7664_v60, %v6261_v59  ;;  %v6690_v52 = vor.u32 %v7765_v43, %v6687_v45  ;;  %v7685_v43 = vld [vmem:[#allocation5 + $0x154] sm:$0xf] }
 0x1e0   :  { %v2056_v10 = vpop.f32.mrf.mxu3  ;;  %3303 = vmatpush.bf16.msrb.mxu1 %v6522_v46  ;;  %v6367_v45 = vld [vmem:[#allocation5 + $0x170] sm:$0xf0] }
 0x1e1   :  { %3264 = vmatpush.bf16.msra.mxu2 %v6262_v1  ;;  %v6229_v10 = vld [vmem:[#allocation5 + $0x48] sm:$0xf]  ;;  %3279 = vmatpush.bf16.msra.mxu3 %v6454_v7  ;;  %v7705_v1 = vld [vmem:[#allocation5 + $0x1ec] sm:$0xf0]  ;;  %v6370_v53 = vor.u32 %v7685_v43, %v6367_v45 }
 0x1e2   :  { %v6230_v15 = vor.u32 %v7656_v11, %v6229_v10  ;;  %v6621_v7 = vld [vmem:[#allocation5 + $0x350] sm:$0xf]  ;;  %v6623_v10 = vld [vmem:[#allocation5 + $0x370] sm:$0xf0]  ;;  %v6430_v13 = vor.u32 %v7705_v1, %v6429_v63 }
 0x1e3   :  { %3290 = vmatpush.bf16.msrb.mxu0 %v6266_v3  ;;  %v6431_v3 = vld [vmem:[#allocation5 + $0x1f0] sm:$0xf0]  ;;  %v6525_v63 = vld [vmem:[#allocation5 + $0x290] sm:$0xf] }
 0x1e4   :  { %3304 = vmatpush.bf16.msrb.mxu1 %v6490_v58  ;;  %v6655_v58 = vld [vmem:[#allocation5 + $0x3b0] sm:$0xf0]  ;;  %v6434_v14 = vor.u32 %v7701_v2, %v6431_v3  ;;  %v7729_v1 = vld [vmem:[#allocation5 + $0x2ac] sm:$0xf0] }
 0x1e5   :  { %3265 = vmatpush.bf16.msra.mxu2 %v6230_v15  ;;  %v6658_v6 = vor.u32 %v7757_v62, %v6655_v58  ;;  %v6397_v15 = vld [vmem:[#allocation5 + $0x190] sm:$0xf]  ;;  %v7677_v62 = vld [vmem:[#allocation5 + $0x114] sm:$0xf] }
 0x1e6   :  { %v6335_v58 = vld [vmem:[#allocation5 + $0x130] sm:$0xf0] }
 0x1e7   :  { %3291 = vmatpush.bf16.msrb.mxu0 %v6234_v16  ;;  %v7725_v2 = vld [vmem:[#allocation5 + $0x294] sm:$0xf] }
 0x1e8   :  { %3305 = vmatpush.bf16.msrb.mxu1 %v6458_v9  ;;  %v7749_v9 = vld [vmem:[#allocation5 + $0x354] sm:$0xf] }
 0x1e9   :  { %3266 = vmatpush.bf16.msra.mxu2 %v6198_v22  ;;  %v7693_v22 = vld [vmem:[#allocation5 + $0x194] sm:$0xf]  ;;  %v6626_v27 = vor.u32 %v7749_v9, %v6623_v10  ;;  %v6526_v10 = vor.u32 %v7729_v1, %v6525_v63  ;;  %v6663_v1 = vld [vmem:[#allocation5 + $0x3b8] sm:$0xf0] }
 0x1ea   :  { %v6527_v3 = vld [vmem:[#allocation5 + $0x2b0] sm:$0xf0] }
 0x1eb   :  { %3292 = vmatpush.bf16.msrb.mxu0 %v6202_v26  ;;  %v6622_v26 = vor.u32 %v7753_v8, %v6621_v7  ;;  %v7673_v7 = vld [vmem:[#allocation5 + $0xec] sm:$0xf0]  ;;  %v7669_v8 = vld [vmem:[#allocation5 + $0xd4] sm:$0xf] }
 0x1ec   :  { %v6303_v9 = vld [vmem:[#allocation5 + $0xf0] sm:$0xf0] }
 0x1f6   :  { %v2093_v29 = vpop.f32.mrf.mxu2 }
 0x1f8   :  { %v2106_v30 = vpop.f32.mrf.mxu3 }
 0x1f9   :  { %v8330_v32 = vadd.f32 %v2106_v30, %v2093_v29 }
 0x1fe   :  { %v2095_v33 = vpop.f32.mrf.mxu2 }
 0x200   :  { %v2108_v34 = vpop.f32.mrf.mxu3 }
 0x22f   :  { %v2414_v29 = vpop.f32.mrf.mxu0 }
 0x230   :  { %v2415_v30 = vadd.f32 %v2414_v29, %v2216_v28  ;;  %v6589_v28 = vld [vmem:[#allocation5 + $0x310] sm:$0xf] }
 0x231   :  { %v2427_v33 = vpop.f32.mrf.mxu1  ;;  %v7745_v29 = vld [vmem:[#allocation5 + $0x32c] sm:$0xf0] }
 0x232   :  { %v2428_v34 = vadd.f32 %v2427_v33, %v2415_v30  ;;  %v7741_v30 = vld [vmem:[#allocation5 + $0x314] sm:$0xf] }
 0x233   :  { %v6591_v33 = vld [vmem:[#allocation5 + $0x330] sm:$0xf0] }
 0x234   :  { %vm2432_vm3 = vcmp.gt.f32.partialorder %v2428_v34, 0.0  ;;  %v2434_v46 = vmul.f32 0.05, %v2428_v34 }
 0x235   :  { %v2388_v40 = vpop.f32.mrf.mxu2 }
 0x236   :  { %v2436_v47 = vsel %vm2432_vm3, %v2428_v34, %v2434_v46  ;;  %v2389_v48 = vadd.f32 %v2388_v40, %v2215_v36  ;;  %v6398_v34 = vor.u32 %v7697_v21, %v6397_v15  ;;  %v6402_v36 = vor.u32 %v7693_v22, %v6399_v23  ;;  %v7717_v15 = vld [vmem:[#allocation5 + $0x254] sm:$0xf]  ;;  %v6269_v23 = vld [vmem:[#allocation5 + $0x90] sm:$0xf] }
 0x237   :  { %v2401_v61 = vpop.f32.mrf.mxu3  ;;  %v8332_v44 = vpack.c.bf16 %v2436_v47, %v2436_v47  ;;  %v2416_v55 = vpop.f32.mrf.mxu0  ;;  %v6590_v46 = vor.u32 %v7745_v29, %v6589_v28  ;;  %v6594_v40 = vor.u32 %v7741_v30, %v6591_v33  ;;  %v6557_v47 = vld [vmem:[#allocation5 + $0x2d0] sm:$0xf]  ;;  %v6306_v22 = vor.u32 %v7669_v8, %v6303_v9  ;;  %v7702_v8 = vld [vmem:[#allocation5 + $0x1dc] sm:$0xf] }
 0x238   :  { %v2402_v59 = vadd.f32 %v2401_v61, %v2389_v48  ;;  %v7737_v48 = vld [vmem:[#allocation5 + $0x2ec] sm:$0xf0]  ;;  %v7733_v61 = vld [vmem:[#allocation5 + $0x2d4] sm:$0xf]  ;;  %v6439_v9 = vld [vmem:[#allocation5 + $0x1f8] sm:$0xf0] }
 0x239   :  { %v2429_v60 = vpop.f32.mrf.mxu1  ;;  %3228 = vmatmul.bf16.vlgmr.msrb.gmra.mxu3 %v8332_v44  ;;  %3254 = vmatmul.bf16.vlgmr.msra.gmra.mxu1 %v8332_v44  ;;  %v6333_v55 = vld [vmem:[#allocation5 + $0x110] sm:$0xf] }
 0x23a   :  { %vm2431_vm4 = vcmp.gt.f32.partialorder %v2402_v59, 0.0  ;;  %v2433_v4 = vmul.f32 0.05, %v2402_v59  ;;  %3324 = vmatpush.bf16.msrb.mxu3 %v6686_v50  ;;  %3350 = vmatpush.bf16.msra.mxu1 %v6690_v52  ;;  %v6559_v50 = vld [vmem:[#allocation5 + $0x2f0] sm:$0xf0]  ;;  %v6366_v52 = vor.u32 %v7689_v39, %v6365_v37 }
 0x23b   :  { %v6562_v60 = vor.u32 %v7733_v61, %v6559_v50  ;;  %v6461_v30 = vld [vmem:[#allocation5 + $0x210] sm:$0xf]  ;;  %v6693_v37 = vld [vmem:[#allocation5 + $0x3d8] sm:$0xf]  ;;  %v7653_v61 = vld [vmem:[#allocation5 + $0x54] sm:$0xf] }
 0x23c   :  { %v2435_v11 = vsel %vm2431_vm4, %v2402_v59, %v2433_v4  ;;  %v6558_v59 = vor.u32 %v7737_v48, %v6557_v47  ;;  %v6334_v4 = vor.u32 %v7681_v57, %v6333_v55  ;;  %v7713_v33 = vld [vmem:[#allocation5 + $0x22c] sm:$0xf0]  ;;  %v7770_v39 = vld [vmem:[#allocation5 + $0x3f4] sm:$0xf0]  ;;  %v6239_v50 = vld [vmem:[#allocation5 + $0x70] sm:$0xf0] }
 0x23d   :  { %v8336_v16 = vpack.c.bf16 %v2435_v11, %v2435_v11  ;;  %v2390_v19 = vpop.f32.mrf.mxu2  ;;  %v6530_v11 = vor.u32 %v7725_v2, %v6527_v3  ;;  %v6237_v47 = vld [vmem:[#allocation5 + $0x50] sm:$0xf]  ;;  %v6694_v55 = vor.u32 %v7770_v39, %v6693_v37  ;;  %v6242_v63 = vor.u32 %v7653_v61, %v6239_v50  ;;  %v7742_v37 = vld [vmem:[#allocation5 + $0x31c] sm:$0xf] }
 0x23e   :  { %3325 = vmatpush.bf16.msrb.mxu3 %v6654_v5  ;;  %3351 = vmatpush.bf16.msra.mxu1 %v6658_v6  ;;  %v6338_v5 = vor.u32 %v7677_v62, %v6335_v58  ;;  %v6301_v6 = vld [vmem:[#allocation5 + $0xd0] sm:$0xf]  ;;  %v6495_v19 = vld [vmem:[#allocation5 + $0x270] sm:$0xf0]  ;;  %v6661_v62 = vld [vmem:[#allocation5 + $0x398] sm:$0xf] }
 0x23f   :  { %v2403_v24 = vpop.f32.mrf.mxu3  ;;  %3215 = vmatmul.bf16.vlgmr.msrb.gmra.mxu2 %v8336_v16  ;;  %3241 = vmatmul.bf16.vlgmr.msra.gmra.mxu0 %v8336_v16  ;;  %v6302_v21 = vor.u32 %v7673_v7, %v6301_v6  ;;  %v6498_v29 = vor.u32 %v7717_v15, %v6495_v19  ;;  %v7657_v48 = vld [vmem:[#allocation5 + $0x6c] sm:$0xf0]  ;;  %v7762_v58 = vld [vmem:[#allocation5 + $0x3b4] sm:$0xf0]  ;;  %v6599_v39 = vld [vmem:[#allocation5 + $0x338] sm:$0xf0] }
 0x240   :  { %3311 = vmatpush.bf16.msrb.mxu2 %v6430_v13  ;;  %3337 = vmatpush.bf16.msra.mxu0 %v6434_v14  ;;  %v6493_v13 = vld [vmem:[#allocation5 + $0x250] sm:$0xf]  ;;  %v6437_v6 = vld [vmem:[#allocation5 + $0x1d8] sm:$0xf]  ;;  %v6602_v50 = vor.u32 %v7742_v37, %v6599_v39 }
 0x241   :  { %v7721_v14 = vld [vmem:[#allocation5 + $0x26c] sm:$0xf0]  ;;  %v7706_v7 = vld [vmem:[#allocation5 + $0x1f4] sm:$0xf0] }
 0x242   :  { %3326 = vmatpush.bf16.msrb.mxu3 %v6622_v26  ;;  %3352 = vmatpush.bf16.msra.mxu1 %v6626_v27  ;;  %v7665_v24 = vld [vmem:[#allocation5 + $0xac] sm:$0xf0]  ;;  %v7661_v26 = vld [vmem:[#allocation5 + $0x94] sm:$0xf]  ;;  %v6494_v28 = vor.u32 %v7721_v14, %v6493_v13  ;;  %v6629_v13 = vld [vmem:[#allocation5 + $0x358] sm:$0xf] }
 0x243   :  { %v6271_v27 = vld [vmem:[#allocation5 + $0xb0] sm:$0xf0]  ;;  %v6270_v43 = vor.u32 %v7665_v24, %v6269_v23  ;;  %v6205_v2 = vld [vmem:[#allocation5 + $0x10] sm:$0xf]  ;;  %v7754_v19 = vld [vmem:[#allocation5 + $0x374] sm:$0xf0]  ;;  %v6438_v23 = vor.u32 %v7706_v7, %v6437_v6  ;;  %v6442_v24 = vor.u32 %v7702_v8, %v6439_v9 }
 0x244   :  { %3312 = vmatpush.bf16.msrb.mxu2 %v6398_v34  ;;  %3338 = vmatpush.bf16.msra.mxu0 %v6402_v36  ;;  %v7709_v34 = vld [vmem:[#allocation5 + $0x214] sm:$0xf]  ;;  %v6274_v45 = vor.u32 %v7661_v26, %v6271_v27  ;;  %v7649_v3 = vld [vmem:[#allocation5 + $0x2c] sm:$0xf0]  ;;  %v6405_v26 = vld [vmem:[#allocation5 + $0x198] sm:$0xf] }
 0x245   :  { %v6463_v36 = vld [vmem:[#allocation5 + $0x230] sm:$0xf0]  ;;  %v6206_v14 = vor.u32 %v7649_v3, %v6205_v2  ;;  %v7698_v27 = vld [vmem:[#allocation5 + $0x1b4] sm:$0xf0]  ;;  %v7726_v6 = vld [vmem:[#allocation5 + $0x29c] sm:$0xf] }
 0x246   :  { %3327 = vmatpush.bf16.msrb.mxu3 %v6590_v46  ;;  %3353 = vmatpush.bf16.msra.mxu1 %v6594_v40  ;;  %v7766_v46 = vld [vmem:[#allocation5 + $0x3dc] sm:$0xf]  ;;  %v6469_v37 = vld [vmem:[#allocation5 + $0x218] sm:$0xf] }
 0x247   :  { %v6695_v40 = vld [vmem:[#allocation5 + $0x3f8] sm:$0xf0]  ;;  %v7714_v39 = vld [vmem:[#allocation5 + $0x234] sm:$0xf0] }
 0x248   :  { %3313 = vmatpush.bf16.msrb.mxu2 %v6366_v52  ;;  %3339 = vmatpush.bf16.msra.mxu0 %v6370_v53  ;;  %v6462_v52 = vor.u32 %v7713_v33, %v6461_v30  ;;  %v6466_v53 = vor.u32 %v7709_v34, %v6463_v36  ;;  %v6698_v57 = vor.u32 %v7766_v46, %v6695_v40  ;;  %v6597_v34 = vld [vmem:[#allocation5 + $0x318] sm:$0xf]  ;;  %v6535_v7 = vld [vmem:[#allocation5 + $0x2b8] sm:$0xf0] }
 0x249   :  { %3280 = vmatmul.bf16.vlgmr.msra.gmra.mxu3 %v8332_v44  ;;  %3306 = vmatmul.bf16.vlgmr.msrb.gmra.mxu1 %v8332_v44  ;;  %v6630_v30 = vor.u32 %v7754_v19, %v6629_v13  ;;  %v7746_v36 = vld [vmem:[#allocation5 + $0x334] sm:$0xf0]  ;;  %v7670_v13 = vld [vmem:[#allocation5 + $0xdc] sm:$0xf]  ;;  %v6538_v19 = vor.u32 %v7726_v6, %v6535_v7 }
 0x24a   :  { %3328 = vmatpush.bf16.msrb.mxu3 %v6558_v59  ;;  %3354 = vmatpush.bf16.msra.mxu1 %v6562_v60  ;;  %v7758_v59 = vld [vmem:[#allocation5 + $0x39c] sm:$0xf]  ;;  %v6238_v60 = vor.u32 %v7657_v48, %v6237_v47  ;;  %v6373_v46 = vld [vmem:[#allocation5 + $0x158] sm:$0xf]  ;;  %v6598_v61 = vor.u32 %v7746_v36, %v6597_v34 }
 0x24b   :  { %v7690_v40 = vld [vmem:[#allocation5 + $0x174] sm:$0xf0]  ;;  %v7686_v47 = vld [vmem:[#allocation5 + $0x15c] sm:$0xf] }
 0x24c   :  { %3314 = vmatpush.bf16.msrb.mxu2 %v6334_v4  ;;  %3340 = vmatpush.bf16.msra.mxu0 %v6338_v5  ;;  %v7645_v4 = vld [vmem:[#allocation5 + $0x14] sm:$0xf]  ;;  %v6375_v48 = vld [vmem:[#allocation5 + $0x178] sm:$0xf0] }
 0x24d   :  { %v6207_v5 = vld [vmem:[#allocation5 + $0x30] sm:$0xf0] }
 0x24e   :  { %3329 = vmatpush.bf16.msrb.mxu3 %v6526_v10  ;;  %3355 = vmatpush.bf16.msra.mxu1 %v6530_v11  ;;  %v6662_v10 = vor.u32 %v7762_v58, %v6661_v62  ;;  %v6666_v11 = vor.u32 %v7758_v59, %v6663_v1  ;;  %v6210_v15 = vor.u32 %v7645_v4, %v6207_v5  ;;  %v6341_v59 = vld [vmem:[#allocation5 + $0x118] sm:$0xf]  ;;  %v6343_v1 = vld [vmem:[#allocation5 + $0x138] sm:$0xf0] }
 0x24f   :  { %3267 = vmatmul.bf16.vlgmr.msra.gmra.mxu2 %v8336_v16  ;;  %3293 = vmatmul.bf16.vlgmr.msrb.gmra.mxu0 %v8336_v16  ;;  %v6374_v62 = vor.u32 %v7690_v40, %v6373_v46  ;;  %v6378_v58 = vor.u32 %v7686_v47, %v6375_v48  ;;  %v6533_v4 = vld [vmem:[#allocation5 + $0x298] sm:$0xf] }
 0x250   :  { %3315 = vmatpush.bf16.msrb.mxu2 %v6302_v21  ;;  %3341 = vmatpush.bf16.msra.mxu0 %v6306_v22  ;;  %v7750_v21 = vld [vmem:[#allocation5 + $0x35c] sm:$0xf]  ;;  %v7730_v5 = vld [vmem:[#allocation5 + $0x2b4] sm:$0xf0] }
 0x251   :  { %v6631_v22 = vld [vmem:[#allocation5 + $0x378] sm:$0xf0]  ;;  %v6245_v47 = vld [vmem:[#allocation5 + $0x58] sm:$0xf] }
 0x252   :  { %3330 = vmatpush.bf16.msrb.mxu3 %v6494_v28  ;;  %3356 = vmatpush.bf16.msra.mxu1 %v6498_v29  ;;  %v7694_v28 = vld [vmem:[#allocation5 + $0x19c] sm:$0xf]  ;;  %v6634_v33 = vor.u32 %v7750_v21, %v6631_v22  ;;  %v6501_v21 = vld [vmem:[#allocation5 + $0x258] sm:$0xf] }
 0x253   :  { %v6407_v29 = vld [vmem:[#allocation5 + $0x1b8] sm:$0xf0]  ;;  %v7722_v22 = vld [vmem:[#allocation5 + $0x274] sm:$0xf0] }
 0x254   :  { %3316 = vmatpush.bf16.msrb.mxu2 %v6270_v43  ;;  %3342 = vmatpush.bf16.msra.mxu0 %v6274_v45  ;;  %v6406_v43 = vor.u32 %v7698_v27, %v6405_v26  ;;  %v6410_v45 = vor.u32 %v7694_v28, %v6407_v29  ;;  %v6277_v28 = vld [vmem:[#allocation5 + $0x98] sm:$0xf]  ;;  %v6502_v34 = vor.u32 %v7722_v22, %v6501_v21  ;;  %v7187_v21 = vld [vmem:[#allocation5 + $0xbc0] sm:$0xf] }
 0x255   :  { %v7666_v29 = vld [vmem:[#allocation5 + $0xb4] sm:$0xf0]  ;;  %v7895_v22 = vld [vmem:[#allocation5 + $0xbdc] sm:$0xf0] }
 0x256   :  { %3331 = vmatpush.bf16.msrb.mxu3 %v6462_v52  ;;  %3357 = vmatpush.bf16.msra.mxu1 %v6466_v53  ;;  %v6565_v52 = vld [vmem:[#allocation5 + $0x2d8] sm:$0xf]  ;;  %v6278_v46 = vor.u32 %v7666_v29, %v6277_v28  ;;  %v8354_v29 = vld [vmem:[#allocation8 + $0x3] ss:$8 sm:$0x3] }
 0x257   :  { %v7738_v53 = vld [vmem:[#allocation5 + $0x2f4] sm:$0xf0] }
 0x258   :  { %3317 = vmatpush.bf16.msrb.mxu2 %v6238_v60  ;;  %3343 = vmatpush.bf16.msra.mxu0 %v6242_v63  ;;  %v7682_v60 = vld [vmem:[#allocation5 + $0x134] sm:$0xf0]  ;;  %v7678_v63 = vld [vmem:[#allocation5 + $0x11c] sm:$0xf]  ;;  %v6566_v2 = vor.u32 %v7738_v53, %v6565_v52  ;;  %v6470_v52 = vor.u32 %v7714_v39, %v6469_v37  ;;  %v7157_v37 = vld [vmem:[#allocation5 + $0xba0] sm:$0xf0] }
 0x259   :  { %3332 = vmatmul.bf16.vlgmr.msrb.gmra.mxu3 %v8332_v44  ;;  %3358 = vmatmul.bf16.vlgmr.msra.gmra.mxu1 %v8332_v44  ;;  %v6342_v8 = vor.u32 %v7682_v60, %v6341_v59  ;;  %v6346_v9 = vor.u32 %v7678_v63, %v6343_v1  ;;  %v7658_v48 = vld [vmem:[#allocation5 + $0x74] sm:$0xf0]  ;;  %v7646_v59 = vld [vmem:[#allocation5 + $0x1c] sm:$0xf] }
 0x25a   :  { %3376 = vmatpush.bf16.msra.mxu3 %v6694_v55  ;;  %3402 = vmatpush.bf16.msrb.mxu1 %v6698_v57  ;;  %v7734_v55 = vld [vmem:[#allocation5 + $0x2dc] sm:$0xf] }
 0x25b   :  { %v6567_v57 = vld [vmem:[#allocation5 + $0x2f8] sm:$0xf0] }
 0x25c   :  { %3318 = vmatpush.bf16.msrb.mxu2 %v6206_v14  ;;  %3344 = vmatpush.bf16.msra.mxu0 %v6210_v15  ;;  %v6570_v3 = vor.u32 %v7734_v55, %v6567_v57  ;;  %v6311_v14 = vld [vmem:[#allocation5 + $0xf8] sm:$0xf0]  ;;  %v6534_v15 = vor.u32 %v7730_v5, %v6533_v4  ;;  %v6246_v55 = vor.u32 %v7658_v48, %v6245_v47 }
 0x25d   :  { %v6314_v27 = vor.u32 %v7670_v13, %v6311_v14  ;;  %v6215_v60 = vld [vmem:[#allocation5 + $0x38] sm:$0xf0] }
 0x25e   :  { %3377 = vmatpush.bf16.msra.mxu3 %v6662_v10  ;;  %3403 = vmatpush.bf16.msrb.mxu1 %v6666_v11  ;;  %v6309_v10 = vld [vmem:[#allocation5 + $0xd8] sm:$0xf]  ;;  %v6218_v1 = vor.u32 %v7646_v59, %v6215_v60  ;;  %v3466_v59 = vperm.slane %v8354_v29, 1 }
 0x25f   :  { %3319 = vmatmul.bf16.vlgmr.msrb.gmra.mxu2 %v8336_v16  ;;  %3345 = vmatmul.bf16.vlgmr.msra.gmra.mxu0 %v8336_v16  ;;  %v7674_v11 = vld [vmem:[#allocation5 + $0xf4] sm:$0xf0] }
 0x260   :  { %3363 = vmatpush.bf16.msra.mxu2 %v6438_v23  ;;  %3389 = vmatpush.bf16.msrb.mxu0 %v6442_v24  ;;  %v7718_v23 = vld [vmem:[#allocation5 + $0x25c] sm:$0xf]  ;;  %v6310_v26 = vor.u32 %v7674_v11, %v6309_v10 }
 0x261   :  { %v6503_v24 = vld [vmem:[#allocation5 + $0x278] sm:$0xf0] }
 0x262   :  { %3378 = vmatpush.bf16.msra.mxu3 %v6630_v30  ;;  %3404 = vmatpush.bf16.msrb.mxu1 %v6634_v33  ;;  %v7662_v30 = vld [vmem:[#allocation5 + $0x9c] sm:$0xf]  ;;  %v6506_v36 = vor.u32 %v7718_v23, %v6503_v24  ;;  %v7188_v24 = vor.u32 %v7895_v22, %v7187_v21  ;;  %v3465_v22 = vperm.slane %v8354_v29, 0 }
 0x263   :  { %v6279_v33 = vld [vmem:[#allocation5 + $0xb8] sm:$0xf0] }
 0x264   :  { %3364 = vmatpush.bf16.msra.mxu2 %v6406_v43  ;;  %3390 = vmatpush.bf16.msrb.mxu0 %v6410_v45  ;;  %v7710_v43 = vld [vmem:[#allocation5 + $0x21c] sm:$0xf]  ;;  %v6282_v40 = vor.u32 %v7662_v30, %v6279_v33  ;;  %v7155_v30 = vld [vmem:[#allocation5 + $0xb80] sm:$0xf] }
 0x265   :  { %v6471_v45 = vld [vmem:[#allocation5 + $0x238] sm:$0xf0]  ;;  %v7887_v33 = vld [vmem:[#allocation5 + $0xb9c] sm:$0xf0] }
 0x266   :  { %3379 = vmatpush.bf16.msra.mxu3 %v6598_v61  ;;  %3405 = vmatpush.bf16.msrb.mxu1 %v6602_v50  ;;  %v7654_v61 = vld [vmem:[#allocation5 + $0x5c] sm:$0xf]  ;;  %v6474_v53 = vor.u32 %v7710_v43, %v6471_v45  ;;  %v6931_v45 = vld [vmem:[#allocation5 + $0x9c0] sm:$0xf] }
 0x267   :  { %v6247_v50 = vld [vmem:[#allocation5 + $0x78] sm:$0xf0] }
 0x268   :  { %3365 = vmatpush.bf16.msra.mxu2 %v6374_v62  ;;  %3391 = vmatpush.bf16.msrb.mxu0 %v6378_v58  ;;  %v6250_v57 = vor.u32 %v7654_v61, %v6247_v50  ;;  %v6213_v62 = vld [vmem:[#allocation5 + $0x18] sm:$0xf]  ;;  %v6933_v61 = vld [vmem:[#allocation5 + $0x9e0] sm:$0xf0] }
 0x269   :  { %v7650_v58 = vld [vmem:[#allocation5 + $0x34] sm:$0xf0] }
 0x26a   :  { %3380 = vmatpush.bf16.msra.mxu3 %v6566_v2  ;;  %3406 = vmatpush.bf16.msrb.mxu1 %v6570_v3  ;;  %v6214_v63 = vor.u32 %v7650_v58, %v6213_v62  ;;  %v3416_v3 = vld [vmem:[#allocation8 + $0x2] ss:$8 sm:$0x3] }
 0x26b   :  { %v3419_v7 = vperm.slane %v3416_v3, 1  ;;  %v3418_v14 = vperm.slane %v3416_v3, 0  ;;  %v7879_v62 = vld [vmem:[#allocation5 + $0xb5c] sm:$0xf0] }
 0x26c   :  { %3366 = vmatpush.bf16.msra.mxu2 %v6342_v8  ;;  %3392 = vmatpush.bf16.msrb.mxu0 %v6346_v9  ;;  %v6899_v3 = vld [vmem:[#allocation5 + $0x980] sm:$0xf] }
 0x26e   :  { %3381 = vmatpush.bf16.msra.mxu3 %v6534_v15  ;;  %3407 = vmatpush.bf16.msrb.mxu1 %v6538_v19 }
 0x270   :  { %3367 = vmatpush.bf16.msra.mxu2 %v6310_v26  ;;  %3393 = vmatpush.bf16.msrb.mxu0 %v6314_v27  ;;  %v7189_v26 = vld [vmem:[#allocation5 + $0xbe0] sm:$0xf0] }
 0x272   :  { %3382 = vmatpush.bf16.msra.mxu3 %v6502_v34  ;;  %3408 = vmatpush.bf16.msrb.mxu1 %v6506_v36  ;;  %v7156_v36 = vor.u32 %v7887_v33, %v7155_v30  ;;  %v7815_v30 = vld [vmem:[#allocation5 + $0x95c] sm:$0xf0] }
 0x274   :  { %3368 = vmatpush.bf16.msra.mxu2 %v6278_v46  ;;  %3394 = vmatpush.bf16.msrb.mxu0 %v6282_v40  ;;  %v7831_v46 = vld [vmem:[#allocation5 + $0x9dc] sm:$0xf0]  ;;  %v7827_v40 = vld [vmem:[#allocation5 + $0x9c4] sm:$0xf] }
 0x275   :  { %v6932_v48 = vor.u32 %v7831_v46, %v6931_v45  ;;  %v7059_v45 = vld [vmem:[#allocation5 + $0xac0] sm:$0xf] }
 0x276   :  { %3383 = vmatpush.bf16.msra.mxu3 %v6470_v52  ;;  %3409 = vmatpush.bf16.msrb.mxu1 %v6474_v53  ;;  %v7863_v46 = vld [vmem:[#allocation5 + $0xadc] sm:$0xf0] }
 0x278   :  { %3369 = vmatpush.bf16.msra.mxu2 %v6246_v55  ;;  %3395 = vmatpush.bf16.msrb.mxu0 %v6250_v57  ;;  %v6936_v55 = vor.u32 %v7827_v40, %v6933_v61  ;;  %v7123_v57 = vld [vmem:[#allocation5 + $0xb40] sm:$0xf] }
 0x279   :  { %3384 = vmatmul.bf16.vlgmr.msra.gmra.mxu3 %v8332_v44  ;;  %3410 = vmatmul.bf16.vlgmr.msrb.gmra.mxu1 %v8332_v44  ;;  %v7124_v60 = vor.u32 %v7879_v62, %v7123_v57  ;;  %v7061_v57 = vld [vmem:[#allocation5 + $0xae0] sm:$0xf0] }
 0x27a   :  { %4360 = vmatpush.bf16.msrb.mxu3 %v7188_v24  ;;  %v7093_v24 = vld [vmem:[#allocation5 + $0xb20] sm:$0xf0] }
 0x27c   :  { %3370 = vmatpush.bf16.msra.mxu2 %v6214_v63  ;;  %3396 = vmatpush.bf16.msrb.mxu0 %v6218_v1  ;;  %v7875_v63 = vld [vmem:[#allocation5 + $0xb44] sm:$0xf] }
 0x27d   :  { %v7125_v1 = vld [vmem:[#allocation5 + $0xb60] sm:$0xf0] }
 0x27e   :  { %4361 = vmatpush.bf16.msrb.mxu3 %v7156_v36 }
 0x27f   :  { %3371 = vmatmul.bf16.vlgmr.msra.gmra.mxu2 %v8336_v16  ;;  %3397 = vmatmul.bf16.vlgmr.msrb.gmra.mxu0 %v8336_v16  ;;  %v7891_v16 = vld [vmem:[#allocation5 + $0xbc4] sm:$0xf] }
 0x280   :  { %4347 = vmatpush.bf16.msrb.mxu2 %v6932_v48  ;;  %4373 = vmatpush.bf16.msra.mxu0 %v6936_v55  ;;  %v7859_v55 = vld [vmem:[#allocation5 + $0xac4] sm:$0xf] }
 0x282   :  { %4362 = vmatpush.bf16.msrb.mxu3 %v7124_v60  ;;  %v7064_v60 = vor.u32 %v7859_v55, %v7061_v57  ;;  %v6997_v57 = vld [vmem:[#allocation5 + $0xa60] sm:$0xf0] }
 0x2b6   :  { %v3255_v2 = vpop.f32.mrf.mxu1 }
 0x2bc   :  { %v3229_v4 = vpop.f32.mrf.mxu3  ;;  %v3242_v5 = vpop.f32.mrf.mxu0 }
 0x2bd   :  { %v3243_v6 = vadd.f32 %v3242_v5, %v8299_v41  ;;  %v7192_v41 = vor.u32 %v7891_v16, %v7189_v26  ;;  %v8361_v5 = vld [vmem:[#allocation8 + $0x4] ss:$8 sm:$0x3] }
 0x2be   :  { %v3257_v8 = vpop.f32.mrf.mxu1  ;;  %v8366_v16 = vld [vmem:[#allocation10 + $0x4] sm:$0x3]  ;;  %v3513_v29 = vperm.slane %v8361_v5, 1  ;;  %v3512_v36 = vperm.slane %v8361_v5, 0 }
 0x2bf   :  { %v3256_v9 = vadd.f32 %v3255_v2, %v3243_v6  ;;  %4386 = vmatpush.bf16.msra.mxu1 %v7192_v41  ;;  %v7128_v6 = vor.u32 %v7875_v63, %v7125_v1  ;;  %v7819_v8 = vld [vmem:[#allocation5 + $0x984] sm:$0xf]  ;;  %v6835_v63 = vld [vmem:[#allocation5 + $0x900] sm:$0xf]  ;;  %v126_v55 = vperm.slane %v8366_v16, 0 }
 0x2c1   :  { %v3423_v10 = vadd.f32 %v3419_v7, %v3256_v9  ;;  %v7823_v7 = vld [vmem:[#allocation5 + $0x99c] sm:$0xf0] }
 0x2c2   :  { %v3216_v11 = vpop.f32.mrf.mxu2  ;;  %v6900_v9 = vor.u32 %v7823_v7, %v6899_v3  ;;  %v6837_v3 = vld [vmem:[#allocation5 + $0x920] sm:$0xf0] }
 0x2c3   :  { %v6700_v13 = vmul.f32 -1.442695, %v3423_v10  ;;  %v3217_v44 = vadd.f32 %v3216_v11, %v8279_v31  ;;  %v7883_v31 = vld [vmem:[#allocation5 + $0xb84] sm:$0xf]  ;;  %v7091_v10 = vld [vmem:[#allocation5 + $0xb00] sm:$0xf] }
 0x2c4   :  { %v3231_v15 = vpop.f32.mrf.mxu3  ;;  %v3244_v19 = vpop.f32.mrf.mxu0  ;;  %v7160_v43 = vor.u32 %v7883_v31, %v7157_v37  ;;  %4348 = vmatpush.bf16.msrb.mxu2 %v6900_v9  ;;  %v7811_v37 = vld [vmem:[#allocation5 + $0x944] sm:$0xf] }
 0x2c5   :  { %7945 = vpow2.f32 %v6700_v13  ;;  %v3230_v23 = vadd.f32 %v3229_v4, %v3217_v44  ;;  %v7867_v15 = vld [vmem:[#allocation5 + $0xb04] sm:$0xf] }
 0x2c6   :  { %v3307_v27 = vpop.f32.mrf.mxu1  ;;  %4387 = vmatpush.bf16.msra.mxu1 %v7160_v43  ;;  %v7096_v41 = vor.u32 %v7867_v15, %v7093_v24  ;;  %v6869_v43 = vld [vmem:[#allocation5 + $0x960] sm:$0xf0] }
 0x2c7   :  { %v3422_v28 = vadd.f32 %v3418_v14, %v3230_v23  ;;  %v7871_v14 = vld [vmem:[#allocation5 + $0xb1c] sm:$0xf0]  ;;  %v7851_v9 = vld [vmem:[#allocation5 + $0xa84] sm:$0xf] }
 0x2c8   :  { %v7092_v23 = vor.u32 %v7871_v14, %v7091_v10  ;;  %v7799_v14 = vld [vmem:[#allocation5 + $0x8dc] sm:$0xf0]  ;;  %v6805_v24 = vld [vmem:[#allocation5 + $0x8e0] sm:$0xf0] }
 0x2c9   :  { %v6699_v34 = vmul.f32 -1.442695, %v3422_v28  ;;  %v6867_v28 = vld [vmem:[#allocation5 + $0x940] sm:$0xf] }
 0x2ca   :  { %v3218_v39 = vpop.f32.mrf.mxu2  ;;  %4388 = vmatpush.bf16.msra.mxu1 %v7128_v6  ;;  %4363 = vmatpush.bf16.msrb.mxu3 %v7092_v23  ;;  %v6868_v61 = vor.u32 %v7815_v30, %v6867_v28  ;;  %v7795_v23 = vld [vmem:[#allocation5 + $0x8c4] sm:$0xf] }
 0x2cb   :  { %v7946_v47 = vpop.eup %7945  ;;  %7947 = vpow2.f32 %v6699_v34  ;;  %v6808_v30 = vor.u32 %v7795_v23, %v6805_v24 }
 0x2cc   :  { %v8356_v50 = vadd.f32 1.0, %v7946_v47  ;;  %v3281_v52 = vpop.f32.mrf.mxu3  ;;  %v3294_v53 = vpop.f32.mrf.mxu0  ;;  %v127_v47 = vperm.slane %v8366_v16, 1  ;;  %4349 = vmatpush.bf16.msrb.mxu2 %v6868_v61  ;;  %v7796_v16 = vld [vmem:[#allocation5 + $0x8cc] sm:$0xf] }
 0x2cd   :  { %v3295_v58 = vadd.f32 %v3294_v53, %v8305_v42  ;;  %v6901_v42 = vld [vmem:[#allocation5 + $0x9a0] sm:$0xf0]  ;;  %v6872_v53 = vor.u32 %v7811_v37, %v6869_v43  ;;  %v7847_v43 = vld [vmem:[#allocation5 + $0xa5c] sm:$0xf0] }
 0x2ce   :  { %7949 = vrcp.f32 %v8356_v50  ;;  %v3309_v2 = vpop.f32.mrf.mxu1  ;;  %v6904_v44 = vor.u32 %v7819_v8, %v6901_v42  ;;  %4389 = vmatpush.bf16.msra.mxu1 %v7096_v41  ;;  %v3458_v48 = vand.u32 2147483648, %v8356_v50  ;;  %v7855_v8 = vld [vmem:[#allocation5 + $0xa9c] sm:$0xf0]  ;;  %vm3452_vm5 = vweird.f32 %v8356_v50 }
 0x2cf   :  { %v3308_v4 = vadd.f32 %v3307_v27, %v3295_v58  ;;  %v7803_v2 = vld [vmem:[#allocation5 + $0x904] sm:$0xf] }
 0x2d0   :  { %4374 = vmatpush.bf16.msra.mxu0 %v6904_v44  ;;  %v6840_v7 = vor.u32 %v7803_v2, %v6837_v3  ;;  %v6803_v44 = vld [vmem:[#allocation5 + $0x8c0] sm:$0xf] }
 0x2d1   :  { %v7948_v11 = vpop.eup %7947  ;;  %v3470_v13 = vadd.f32 %v3466_v59, %v3308_v4  ;;  %v7060_v59 = vor.u32 %v7863_v46, %v7059_v45  ;;  %v7027_v4 = vld [vmem:[#allocation5 + $0xa80] sm:$0xf]  ;;  %v6804_v28 = vor.u32 %v7799_v14, %v6803_v44  ;;  %v7843_v45 = vld [vmem:[#allocation5 + $0xa44] sm:$0xf] }
 0x2d2   :  { %v8363_v19 = vadd.f32 1.0, %v7948_v11  ;;  %v3268_v21 = vpop.f32.mrf.mxu2  ;;  %4390 = vmatpush.bf16.msra.mxu1 %v7064_v60  ;;  %v7028_v11 = vor.u32 %v7855_v8, %v7027_v4  ;;  %v7787_v60 = vld [vmem:[#allocation5 + $0x884] sm:$0xf]  ;;  %v6963_v2 = vld [vmem:[#allocation5 + $0xa00] sm:$0xf] }
 0x2d3   :  { %v6702_v26 = vmul.f32 -1.442695, %v3470_v13  ;;  %v3269_v27 = vadd.f32 %v3268_v21, %v8285_v12  ;;  %4364 = vmatpush.bf16.msrb.mxu3 %v7060_v59  ;;  %v7029_v13 = vld [vmem:[#allocation5 + $0xaa0] sm:$0xf0]  ;;  %v7791_v59 = vld [vmem:[#allocation5 + $0x89c] sm:$0xf0] }
 0x2d4   :  { %v8369_v33 = vpop.eup %7949  ;;  %7951 = vrcp.f32 %v8363_v19  ;;  %v3283_v31 = vpop.f32.mrf.mxu3  ;;  %4375 = vmatpush.bf16.msra.mxu0 %v6872_v53  ;;  %v7032_v41 = vor.u32 %v7851_v9, %v7029_v13  ;;  %v7839_v9 = vld [vmem:[#allocation5 + $0xa1c] sm:$0xf0]  ;;  %vm3437_vm9 = vweird.f32 %v8363_v19 }
 0x2d5   :  { %v3296_v34 = vpop.f32.mrf.mxu0  ;;  %v3448_v39 = vmul.f32 %v8369_v33, %v8356_v50  ;;  %7953 = vpow2.f32 %v6702_v26  ;;  %v3282_v12 = vadd.f32 %v3281_v52, %v3269_v27  ;;  %v7807_v52 = vld [vmem:[#allocation5 + $0x91c] sm:$0xf0]  ;;  %vm3453_vm6 = vweird.f32 %v8369_v33 }
 0x2d6   :  { %v8376_v40 = vpop.f32.mrf.mxu1  ;;  %v6836_v1 = vor.u32 %v7807_v52, %v6835_v63  ;;  %v6995_v31 = vld [vmem:[#allocation5 + $0xa40] sm:$0xf]  ;;  %4391 = vmatpush.bf16.msra.mxu1 %v7032_v41  ;;  %v6964_v14 = vor.u32 %v7839_v9, %v6963_v2  ;;  %vm8419_vm8 = vmor %vm3452_vm5, %vm3453_vm6  ;;  %v7195_v41 = vld [vmem:[#allocation5 + $0xbc8] sm:$0xf] }
 0x2d7   :  { %v3449_v62 = vsub.f32 1.0, %v3448_v39  ;;  %v3469_v58 = vadd.f32 %v3465_v22, %v3282_v12  ;;  %v3456_v22 = vand.u32 2147483647, %v8356_v50  ;;  %v8390_v39 = vor.u32 1.1754944e-38, %v3458_v48  ;;  %4365 = vmatpush.bf16.msrb.mxu3 %v7028_v11  ;;  %v7892_v50 = vld [vmem:[#allocation5 + $0xbcc] sm:$0xf] }
 0x2d8   :  { %4350 = vmatpush.bf16.msrb.mxu2 %v6836_v1  ;;  %4376 = vmatpush.bf16.msra.mxu0 %v6840_v7  ;;  %v3443_v12 = vand.u32 2147483648, %v8363_v19  ;;  %v3441_v48 = vand.u32 2147483647, %v8363_v19  ;;  %v6773_v1 = vld [vmem:[#allocation5 + $0x8a0] sm:$0xf0] }
 0x2d9   :  { %v6701_v6 = vmul.f32 -1.442695, %v3469_v58  ;;  %v3450_v37 = vmul.f32 %v8369_v33, %v3449_v62  ;;  %v6771_v58 = vld [vmem:[#allocation5 + $0x880] sm:$0xf]  ;;  %v6996_v62 = vor.u32 %v7847_v43, %v6995_v31  ;;  %vm8404_vm7 = vcmp.eq.f32.partialorder %v3456_v22, 8.507059e+37 }
 0x2da   :  { %v8380_v42 = vpop.eup %7951  ;;  %v3270_v10 = vpop.f32.mrf.mxu2  ;;  %v6772_v52 = vor.u32 %v7791_v59, %v6771_v58  ;;  %v8408_v8 = vor.u32 1.1754944e-38, %v3443_v12  ;;  %vm8440_vm11 = vcmp.eq.f32.partialorder %v3441_v48, 8.507059e+37  ;;  %v7884_v2 = vld [vmem:[#allocation5 + $0xb8c] sm:$0xf]  ;;  %v6707_v9 = vld [vmem:[#allocation5 + $0x800] sm:$0xf] }
 0x2db   :  { %v7954_v15 = vpop.eup %7953  ;;  %v3433_v21 = vmul.f32 %v8380_v42, %v8363_v19  ;;  %7955 = vpow2.f32 %v6701_v6  ;;  %v8402_v6 = vadd.f32 %v8369_v33, %v3450_v37  ;;  %4366 = vmatpush.bf16.msrb.mxu3 %v6996_v62  ;;  %v7835_v10 = vld [vmem:[#allocation5 + $0xa04] sm:$0xf]  ;;  %v6739_v37 = vld [vmem:[#allocation5 + $0x840] sm:$0xf]  ;;  %vm3438_vm10 = vweird.f32 %v8380_v42  ;;  %v7163_v62 = vld [vmem:[#allocation5 + $0xb88] sm:$0xf] }
 0x2dc   :  { %v8385_v26 = vadd.f32 1.0, %v7954_v15  ;;  %v8387_v27 = vpop.f32.mrf.mxu3  ;;  %4351 = vmatpush.bf16.msrb.mxu2 %v6804_v28  ;;  %4377 = vmatpush.bf16.msra.mxu0 %v6808_v30  ;;  %v6965_v15 = vld [vmem:[#allocation5 + $0xa20] sm:$0xf0]  ;;  %v7896_v28 = vld [vmem:[#allocation5 + $0xbe4] sm:$0xf0]  ;;  %vm8452_vm13 = vmor %vm3437_vm9, %vm3438_vm10 }
 0x2dd   :  { %v3346_v34 = vpop.f32.mrf.mxu0  ;;  %v3434_v46 = vsub.f32 1.0, %v3433_v21  ;;  %v6968_v24 = vor.u32 %v7835_v10, %v6965_v15  ;;  %v7196_v58 = vor.u32 %v7896_v28, %v7195_v41  ;;  %v7775_v10 = vld [vmem:[#allocation5 + $0x81c] sm:$0xf0]  ;;  %v6939_v21 = vld [vmem:[#allocation5 + $0x9c8] sm:$0xf] }
 0x2de   :  { %7957 = vrcp.f32 %v8385_v26  ;;  %v3347_v61 = vadd.f32 %v3346_v34, %v8316_v38  ;;  %v3361_v53 = vpop.f32.mrf.mxu1  ;;  %v7000_v38 = vor.u32 %v7843_v45, %v6997_v57  ;;  %v3505_v4 = vand.u32 2147483648, %v8385_v26  ;;  %v7197_v34 = vld [vmem:[#allocation5 + $0xbe8] sm:$0xf0]  ;;  %v7783_v45 = vld [vmem:[#allocation5 + $0x85c] sm:$0xf0] }
 0x2df   :  { %v3435_v44 = vmul.f32 %v8380_v42, %v3434_v46  ;;  %v3503_v22 = vand.u32 2147483647, %v8385_v26  ;;  %4367 = vmatpush.bf16.msrb.mxu3 %v6964_v14  ;;  %v7779_v46 = vld [vmem:[#allocation5 + $0x844] sm:$0xf]  ;;  %vm3499_vm14 = vweird.f32 %v8385_v26 }
 0x2e0   :  { %v3360_v63 = vadd.f32 %v8376_v40, %v3347_v61  ;;  %v6776_v40 = vor.u32 %v7787_v60, %v6773_v1  ;;  %4392 = vmatpush.bf16.msra.mxu1 %v7000_v38  ;;  %4352 = vmatpush.bf16.msrb.mxu2 %v6772_v52  ;;  %v6741_v61 = vld [vmem:[#allocation5 + $0x860] sm:$0xf0]  ;;  %v6740_v38 = vor.u32 %v7783_v45, %v6739_v37  ;;  %v7888_v1 = vld [vmem:[#allocation5 + $0xba4] sm:$0xf0] }
 0x2e1   :  { %v7956_v3 = vpop.eup %7955  ;;  %v8438_v57 = vadd.f32 %v8380_v42, %v3435_v44  ;;  %v6744_v52 = vor.u32 %v7779_v46, %v6741_v61  ;;  %vm8444_vm12 = vcmp.eq.f32.partialorder %v3503_v22, 8.507059e+37  ;;  %v6709_v44 = vld [vmem:[#allocation5 + $0x820] sm:$0xf0]  ;;  %v7832_v22 = vld [vmem:[#allocation5 + $0x9e4] sm:$0xf0] }
 0x2e2   :  { %v8410_v11 = vadd.f32 1.0, %v7956_v3  ;;  %v3517_v13 = vadd.f32 %v3513_v29, %v3360_v63  ;;  %v3320_v23 = vpop.f32.mrf.mxu2  ;;  %4378 = vmatpush.bf16.msra.mxu0 %v6776_v40  ;;  %v7200_v63 = vor.u32 %v7892_v50, %v7197_v34  ;;  %v3506_v3 = vor.u32 1.1754944e-38, %v3505_v4  ;;  %v7165_v40 = vld [vmem:[#allocation5 + $0xba8] sm:$0xf0]  ;;  %v7131_v50 = vld [vmem:[#allocation5 + $0xb48] sm:$0xf] }
 0x2e3   :  { %v3321_v30 = vadd.f32 %v3320_v23, %v8291_v56  ;;  %v3455_v56 = vsel %vm8419_vm8, %v8369_v33, %v8402_v6  ;;  %4412 = vmatpush.bf16.msra.mxu3 %v7196_v58  ;;  %v7164_v6 = vor.u32 %v7888_v1, %v7163_v62  ;;  %v7168_v19 = vor.u32 %v7884_v2, %v7165_v40  ;;  %v7828_v23 = vld [vmem:[#allocation5 + $0x9cc] sm:$0xf]  ;;  %v7880_v34 = vld [vmem:[#allocation5 + $0xb64] sm:$0xf0] }
 0x2e4   :  { %v8424_v29 = vpop.eup %7957  ;;  %7959 = vrcp.f32 %v8410_v11  ;;  %v3335_v31 = vpop.f32.mrf.mxu3  ;;  %4393 = vmatpush.bf16.msra.mxu1 %v6968_v24  ;;  %4353 = vmatpush.bf16.msrb.mxu2 %v6740_v38  ;;  %v3460_v5 = vsel %vm8404_vm7, %v8390_v39, %v3455_v56  ;;  %v6940_v39 = vor.u32 %v7832_v22, %v6939_v21  ;;  %v7132_v46 = vor.u32 %v7880_v34, %v7131_v50  ;;  %v7133_v61 = vld [vmem:[#allocation5 + $0xb68] sm:$0xf0]  ;;  %v6907_v58 = vld [vmem:[#allocation5 + $0x988] sm:$0xf] }
 0x2e5   :  { %v3495_v12 = vmul.f32 %v8424_v29, %v8385_v26  ;;  %7961 = vtanh.f32 %v3517_v13  ;;  %v3348_v43 = vpop.f32.mrf.mxu0  ;;  %v3334_v53 = vadd.f32 %v8387_v27, %v3321_v30  ;;  %vm3500_vm15 = vweird.f32 %v8424_v29  ;;  %v7771_v13 = vld [vmem:[#allocation5 + $0x804] sm:$0xf]  ;;  %v6941_v31 = vld [vmem:[#allocation5 + $0x9e8] sm:$0xf0]  ;;  %v7824_v62 = vld [vmem:[#allocation5 + $0x9a4] sm:$0xf0] }
 0x2e6   :  { %4379 = vmatpush.bf16.msra.mxu0 %v6744_v52  ;;  %v6712_v15 = vor.u32 %v7771_v13, %v6709_v44  ;;  %v3440_v30 = vsel %vm8452_vm13, %v8380_v42, %v8438_v57  ;;  %vm8477_vm0 = vmor %vm3499_vm14, %vm3500_vm15  ;;  %v3488_v43 = vand.u32 2147483647, %v8410_v11  ;;  %v6944_v45 = vor.u32 %v7828_v23, %v6941_v31  ;;  %v7876_v42 = vld [vmem:[#allocation5 + $0xb4c] sm:$0xf]  ;;  %v7099_v1 = vld [vmem:[#allocation5 + $0xb08] sm:$0xf] }
 0x2e7   :  { %v3496_v59 = vsub.f32 1.0, %v3495_v12  ;;  %v3516_v48 = vadd.f32 %v3512_v36, %v3334_v53  ;;  %v6708_v36 = vor.u32 %v7775_v10, %v6707_v9  ;;  %4413 = vmatpush.bf16.msra.mxu3 %v7164_v6  ;;  %v3490_v53 = vand.u32 2147483648, %v8410_v11  ;;  %v7820_v38 = vld [vmem:[#allocation5 + $0x98c] sm:$0xf]  ;;  %v7864_v21 = vld [vmem:[#allocation5 + $0xae4] sm:$0xf0] }
 0x2e8   :  { %4438 = vmatpush.bf16.msrb.mxu1 %v7200_v63  ;;  %v7136_v26 = vor.u32 %v7876_v42, %v7133_v61  ;;  %v6908_v63 = vor.u32 %v7824_v62, %v6907_v58  ;;  %v6909_v52 = vld [vmem:[#allocation5 + $0x9a8] sm:$0xf0]  ;;  %vm3484_vm2 = vweird.f32 %v8410_v11  ;;  %vm3489_vm4 = vcmp.eq.f32.partialorder %v3488_v43, 8.507059e+37 }
 0x2e9   :  { %v3497_v4 = vmul.f32 %v8424_v29, %v3496_v59  ;;  %7963 = vtanh.f32 %v3516_v48  ;;  %4354 = vmatpush.bf16.msrb.mxu2 %v6708_v36  ;;  %v6912_v27 = vor.u32 %v7820_v38, %v6909_v52  ;;  %v7872_v48 = vld [vmem:[#allocation5 + $0xb24] sm:$0xf0]  ;;  %v7868_v6 = vld [vmem:[#allocation5 + $0xb0c] sm:$0xf] }
 0x2ea   :  { %v8461_v14 = vpop.eup %7959  ;;  %v3322_v7 = vpop.f32.mrf.mxu2  ;;  %4380 = vmatpush.bf16.msra.mxu0 %v6712_v15  ;;  %v7101_v40 = vld [vmem:[#allocation5 + $0xb28] sm:$0xf0]  ;;  %v7100_v9 = vor.u32 %v7872_v48, %v7099_v1  ;;  %v7067_v15 = vld [vmem:[#allocation5 + $0xac8] sm:$0xf] }
 0x2eb   :  { %v7962_v24 = vpop.eup %7961  ;;  %v3480_v41 = vmul.f32 %v8461_v14, %v8410_v11  ;;  %v3498_v28 = vadd.f32 %v8424_v29, %v3497_v4  ;;  %vm3485_vm1 = vweird.f32 %v8461_v14  ;;  %4414 = vmatpush.bf16.msra.mxu3 %v7132_v46  ;;  %v6875_v4 = vld [vmem:[#allocation5 + $0x948] sm:$0xf]  ;;  %v7812_v10 = vld [vmem:[#allocation5 + $0x94c] sm:$0xf]  ;;  %v7068_v31 = vor.u32 %v7864_v21, %v7067_v15 }
 0x2ec   :  { %v3570_v12 = vmul.f32 %v7962_v24, %v3460_v5  ;;  %4439 = vmatpush.bf16.msrb.mxu1 %v7168_v19  ;;  %v7816_v19 = vld [vmem:[#allocation5 + $0x964] sm:$0xf0]  ;;  %v7104_v5 = vor.u32 %v7868_v6, %v7101_v40  ;;  %v6877_v36 = vld [vmem:[#allocation5 + $0x968] sm:$0xf0]  ;;  %vm3486_vm3 = vmor %vm3484_vm2, %vm3485_vm1 }
 0x2ed   :  { %v3481_v56 = vsub.f32 1.0, %v3480_v41  ;;  %v3502_v57 = vsel %vm8477_vm0, %v8424_v29, %v3498_v28  ;;  %4399 = vmatpush.bf16.msra.mxu2 %v6940_v39  ;;  %v6876_v60 = vor.u32 %v7816_v19, %v6875_v4  ;;  %v7860_v22 = vld [vmem:[#allocation5 + $0xacc] sm:$0xf]  ;;  %v6880_v28 = vor.u32 %v7812_v10, %v6877_v36  ;;  %v7808_v7 = vld [vmem:[#allocation5 + $0x924] sm:$0xf0] }
 0x2ee   :  { %v3507_v59 = vsel %vm8444_vm12, %v3506_v3, %v3502_v57  ;;  %4425 = vmatpush.bf16.msrb.mxu0 %v6944_v45  ;;  %v3445_v3 = vsel %vm8440_vm11, %v8408_v8, %v3440_v30  ;;  %v3491_v8 = vor.u32 1.1754944e-38, %v3490_v53  ;;  %v7069_v23 = vld [vmem:[#allocation5 + $0xae8] sm:$0xf0]  ;;  %v6843_v30 = vld [vmem:[#allocation5 + $0x908] sm:$0xf] }
 0x2ef   :  { %v3482_v2 = vmul.f32 %v8461_v14, %v3481_v56  ;;  %v3568_v29 = vmul.f32 %v3507_v59, %v127_v47  ;;  %v7964_v33 = vpop.eup %7963  ;;  %4415 = vmatpush.bf16.msra.mxu3 %v7100_v9  ;;  %v7804_v11 = vld [vmem:[#allocation5 + $0x90c] sm:$0xf]  ;;  %v7035_v45 = vld [vmem:[#allocation5 + $0xa88] sm:$0xf]  ;;  %v6844_v43 = vor.u32 %v7808_v7, %v6843_v30 }
 0x2f0   :  { %v3569_v44 = vmul.f32 %v7964_v33, %v3445_v3  ;;  %4440 = vmatpush.bf16.msrb.mxu1 %v7136_v26  ;;  %v6845_v50 = vld [vmem:[#allocation5 + $0x928] sm:$0xf0]  ;;  %v6811_v53 = vld [vmem:[#allocation5 + $0x8c8] sm:$0xf] }
 0x2f1   :  { %v8496_v13 = vadd.f32 %v3570_v12, %v3568_v29  ;;  %v3483_v47 = vadd.f32 %v8461_v14, %v3482_v2  ;;  %4400 = vmatpush.bf16.msra.mxu2 %v6908_v63  ;;  %v8507_v37 = vld [vmem:[#allocation8 + $0x5] ss:$8 sm:$0x3]  ;;  %v7072_v12 = vor.u32 %v7860_v22, %v7069_v23  ;;  %v6848_v56 = vor.u32 %v7804_v11, %v6845_v50  ;;  %v7800_v57 = vld [vmem:[#allocation5 + $0x8e4] sm:$0xf0] }
 0x2f2   :  { %4426 = vmatpush.bf16.msrb.mxu0 %v6912_v27  ;;  %v7852_v46 = vld [vmem:[#allocation5 + $0xa8c] sm:$0xf]  ;;  %v7003_v63 = vld [vmem:[#allocation5 + $0xa48] sm:$0xf]  ;;  %v3524_v1 = vperm.slane %v8507_v37, 1  ;;  %v6812_v2 = vor.u32 %v7800_v57, %v6811_v53 }
 0x2f3   :  { %4977 = vst [vmem:[#allocation12 + $0x28] sm:$0xff] %v8496_v13  ;;  %v3487_v24 = vsel %vm3486_vm3, %v8461_v14, %v3483_v47  ;;  %v7856_v14 = vld [vmem:[#allocation5 + $0xaa4] sm:$0xf0]  ;;  %v7037_v42 = vld [vmem:[#allocation5 + $0xaa8] sm:$0xf0]  ;;  %4416 = vmatpush.bf16.msra.mxu3 %v7068_v31 }
 0x2f4   :  { %v3492_v39 = vsel %vm3489_vm4, %v3491_v8, %v3487_v24  ;;  %4441 = vmatpush.bf16.msrb.mxu1 %v7104_v5  ;;  %v7036_v26 = vor.u32 %v7856_v14, %v7035_v45  ;;  %v7040_v59 = vor.u32 %v7852_v46, %v7037_v42  ;;  %v7848_v38 = vld [vmem:[#allocation5 + $0xa64] sm:$0xf0]  ;;  %v7844_v29 = vld [vmem:[#allocation5 + $0xa4c] sm:$0xf]  ;;  %v3523_v8 = vperm.slane %v8507_v37, 0 }
 0x2f5   :  { %v3567_v34 = vmul.f32 %v3492_v39, %v126_v55  ;;  %4401 = vmatpush.bf16.msra.mxu2 %v6876_v60  ;;  %v6813_v55 = vld [vmem:[#allocation5 + $0x8e8] sm:$0xf0]  ;;  %v6779_v40 = vld [vmem:[#allocation5 + $0x888] sm:$0xf]  ;;  %v7004_v9 = vor.u32 %v7848_v38, %v7003_v63 }
 0x2f6   :  { %v3411_v41 = vpop.f32.mrf.mxu1  ;;  %4427 = vmatpush.bf16.msrb.mxu0 %v6880_v28  ;;  %v7005_v27 = vld [vmem:[#allocation5 + $0xa68] sm:$0xf0]  ;;  %v6816_v6 = vor.u32 %v7796_v16, %v6813_v55  ;;  %v7792_v33 = vld [vmem:[#allocation5 + $0x8a4] sm:$0xf0] }
 0x2f7   :  { %v8509_v61 = vadd.f32 %v3569_v44, %v3567_v34  ;;  %4417 = vmatpush.bf16.msra.mxu3 %v7036_v26  ;;  %v7788_v4 = vld [vmem:[#allocation5 + $0x88c] sm:$0xf]  ;;  %v7008_v10 = vor.u32 %v7844_v29, %v7005_v27  ;;  %v6971_v47 = vld [vmem:[#allocation5 + $0xa08] sm:$0xf]  ;;  %v6780_v5 = vor.u32 %v7792_v33, %v6779_v40 }
 0x2f8   :  { %4442 = vmatpush.bf16.msrb.mxu1 %v7072_v12  ;;  %v6781_v19 = vld [vmem:[#allocation5 + $0x8a8] sm:$0xf0]  ;;  %v6747_v22 = vld [vmem:[#allocation5 + $0x848] sm:$0xf] }
 0x2f9   :  { %4976 = vst [vmem:[#allocation12 + $0x20] sm:$0xff] %v8509_v61  ;;  %4402 = vmatpush.bf16.msra.mxu2 %v6844_v43  ;;  %v7836_v36 = vld [vmem:[#allocation5 + $0xa0c] sm:$0xf]  ;;  %v6784_v60 = vor.u32 %v7788_v4, %v6781_v19  ;;  %v7784_v28 = vld [vmem:[#allocation5 + $0x864] sm:$0xf0] }
 0x2fa   :  { %4428 = vmatpush.bf16.msrb.mxu0 %v6848_v56  ;;  %v6973_v15 = vld [vmem:[#allocation5 + $0xa28] sm:$0xf0]  ;;  %v6748_v34 = vor.u32 %v7784_v28, %v6747_v22  ;;  %v6715_v12 = vld [vmem:[#allocation5 + $0x808] sm:$0xf]  ;;  %v7173_v22 = vld [vmem:[#allocation5 + $0xbb0] sm:$0xf0] }
 0x2fb   :  { %4418 = vmatpush.bf16.msra.mxu3 %v7004_v9  ;;  %v7780_v30 = vld [vmem:[#allocation5 + $0x84c] sm:$0xf]  ;;  %v6976_v31 = vor.u32 %v7836_v36, %v6973_v15  ;;  %v7776_v45 = vld [vmem:[#allocation5 + $0x824] sm:$0xf0]  ;;  %v7205_v9 = vld [vmem:[#allocation5 + $0xbf0] sm:$0xf0] }
 0x2fc   :  { %v3385_v58 = vpop.f32.mrf.mxu3  ;;  %v3398_v62 = vpop.f32.mrf.mxu0  ;;  %4443 = vmatpush.bf16.msrb.mxu1 %v7040_v59  ;;  %v6749_v11 = vld [vmem:[#allocation5 + $0x868] sm:$0xf0]  ;;  %v6716_v42 = vor.u32 %v7776_v45, %v6715_v12  ;;  %v7171_v36 = vld [vmem:[#allocation5 + $0xb90] sm:$0xf]  ;;  %v7829_v28 = vld [vmem:[#allocation5 + $0x9d4] sm:$0xf] }
 0x2fd   :  { %v3399_v52 = vadd.f32 %v3398_v62, %v8320_v51  ;;  %v7840_v51 = vld [vmem:[#allocation5 + $0xa24] sm:$0xf0]  ;;  %4403 = vmatpush.bf16.msra.mxu2 %v6812_v2  ;;  %v6752_v37 = vor.u32 %v7780_v30, %v6749_v11  ;;  %v6717_v43 = vld [vmem:[#allocation5 + $0x828] sm:$0xf0]  ;;  %v7889_v15 = vld [vmem:[#allocation5 + $0xbac] sm:$0xf0] }
 0x2fe   :  { %v3413_v48 = vpop.f32.mrf.mxu1  ;;  %4429 = vmatpush.bf16.msrb.mxu0 %v6816_v6  ;;  %v7897_v6 = vld [vmem:[#allocation5 + $0xbec] sm:$0xf0]  ;;  %v6949_v30 = vld [vmem:[#allocation5 + $0x9f0] sm:$0xf0] }
 0x2ff   :  { %v3412_v3 = vadd.f32 %v3411_v41, %v3399_v52  ;;  %v6972_v41 = vor.u32 %v7840_v51, %v6971_v47  ;;  %v7203_v48 = vld [vmem:[#allocation5 + $0xbd0] sm:$0xf]  ;;  %v7877_v12 = vld [vmem:[#allocation5 + $0xb54] sm:$0xf] }
 0x300   :  { %4444 = vmatpush.bf16.msrb.mxu1 %v7008_v10  ;;  %v7141_v45 = vld [vmem:[#allocation5 + $0xb70] sm:$0xf0] }
 0x301   :  { %v3528_v44 = vadd.f32 %v3524_v1, %v3412_v3  ;;  %4404 = vmatpush.bf16.msra.mxu2 %v6780_v5  ;;  %4419 = vmatpush.bf16.msra.mxu3 %v6972_v41  ;;  %v7893_v3 = vld [vmem:[#allocation5 + $0xbd4] sm:$0xf] }
 0x302   :  { %v3372_v21 = vpop.f32.mrf.mxu2  ;;  %4430 = vmatpush.bf16.msrb.mxu0 %v6784_v60  ;;  %v7208_v5 = vor.u32 %v7893_v3, %v7205_v9  ;;  %v7885_v60 = vld [vmem:[#allocation5 + $0xb94] sm:$0xf] }
 0x303   :  { %v6704_v23 = vmul.f32 -1.442695, %v3528_v44  ;;  %v3373_v24 = vadd.f32 %v3372_v21, %v8297_v17  ;;  %v7772_v17 = vld [vmem:[#allocation5 + $0x80c] sm:$0xf]  ;;  %v7204_v44 = vor.u32 %v7897_v6, %v7203_v48  ;;  %v7176_v11 = vor.u32 %v7885_v60, %v7173_v22  ;;  %v7075_v48 = vld [vmem:[#allocation5 + $0xad0] sm:$0xf] }
 0x304   :  { %v3387_v7 = vpop.f32.mrf.mxu3  ;;  %v3400_v39 = vpop.f32.mrf.mxu0  ;;  %4445 = vmatpush.bf16.msrb.mxu1 %v6976_v31  ;;  %v6720_v53 = vor.u32 %v7772_v17, %v6717_v43  ;;  %v7172_v31 = vor.u32 %v7889_v15, %v7171_v36  ;;  %v6952_v17 = vor.u32 %v7829_v28, %v6949_v30  ;;  %v6915_v43 = vld [vmem:[#allocation5 + $0x990] sm:$0xf]  ;;  %v7853_v36 = vld [vmem:[#allocation5 + $0xa94] sm:$0xf] }
 0x305   :  { %7965 = vpow2.f32 %v6704_v23  ;;  %v3386_v50 = vadd.f32 %v3385_v58, %v3373_v24  ;;  %4405 = vmatpush.bf16.msra.mxu2 %v6748_v34  ;;  %v7833_v24 = vld [vmem:[#allocation5 + $0x9ec] sm:$0xf0]  ;;  %v7045_v15 = vld [vmem:[#allocation5 + $0xab0] sm:$0xf0] }
 0x306   :  { %4431 = vmatpush.bf16.msrb.mxu0 %v6752_v37  ;;  %v7881_v37 = vld [vmem:[#allocation5 + $0xb6c] sm:$0xf0]  ;;  %v7048_v28 = vor.u32 %v7853_v36, %v7045_v15 }
 0x307   :  { %v3527_v14 = vadd.f32 %v3523_v8, %v3386_v50  ;;  %v7139_v50 = vld [vmem:[#allocation5 + $0xb50] sm:$0xf] }
 0x308   :  { %v7865_v6 = vld [vmem:[#allocation5 + $0xaec] sm:$0xf0] }
 0x309   :  { %v6703_v46 = vmul.f32 -1.442695, %v3527_v14  ;;  %4406 = vmatpush.bf16.msra.mxu2 %v6716_v42  ;;  %v6819_v22 = vld [vmem:[#allocation5 + $0x8d0] sm:$0xf] }
 0x30a   :  { %v3374_v56 = vpop.f32.mrf.mxu2  ;;  %4432 = vmatpush.bf16.msrb.mxu0 %v6720_v53  ;;  %v6917_v53 = vld [vmem:[#allocation5 + $0x9b0] sm:$0xf0]  ;;  %v7011_v30 = vld [vmem:[#allocation5 + $0xa50] sm:$0xf] }
 0x30b   :  { %v7966_v57 = vpop.eup %7965  ;;  %7967 = vpow2.f32 %v6703_v46  ;;  %v7825_v46 = vld [vmem:[#allocation5 + $0x9ac] sm:$0xf0]  ;;  %v7821_v56 = vld [vmem:[#allocation5 + $0x994] sm:$0xf] }
 0x30c   :  { %v3536_v26 = vadd.f32 1.0, %v7966_v57  ;;  %v7140_v57 = vor.u32 %v7881_v37, %v7139_v50  ;;  %v7793_v37 = vld [vmem:[#allocation5 + $0x8ac] sm:$0xf0] }
 0x30e   :  { %7969 = vrcp.f32 %v3536_v26  ;;  %v3563_v63 = vand.u32 2147483648, %v3536_v26  ;;  %v3561_v52 = vand.u32 2147483647, %v3536_v26  ;;  %vm3557_vm6 = vweird.f32 %v3536_v26 }
 0x310   :  { %v3564_v27 = vor.u32 1.1754944e-38, %v3563_v63  ;;  %vm3562_vm8 = vcmp.eq.f32.partialorder %v3561_v52, 8.507059e+37  ;;  %v6920_v63 = vor.u32 %v7821_v56, %v6917_v53  ;;  %v7817_v52 = vld [vmem:[#allocation5 + $0x96c] sm:$0xf0]  ;;  %v7837_v56 = vld [vmem:[#allocation5 + $0xa14] sm:$0xf] }
 0x311   :  { %v7968_v16 = vpop.eup %7967  ;;  %v6981_v53 = vld [vmem:[#allocation5 + $0xa30] sm:$0xf0] }
 0x312   :  { %v3535_v55 = vadd.f32 1.0, %v7968_v16  ;;  %v7107_v16 = vld [vmem:[#allocation5 + $0xb10] sm:$0xf] }
 0x314   :  { %v7970_v58 = vpop.eup %7969  ;;  %7971 = vrcp.f32 %v3535_v55  ;;  %v3548_v19 = vand.u32 2147483648, %v3535_v55  ;;  %v3546_v51 = vand.u32 2147483647, %v3535_v55  ;;  %vm3542_vm10 = vweird.f32 %v3535_v55 }
 0x315   :  { %v3553_v62 = vmul.f32 %v7970_v58, %v3536_v26  ;;  %7973 = vtanh.f32 %v8496_v13  ;;  %vm3558_vm5 = vweird.f32 %v7970_v58  ;;  %v7144_v26 = vor.u32 %v7877_v12, %v7141_v45  ;;  %v7789_v12 = vld [vmem:[#allocation5 + $0x894] sm:$0xf] }
 0x316   :  { %vm3559_vm7 = vmor %vm3557_vm6, %vm3558_vm5  ;;  %7975 = vtanh.f32 %v8509_v61  ;;  %v3549_v23 = vor.u32 1.1754944e-38, %v3548_v19  ;;  %v6947_v61 = vld [vmem:[#allocation5 + $0x9d0] sm:$0xf]  ;;  %vm3547_vm12 = vcmp.eq.f32.partialorder %v3546_v51, 8.507059e+37  ;;  %v7805_v19 = vld [vmem:[#allocation5 + $0x914] sm:$0xf] }
 0x317   :  { %v3554_v59 = vsub.f32 1.0, %v3553_v62  ;;  %v6948_v14 = vor.u32 %v7833_v24, %v6947_v61  ;;  %v7109_v62 = vld [vmem:[#allocation5 + $0xb30] sm:$0xf0] }
 0x318   :  { %v7797_v61 = vld [vmem:[#allocation5 + $0x8d4] sm:$0xf] }
 0x319   :  { %v3555_v38 = vmul.f32 %v7970_v58, %v3554_v59  ;;  %v6916_v59 = vor.u32 %v7825_v46, %v6915_v43  ;;  %v6821_v24 = vld [vmem:[#allocation5 + $0x8f0] sm:$0xf0]  ;;  %v6979_v43 = vld [vmem:[#allocation5 + $0xa10] sm:$0xf] }
 0x31a   :  { %v7972_v1 = vpop.eup %7971  ;;  %v6824_v50 = vor.u32 %v7797_v61, %v6821_v24  ;;  %v6789_v45 = vld [vmem:[#allocation5 + $0x8b0] sm:$0xf0]  ;;  %v7841_v46 = vld [vmem:[#allocation5 + $0xa2c] sm:$0xf0]  ;;  %v7878_v61 = vld [vmem:[#allocation5 + $0xb5c] sm:$0xf] }
 0x31b   :  { %v3556_v2 = vadd.f32 %v7970_v58, %v3555_v38  ;;  %v3538_v29 = vmul.f32 %v7972_v1, %v3535_v55  ;;  %v7974_v4 = vpop.eup %7973  ;;  %vm3543_vm9 = vweird.f32 %v7972_v1  ;;  %v7873_v55 = vld [vmem:[#allocation5 + $0xb2c] sm:$0xf0]  ;;  %v7149_v24 = vld [vmem:[#allocation5 + $0xb78] sm:$0xf0] }
 0x31c   :  { %vm3544_vm11 = vmor %vm3542_vm10, %vm3543_vm9  ;;  %v7976_v7 = vpop.eup %7975  ;;  %v6883_v38 = vld [vmem:[#allocation5 + $0x950] sm:$0xf] }
 0x31d   :  { %v3560_v40 = vsel %vm3559_vm7, %v7970_v58, %v3556_v2  ;;  %v3539_v33 = vsub.f32 1.0, %v3538_v29  ;;  %v7869_v58 = vld [vmem:[#allocation5 + $0xb14] sm:$0xf]  ;;  %v7108_v29 = vor.u32 %v7873_v55, %v7107_v16  ;;  %v6884_v3 = vor.u32 %v7817_v52, %v6883_v38 }
 0x31e   :  { %v3565_v13 = vsel %vm3562_vm8, %v3564_v27, %v3560_v40  ;;  %v6885_v2 = vld [vmem:[#allocation5 + $0x970] sm:$0xf0]  ;;  %v7112_v27 = vor.u32 %v7869_v58, %v7109_v62  ;;  %v6792_v55 = vor.u32 %v7789_v12, %v6789_v45  ;;  %v7894_v58 = vld [vmem:[#allocation5 + $0xbdc] sm:$0xf] }
 0x31f   :  { %v3576_v10 = vmul.f32 %v7974_v4, %v3565_v13  ;;  %v3540_v47 = vmul.f32 %v7972_v1, %v3539_v33  ;;  %v7861_v40 = vld [vmem:[#allocation5 + $0xad4] sm:$0xf]  ;;  %v6851_v4 = vld [vmem:[#allocation5 + $0x910] sm:$0xf]  ;;  %v7213_v62 = vld [vmem:[#allocation5 + $0xbf8] sm:$0xf0] }
 0x320   :  { %v7077_v33 = vld [vmem:[#allocation5 + $0xaf0] sm:$0xf0]  ;;  %v7809_v13 = vld [vmem:[#allocation5 + $0x92c] sm:$0xf0]  ;;  %v7870_v12 = vld [vmem:[#allocation5 + $0xb1c] sm:$0xf] }
 0x321   :  { %v8518_v21 = vpack.c.bf16 %v3576_v10, %v3576_v10  ;;  %4973 = vst [vmem:[#allocation12 + $0x8] sm:$0xff] %v3576_v10  ;;  %v3541_v8 = vadd.f32 %v7972_v1, %v3540_v47  ;;  %v6853_v10 = vld [vmem:[#allocation5 + $0x930] sm:$0xf0]  ;;  %v7076_v47 = vor.u32 %v7865_v6, %v7075_v48  ;;  %v7080_v51 = vor.u32 %v7861_v40, %v7077_v33  ;;  %v7179_v48 = vld [vmem:[#allocation5 + $0xb98] sm:$0xf] }
 0x322   :  { %v6856_v60 = vor.u32 %v7805_v19, %v6853_v10  ;;  %v7781_v38 = vld [vmem:[#allocation5 + $0x854] sm:$0xf]  ;;  %v7890_v6 = vld [vmem:[#allocation5 + $0xbb4] sm:$0xf0]  ;;  %v7886_v40 = vld [vmem:[#allocation5 + $0xb9c] sm:$0xf] }
 0x323   :  { %v3545_v41 = vsel %vm3544_vm11, %v7972_v1, %v3541_v8  ;;  %4368 = vmatmul.bf16.vlgmr.msrb.gmra.mxu3 %v8518_v21  ;;  %4394 = vmatmul.bf16.vlgmr.msra.gmra.mxu1 %v8518_v21  ;;  %v7813_v1 = vld [vmem:[#allocation5 + $0x954] sm:$0xf]  ;;  %v6852_v8 = vor.u32 %v7809_v13, %v6851_v4  ;;  %v6723_v4 = vld [vmem:[#allocation5 + $0x810] sm:$0xf]  ;;  %v7180_v36 = vor.u32 %v7890_v6, %v7179_v48  ;;  %v7117_v45 = vld [vmem:[#allocation5 + $0xb38] sm:$0xf0] }
 0x324   :  { %v3550_v39 = vsel %vm3547_vm12, %v3549_v23, %v3545_v41  ;;  %4464 = vmatpush.bf16.msrb.mxu3 %v7204_v44  ;;  %4490 = vmatpush.bf16.msra.mxu1 %v7208_v5  ;;  %v6888_v9 = vor.u32 %v7813_v1, %v6885_v2  ;;  %v7043_v44 = vld [vmem:[#allocation5 + $0xa90] sm:$0xf]  ;;  %v6757_v52 = vld [vmem:[#allocation5 + $0x870] sm:$0xf0]  ;;  %v6980_v1 = vor.u32 %v7841_v46, %v6979_v43  ;;  %v6891_v43 = vld [vmem:[#allocation5 + $0x958] sm:$0xf] }
 0x325   :  { %v3575_v34 = vmul.f32 %v7976_v7, %v3550_v39  ;;  %v7857_v5 = vld [vmem:[#allocation5 + $0xaac] sm:$0xf0]  ;;  %v7845_v39 = vld [vmem:[#allocation5 + $0xa54] sm:$0xf]  ;;  %v6984_v2 = vor.u32 %v7837_v56, %v6981_v53  ;;  %v7818_v46 = vld [vmem:[#allocation5 + $0x974] sm:$0xf0] }
 0x326   :  { %v7801_v23 = vld [vmem:[#allocation5 + $0x8ec] sm:$0xf0]  ;;  %v7044_v41 = vor.u32 %v7857_v5, %v7043_v44  ;;  %v7773_v19 = vld [vmem:[#allocation5 + $0x814] sm:$0xf]  ;;  %v7830_v44 = vld [vmem:[#allocation5 + $0x9dc] sm:$0xf] }
 0x327   :  { %v8522_v42 = vpack.c.bf16 %v3575_v34, %v3575_v34  ;;  %4972 = vst [vmem:[#allocation12] sm:$0xff] %v3575_v34  ;;  %v7849_v7 = vld [vmem:[#allocation5 + $0xa6c] sm:$0xf0]  ;;  %v6725_v10 = vld [vmem:[#allocation5 + $0x830] sm:$0xf0] }
 0x328   :  { %4465 = vmatpush.bf16.msrb.mxu3 %v7172_v31  ;;  %4491 = vmatpush.bf16.msra.mxu1 %v7176_v11  ;;  %v7013_v31 = vld [vmem:[#allocation5 + $0xa70] sm:$0xf0]  ;;  %v6820_v11 = vor.u32 %v7801_v23, %v6819_v22  ;;  %v6787_v34 = vld [vmem:[#allocation5 + $0x890] sm:$0xf]  ;;  %v6957_v5 = vld [vmem:[#allocation5 + $0x9f8] sm:$0xf0]  ;;  %v6728_v22 = vor.u32 %v7773_v19, %v6725_v10 }
 0x329   :  { %4355 = vmatmul.bf16.vlgmr.msrb.gmra.mxu2 %v8522_v42  ;;  %4381 = vmatmul.bf16.vlgmr.msra.gmra.mxu0 %v8522_v42  ;;  %v6788_v16 = vor.u32 %v7793_v37, %v6787_v34  ;;  %v7777_v13 = vld [vmem:[#allocation5 + $0x82c] sm:$0xf0]  ;;  %v7882_v23 = vld [vmem:[#allocation5 + $0xb74] sm:$0xf0]  ;;  %v7814_v56 = vld [vmem:[#allocation5 + $0x95c] sm:$0xf] }
 0x32a   :  { %4451 = vmatpush.bf16.msrb.mxu2 %v6948_v14  ;;  %4477 = vmatpush.bf16.msra.mxu0 %v6952_v17  ;;  %v7012_v14 = vor.u32 %v7849_v7, %v7011_v30  ;;  %v7016_v17 = vor.u32 %v7845_v39, %v7013_v31  ;;  %v6923_v30 = vld [vmem:[#allocation5 + $0x998] sm:$0xf]  ;;  %v7822_v39 = vld [vmem:[#allocation5 + $0x99c] sm:$0xf] }
 0x32b   :  { %v7826_v7 = vld [vmem:[#allocation5 + $0x9b4] sm:$0xf0]  ;;  %v6925_v31 = vld [vmem:[#allocation5 + $0x9b8] sm:$0xf0] }
 0x32c   :  { %4466 = vmatpush.bf16.msrb.mxu3 %v7140_v57  ;;  %4492 = vmatpush.bf16.msra.mxu1 %v7144_v26  ;;  %v7211_v57 = vld [vmem:[#allocation5 + $0xbd8] sm:$0xf]  ;;  %v6893_v53 = vld [vmem:[#allocation5 + $0x978] sm:$0xf0] }
 0x32d   :  { %v7898_v26 = vld [vmem:[#allocation5 + $0xbf4] sm:$0xf0]  ;;  %v7798_v19 = vld [vmem:[#allocation5 + $0x8dc] sm:$0xf] }
 0x32e   :  { %4452 = vmatpush.bf16.msrb.mxu2 %v6916_v59  ;;  %4478 = vmatpush.bf16.msra.mxu0 %v6920_v63  ;;  %v6755_v59 = vld [vmem:[#allocation5 + $0x850] sm:$0xf]  ;;  %v7115_v34 = vld [vmem:[#allocation5 + $0xb18] sm:$0xf]  ;;  %v6829_v10 = vld [vmem:[#allocation5 + $0x8f8] sm:$0xf0] }
 0x32f   :  { %v7785_v63 = vld [vmem:[#allocation5 + $0x86c] sm:$0xf0]  ;;  %v7874_v37 = vld [vmem:[#allocation5 + $0xb34] sm:$0xf0] }
 0x330   :  { %4467 = vmatpush.bf16.msrb.mxu3 %v7108_v29  ;;  %4493 = vmatpush.bf16.msra.mxu1 %v7112_v27  ;;  %v7212_v29 = vor.u32 %v7898_v26, %v7211_v57  ;;  %v7216_v27 = vor.u32 %v7894_v58, %v7213_v62  ;;  %v6756_v33 = vor.u32 %v7785_v63, %v6755_v59  ;;  %v7862_v58 = vld [vmem:[#allocation5 + $0xadc] sm:$0xf]  ;;  %v7051_v48 = vld [vmem:[#allocation5 + $0xa98] sm:$0xf] }
 0x331   :  { %v7116_v57 = vor.u32 %v7874_v37, %v7115_v34  ;;  %v7120_v26 = vor.u32 %v7870_v12, %v7117_v45  ;;  %v7085_v62 = vld [vmem:[#allocation5 + $0xaf8] sm:$0xf0]  ;;  %v6892_v59 = vor.u32 %v7818_v46, %v6891_v43  ;;  %v6896_v63 = vor.u32 %v7814_v56, %v6893_v53  ;;  %v7858_v6 = vld [vmem:[#allocation5 + $0xab4] sm:$0xf0] }
 0x332   :  { %4453 = vmatpush.bf16.msrb.mxu2 %v6884_v3  ;;  %4479 = vmatpush.bf16.msra.mxu0 %v6888_v9  ;;  %v6760_v3 = vor.u32 %v7781_v38, %v6757_v52  ;;  %v7181_v9 = vld [vmem:[#allocation5 + $0xbb8] sm:$0xf0]  ;;  %v6859_v38 = vld [vmem:[#allocation5 + $0x918] sm:$0xf] }
 0x333   :  { %4420 = vmatmul.bf16.vlgmr.msra.gmra.mxu3 %v8518_v21  ;;  %4446 = vmatmul.bf16.vlgmr.msrb.gmra.mxu1 %v8518_v21  ;;  %v7184_v15 = vor.u32 %v7886_v40, %v7181_v9  ;;  %v7810_v52 = vld [vmem:[#allocation5 + $0x934] sm:$0xf0]  ;;  %v7854_v40 = vld [vmem:[#allocation5 + $0xa9c] sm:$0xf] }
 0x334   :  { %4468 = vmatpush.bf16.msrb.mxu3 %v7076_v47  ;;  %4494 = vmatpush.bf16.msra.mxu1 %v7080_v51  ;;  %v6955_v47 = vld [vmem:[#allocation5 + $0x9d8] sm:$0xf]  ;;  %v7782_v12 = vld [vmem:[#allocation5 + $0x85c] sm:$0xf] }
 0x335   :  { %v7834_v51 = vld [vmem:[#allocation5 + $0x9f4] sm:$0xf0]  ;;  %v6765_v45 = vld [vmem:[#allocation5 + $0x878] sm:$0xf0] }
 0x336   :  { %4454 = vmatpush.bf16.msrb.mxu2 %v6852_v8  ;;  %4480 = vmatpush.bf16.msra.mxu0 %v6856_v60  ;;  %v7147_v8 = vld [vmem:[#allocation5 + $0xb58] sm:$0xf]  ;;  %v6724_v60 = vor.u32 %v7777_v13, %v6723_v4  ;;  %v6768_v46 = vor.u32 %v7782_v12, %v6765_v45 }
 0x337   :  { %v6827_v4 = vld [vmem:[#allocation5 + $0x8d8] sm:$0xf] }
 0x338   :  { %4469 = vmatpush.bf16.msrb.mxu3 %v7044_v41  ;;  %4495 = vmatpush.bf16.msra.mxu1 %v7048_v28  ;;  %v6956_v41 = vor.u32 %v7834_v51, %v6955_v47  ;;  %v6960_v28 = vor.u32 %v7830_v44, %v6957_v5  ;;  %v7802_v13 = vld [vmem:[#allocation5 + $0x8f4] sm:$0xf0]  ;;  %v7052_v47 = vor.u32 %v7858_v6, %v7051_v48 }
 0x339   :  { %4407 = vmatmul.bf16.vlgmr.msra.gmra.mxu2 %v8522_v42  ;;  %4433 = vmatmul.bf16.vlgmr.msrb.gmra.mxu0 %v8522_v42  ;;  %v7019_v44 = vld [vmem:[#allocation5 + $0xa58] sm:$0xf] }
 0x33a   :  { %4455 = vmatpush.bf16.msrb.mxu2 %v6820_v11  ;;  %4481 = vmatpush.bf16.msra.mxu0 %v6824_v50  ;;  %v7148_v11 = vor.u32 %v7882_v23, %v7147_v8  ;;  %v7152_v50 = vor.u32 %v7878_v61, %v7149_v24  ;;  %v7850_v5 = vld [vmem:[#allocation5 + $0xa74] sm:$0xf0]  ;;  %v6828_v8 = vor.u32 %v7802_v13, %v6827_v4  ;;  %v7790_v61 = vld [vmem:[#allocation5 + $0x89c] sm:$0xf] }
 0x33b   :  { %v7794_v23 = vld [vmem:[#allocation5 + $0x8b4] sm:$0xf0]  ;;  %v6797_v24 = vld [vmem:[#allocation5 + $0x8b8] sm:$0xf0] }
 0x33c   :  { %4470 = vmatpush.bf16.msrb.mxu3 %v7012_v14  ;;  %4496 = vmatpush.bf16.msra.mxu1 %v7016_v17  ;;  %v6924_v14 = vor.u32 %v7826_v7, %v6923_v30  ;;  %v6928_v17 = vor.u32 %v7822_v39, %v6925_v31  ;;  %v6987_v30 = vld [vmem:[#allocation5 + $0xa18] sm:$0xf]  ;;  %v7838_v39 = vld [vmem:[#allocation5 + $0xa1c] sm:$0xf] }
 0x33d   :  { %v7842_v7 = vld [vmem:[#allocation5 + $0xa34] sm:$0xf0]  ;;  %v6989_v31 = vld [vmem:[#allocation5 + $0xa38] sm:$0xf0] }
 0x33e   :  { %4456 = vmatpush.bf16.msrb.mxu2 %v6788_v16  ;;  %4482 = vmatpush.bf16.msra.mxu0 %v6792_v55  ;;  %v7083_v16 = vld [vmem:[#allocation5 + $0xad8] sm:$0xf] }
 0x33f   :  { %v7866_v55 = vld [vmem:[#allocation5 + $0xaf4] sm:$0xf0] }
 0x340   :  { %4471 = vmatpush.bf16.msrb.mxu3 %v6980_v1  ;;  %4497 = vmatpush.bf16.msra.mxu1 %v6984_v2  ;;  %v7806_v1 = vld [vmem:[#allocation5 + $0x91c] sm:$0xf]  ;;  %v6763_v34 = vld [vmem:[#allocation5 + $0x858] sm:$0xf] }
 0x341   :  { %v6861_v2 = vld [vmem:[#allocation5 + $0x938] sm:$0xf0]  ;;  %v7786_v37 = vld [vmem:[#allocation5 + $0x874] sm:$0xf0] }
 0x342   :  { %4457 = vmatpush.bf16.msrb.mxu2 %v6756_v33  ;;  %4483 = vmatpush.bf16.msra.mxu0 %v6760_v3  ;;  %v7053_v33 = vld [vmem:[#allocation5 + $0xab8] sm:$0xf0]  ;;  %v6860_v3 = vor.u32 %v7810_v52, %v6859_v38  ;;  %v6864_v9 = vor.u32 %v7806_v1, %v6861_v2  ;;  %v6764_v43 = vor.u32 %v7786_v37, %v6763_v34  ;;  %v6731_v56 = vld [vmem:[#allocation5 + $0x818] sm:$0xf] }
 0x343   :  { %4472 = vmatmul.bf16.vlgmr.msrb.gmra.mxu3 %v8518_v21  ;;  %4498 = vmatmul.bf16.vlgmr.msra.gmra.mxu1 %v8518_v21  ;;  %v7056_v51 = vor.u32 %v7854_v40, %v7053_v33  ;;  %v7778_v53 = vld [vmem:[#allocation5 + $0x834] sm:$0xf0] }
 0x344   :  { %4516 = vmatpush.bf16.msra.mxu3 %v7212_v29  ;;  %4542 = vmatpush.bf16.msrb.mxu1 %v7216_v27  ;;  %v7084_v29 = vor.u32 %v7866_v55, %v7083_v16  ;;  %v7088_v27 = vor.u32 %v7862_v58, %v7085_v62  ;;  %v6732_v16 = vor.u32 %v7778_v53, %v6731_v56  ;;  %v4556_v62 = vld [vmem:[#allocation8 + $0x6] ss:$8 sm:$0x3] }
 0x345   :  { %v4559_v52 = vperm.slane %v4556_v62, 1  ;;  %v4558_v6 = vperm.slane %v4556_v62, 0  ;;  %v8563_v53 = vld [vmem:[#allocation10 + $0x6] sm:$0x3]  ;;  %v7930_v62 = vld [vmem:[#allocation7 + $0x214] sm:$0xf0] }
 0x346   :  { %4458 = vmatpush.bf16.msrb.mxu2 %v6724_v60  ;;  %4484 = vmatpush.bf16.msra.mxu0 %v6728_v22  ;;  %v6832_v60 = vor.u32 %v7798_v19, %v6829_v10  ;;  %v6795_v22 = vld [vmem:[#allocation5 + $0x898] sm:$0xf]  ;;  %v4603_v19 = vld [vmem:[#allocation8 + $0x7] ss:$8 sm:$0x3] }
 0x348   :  { %4517 = vmatpush.bf16.msra.mxu3 %v7180_v36  ;;  %4543 = vmatpush.bf16.msrb.mxu1 %v7184_v15  ;;  %v7846_v36 = vld [vmem:[#allocation5 + $0xa5c] sm:$0xf] }
 0x349   :  { %4459 = vmatmul.bf16.vlgmr.msrb.gmra.mxu2 %v8522_v42  ;;  %4485 = vmatmul.bf16.vlgmr.msra.gmra.mxu0 %v8522_v42  ;;  %v7021_v15 = vld [vmem:[#allocation5 + $0xa78] sm:$0xf0] }
 0x34a   :  { %4503 = vmatpush.bf16.msra.mxu2 %v6956_v41  ;;  %4529 = vmatpush.bf16.msrb.mxu0 %v6960_v28  ;;  %v7020_v41 = vor.u32 %v7850_v5, %v7019_v44  ;;  %v7024_v28 = vor.u32 %v7846_v36, %v7021_v15  ;;  %v4606_v5 = vperm.slane %v4603_v19, 1 }
 0x34c   :  { %4518 = vmatpush.bf16.msra.mxu3 %v7148_v11  ;;  %4544 = vmatpush.bf16.msrb.mxu1 %v7152_v50  ;;  %v6796_v11 = vor.u32 %v7794_v23, %v6795_v22  ;;  %v6800_v50 = vor.u32 %v7790_v61, %v6797_v24  ;;  %v4605_v24 = vperm.slane %v4603_v19, 0 }
 0x34e   :  { %4504 = vmatpush.bf16.msra.mxu2 %v6924_v14  ;;  %4530 = vmatpush.bf16.msrb.mxu0 %v6928_v17  ;;  %v6988_v14 = vor.u32 %v7842_v7, %v6987_v30  ;;  %v6992_v17 = vor.u32 %v7838_v39, %v6989_v31 }
 0x350   :  { %4519 = vmatpush.bf16.msra.mxu3 %v7116_v57  ;;  %4545 = vmatpush.bf16.msrb.mxu1 %v7120_v26  ;;  %v7774_v57 = vld [vmem:[#allocation5 + $0x81c] sm:$0xf] }
 0x351   :  { %v6733_v26 = vld [vmem:[#allocation5 + $0x838] sm:$0xf0] }
 0x352   :  { %4505 = vmatpush.bf16.msra.mxu2 %v6892_v59  ;;  %4531 = vmatpush.bf16.msrb.mxu0 %v6896_v63  ;;  %v6736_v55 = vor.u32 %v7774_v57, %v6733_v26 }
 0x354   :  { %4520 = vmatpush.bf16.msra.mxu3 %v7084_v29  ;;  %4546 = vmatpush.bf16.msrb.mxu1 %v7088_v27 }
 0x356   :  { %4506 = vmatpush.bf16.msra.mxu2 %v6860_v3  ;;  %4532 = vmatpush.bf16.msrb.mxu0 %v6864_v9 }
 0x358   :  { %4521 = vmatpush.bf16.msra.mxu3 %v7052_v47  ;;  %4547 = vmatpush.bf16.msrb.mxu1 %v7056_v51 }
 0x35a   :  { %4507 = vmatpush.bf16.msra.mxu2 %v6828_v8  ;;  %4533 = vmatpush.bf16.msrb.mxu0 %v6832_v60 }
 0x35c   :  { %4522 = vmatpush.bf16.msra.mxu3 %v7020_v41  ;;  %4548 = vmatpush.bf16.msrb.mxu1 %v7024_v28 }
 0x35e   :  { %4508 = vmatpush.bf16.msra.mxu2 %v6796_v11  ;;  %4534 = vmatpush.bf16.msrb.mxu0 %v6800_v50 }
 0x360   :  { %4523 = vmatpush.bf16.msra.mxu3 %v6988_v14  ;;  %4549 = vmatpush.bf16.msrb.mxu1 %v6992_v17 }
 0x362   :  { %4509 = vmatpush.bf16.msra.mxu2 %v6764_v43  ;;  %4535 = vmatpush.bf16.msrb.mxu0 %v6768_v46 }
 0x363   :  { %4524 = vmatmul.bf16.vlgmr.msra.gmra.mxu3 %v8518_v21  ;;  %4550 = vmatmul.bf16.vlgmr.msrb.gmra.mxu1 %v8518_v21 }
 0x366   :  { %4510 = vmatpush.bf16.msra.mxu2 %v6732_v16  ;;  %4536 = vmatpush.bf16.msrb.mxu0 %v6736_v55 }
 0x369   :  { %4511 = vmatmul.bf16.vlgmr.msra.gmra.mxu2 %v8522_v42  ;;  %4537 = vmatmul.bf16.vlgmr.msrb.gmra.mxu0 %v8522_v42 }
 0x3a0   :  { %v4395_v58 = vpop.f32.mrf.mxu1 }
 0x3a6   :  { %v4369_v59 = vpop.f32.mrf.mxu3  ;;  %v4382_v63 = vpop.f32.mrf.mxu0 }
 0x3a7   :  { %v4383_v38 = vadd.f32 %v4382_v63, %v8324_v0 }
 0x3a8   :  { %v4397_v1 = vpop.f32.mrf.mxu1 }
 0x3a9   :  { %v4396_v2 = vadd.f32 %v4395_v58, %v4383_v38  ;;  %v7345_v58 = vld [vmem:[#allocation7 + $0x210] sm:$0xf]  ;;  %v7929_v1 = vld [vmem:[#allocation7 + $0x214] sm:$0xf] }
 0x3ab   :  { %v4563_v29 = vadd.f32 %v4559_v52, %v4396_v2  ;;  %v7346_v52 = vor.u32 %v7930_v62, %v7345_v58  ;;  %v7347_v2 = vld [vmem:[#allocation7 + $0x218] sm:$0xf0]  ;;  %v7906_v62 = vld [vmem:[#allocation7 + $0x154] sm:$0xf0] }
 0x3ac   :  { %v4356_v27 = vpop.f32.mrf.mxu2 }
 0x3ad   :  { %v7218_v48 = vmul.f32 -1.442695, %v4563_v29  ;;  %v4357_v21 = vadd.f32 %v4356_v27, %v8303_v18  ;;  %v137_v27 = vperm.slane %v8563_v53, 1  ;;  %4931 = vmatpush.bf16.msrb.mxu3 %v7346_v52 }
 0x3ae   :  { %v4371_v40 = vpop.f32.mrf.mxu3  ;;  %v4384_v33 = vpop.f32.mrf.mxu0 }
 0x3af   :  { %7977 = vpow2.f32 %v7218_v48  ;;  %v4370_v3 = vadd.f32 %v4369_v59, %v4357_v21  ;;  %v7350_v48 = vor.u32 %v7929_v1, %v7347_v2 }
 0x3b0   :  { %v4447_v42 = vpop.f32.mrf.mxu1 }
 0x3b1   :  { %v4562_v9 = vadd.f32 %v4558_v6, %v4370_v3  ;;  %4957 = vmatpush.bf16.msra.mxu1 %v7350_v48  ;;  %v7924_v48 = vld [vmem:[#allocation7 + $0x1e4] sm:$0xf0] }
 0x3b3   :  { %v7217_v4 = vmul.f32 -1.442695, %v4562_v9 }
 0x3b4   :  { %v4358_v13 = vpop.f32.mrf.mxu2 }
 0x3b5   :  { %v7978_v10 = vpop.eup %7977  ;;  %7979 = vpow2.f32 %v7217_v4  ;;  %v7337_v4 = vld [vmem:[#allocation7 + $0x200] sm:$0xf]  ;;  %v7928_v13 = vld [vmem:[#allocation7 + $0x204] sm:$0xf0] }
 0x3b6   :  { %v8540_v0 = vadd.f32 1.0, %v7978_v10  ;;  %v4421_v47 = vpop.f32.mrf.mxu3  ;;  %v4434_v51 = vpop.f32.mrf.mxu0 }
 0x3b7   :  { %v4435_v44 = vadd.f32 %v4434_v51, %v8326_v25 }
 0x3b8   :  { %7981 = vrcp.f32 %v8540_v0  ;;  %v4449_v18 = vpop.f32.mrf.mxu1  ;;  %v4596_v46 = vand.u32 2147483647, %v8540_v0  ;;  %v4598_v16 = vand.u32 2147483648, %v8540_v0  ;;  %vm4592_vm15 = vweird.f32 %v8540_v0 }
 0x3b9   :  { %v4448_v36 = vadd.f32 %v4447_v42, %v4435_v44  ;;  %v7339_v18 = vld [vmem:[#allocation7 + $0x208] sm:$0xf0] }
 0x3ba   :  { %vm8577_vm14 = vcmp.eq.f32.partialorder %v4596_v46, 8.507059e+37  ;;  %v8581_v33 = vor.u32 1.1754944e-38, %v4598_v16  ;;  %v7911_v16 = vld [vmem:[#allocation7 + $0x184] sm:$0xf] }
 0x3bb   :  { %v7980_v15 = vpop.eup %7979  ;;  %v4610_v8 = vadd.f32 %v4606_v5, %v4448_v36  ;;  %v7927_v5 = vld [vmem:[#allocation7 + $0x204] sm:$0xf] }
 0x3bc   :  { %v8544_v60 = vadd.f32 1.0, %v7980_v15  ;;  %v4408_v22 = vpop.f32.mrf.mxu2 }
 0x3bd   :  { %v7220_v23 = vmul.f32 -1.442695, %v4610_v8  ;;  %v4409_v61 = vadd.f32 %v4408_v22, %v8309_v20  ;;  %v8554_v20 = vld [vmem:[#allocation8 + $0x10] ss:$8 sm:$0x3] }
 0x3be   :  { %v8547_v41 = vpop.eup %7981  ;;  %7983 = vrcp.f32 %v8544_v60  ;;  %v4423_v28 = vpop.f32.mrf.mxu3  ;;  %v4653_v56 = vperm.slane %v8554_v20, 1  ;;  %v4583_v38 = vand.u32 2147483648, %v8544_v60  ;;  %v4581_v9 = vand.u32 2147483647, %v8544_v60  ;;  %v7281_v8 = vld [vmem:[#allocation7 + $0x190] sm:$0xf] }
 0x3bf   :  { %v4436_v25 = vpop.f32.mrf.mxu0  ;;  %7985 = vpow2.f32 %v7220_v23  ;;  %v4422_v30 = vadd.f32 %v4421_v47, %v4409_v61  ;;  %v4588_v7 = vmul.f32 %v8547_v41, %v8540_v0  ;;  %vm4593_vm13 = vweird.f32 %v8547_v41  ;;  %v7914_v22 = vld [vmem:[#allocation7 + $0x194] sm:$0xf0]  ;;  %v7913_v23 = vld [vmem:[#allocation7 + $0x194] sm:$0xf] }
 0x3c0   :  { %v4499_v39 = vpop.f32.mrf.mxu1  ;;  %vm8590_vm0 = vmor %vm4592_vm15, %vm4593_vm13  ;;  %v8596_v51 = vor.u32 1.1754944e-38, %v4583_v38  ;;  %v7338_v28 = vor.u32 %v7928_v13, %v7337_v4  ;;  %v7283_v25 = vld [vmem:[#allocation7 + $0x198] sm:$0xf0]  ;;  %vm8606_vm2 = vcmp.eq.f32.partialorder %v4581_v9, 8.507059e+37  ;;  %vm4577_vm4 = vweird.f32 %v8544_v60  ;;  %v7323_v9 = vld [vmem:[#allocation7 + $0x1e8] sm:$0xf0] }
 0x3c1   :  { %v4609_v31 = vadd.f32 %v4605_v24, %v4422_v30  ;;  %v4589_v34 = vsub.f32 1.0, %v4588_v7 }
 0x3c2   :  { %4932 = vmatpush.bf16.msrb.mxu3 %v7338_v28 }
 0x3c3   :  { %v7219_v11 = vmul.f32 -1.442695, %v4609_v31  ;;  %v4590_v26 = vmul.f32 %v8547_v41, %v4589_v34  ;;  %v7282_v31 = vor.u32 %v7914_v22, %v7281_v8  ;;  %v7329_v34 = vld [vmem:[#allocation7 + $0x1f0] sm:$0xf] }
 0x3c4   :  { %v8552_v50 = vpop.eup %7983  ;;  %v4410_v37 = vpop.f32.mrf.mxu2  ;;  %v7313_v22 = vld [vmem:[#allocation7 + $0x1d0] sm:$0xf] }
 0x3c5   :  { %v7986_v12 = vpop.eup %7985  ;;  %7987 = vpow2.f32 %v7219_v11  ;;  %v4573_v45 = vmul.f32 %v8552_v50, %v8544_v60  ;;  %v8575_v6 = vadd.f32 %v8547_v41, %v4590_v26  ;;  %vm4578_vm1 = vweird.f32 %v8552_v50  ;;  %v7926_v37 = vld [vmem:[#allocation7 + $0x1f4] sm:$0xf0]  ;;  %4918 = vmatpush.bf16.msrb.mxu2 %v7282_v31  ;;  %v7912_v26 = vld [vmem:[#allocation7 + $0x184] sm:$0xf0] }
 0x3c6   :  { %v8558_v14 = vadd.f32 1.0, %v7986_v12  ;;  %v4473_v17 = vpop.f32.mrf.mxu3  ;;  %v7286_v11 = vor.u32 %v7913_v23, %v7283_v25  ;;  %vm8622_vm6 = vmor %vm4577_vm4, %vm4578_vm1  ;;  %v7922_v23 = vld [vmem:[#allocation7 + $0x1d4] sm:$0xf0] }
 0x3c7   :  { %v4486_v43 = vpop.f32.mrf.mxu0  ;;  %v4574_v59 = vsub.f32 1.0, %v4573_v45  ;;  %v7314_v25 = vor.u32 %v7922_v23, %v7313_v22  ;;  %v7901_v23 = vld [vmem:[#allocation7 + $0x134] sm:$0xf] }
 0x3c8   :  { %7989 = vrcp.f32 %v8558_v14  ;;  %v4487_v57 = vadd.f32 %v4486_v43, %v8328_v35  ;;  %v4501_v55 = vpop.f32.mrf.mxu1  ;;  %v4652_v35 = vperm.slane %v8554_v20, 0  ;;  %v4645_v61 = vand.u32 2147483648, %v8558_v14  ;;  %v7331_v43 = vld [vmem:[#allocation7 + $0x1f8] sm:$0xf0]  ;;  %4944 = vmatpush.bf16.msra.mxu0 %v7286_v11  ;;  %v7257_v11 = vld [vmem:[#allocation7 + $0x160] sm:$0xf] }
 0x3c9   :  { %v4575_v0 = vmul.f32 %v8552_v50, %v4574_v59  ;;  %v4643_v20 = vand.u32 2147483647, %v8558_v14  ;;  %vm4639_vm5 = vweird.f32 %v8558_v14  ;;  %v7275_v59 = vld [vmem:[#allocation7 + $0x188] sm:$0xf0] }
 0x3ca   :  { %v4500_v63 = vadd.f32 %v4499_v39, %v4487_v57  ;;  %v7342_v39 = vor.u32 %v7927_v5, %v7339_v18  ;;  %v7273_v57 = vld [vmem:[#allocation7 + $0x180] sm:$0xf]  ;;  %v4646_v58 = vor.u32 1.1754944e-38, %v4645_v61  ;;  %v7909_v18 = vld [vmem:[#allocation7 + $0x174] sm:$0xf] }
 0x3cb   :  { %v7988_v29 = vpop.eup %7987  ;;  %v8612_v12 = vadd.f32 %v8552_v50, %v4575_v0  ;;  %v7274_v60 = vor.u32 %v7912_v26, %v7273_v57  ;;  %vm4644_vm8 = vcmp.eq.f32.partialorder %v4643_v20, 8.507059e+37  ;;  %v7910_v0 = vld [vmem:[#allocation7 + $0x174] sm:$0xf0]  ;;  %v7921_v61 = vld [vmem:[#allocation7 + $0x1d4] sm:$0xf] }
 0x3cc   :  { %v8572_v21 = vadd.f32 1.0, %v7988_v29  ;;  %v4657_v3 = vadd.f32 %v4653_v56, %v4500_v63  ;;  %v4460_v42 = vpop.f32.mrf.mxu2  ;;  %4958 = vmatpush.bf16.msra.mxu1 %v7342_v39  ;;  %v7278_v29 = vor.u32 %v7911_v16, %v7275_v59  ;;  %v7259_v20 = vld [vmem:[#allocation7 + $0x168] sm:$0xf0]  ;;  %v8665_v59 = vld [vmem:[#allocation8 + $0x11] ss:$8 sm:$0x3] }
 0x3cd   :  { %v4461_v47 = vadd.f32 %v4460_v42, %v8318_v49  ;;  %v4595_v49 = vsel %vm8590_vm0, %v8547_v41, %v8575_v6  ;;  %v7330_v41 = vor.u32 %v7926_v37, %v7329_v34  ;;  %v7923_v6 = vld [vmem:[#allocation7 + $0x1e4] sm:$0xf]  ;;  %v4580_v40 = vsel %vm8622_vm6, %v8552_v50, %v8612_v12  ;;  %4919 = vmatpush.bf16.msrb.mxu2 %v7274_v60  ;;  %v7908_v34 = vld [vmem:[#allocation7 + $0x164] sm:$0xf0]  ;;  %v7307_v57 = vld [vmem:[#allocation7 + $0x1c8] sm:$0xf0] }
 0x3ce   :  { %v8585_v19 = vpop.eup %7989  ;;  %7991 = vrcp.f32 %v8572_v21  ;;  %v4475_v44 = vpop.f32.mrf.mxu3  ;;  %v4600_v52 = vsel %vm8577_vm14, %v8581_v33, %v4595_v49  ;;  %v4630_v13 = vand.u32 2147483648, %v8572_v21  ;;  %v7326_v10 = vor.u32 %v7923_v6, %v7323_v9  ;;  %4945 = vmatpush.bf16.msra.mxu0 %v7278_v29  ;;  %v7907_v37 = vld [vmem:[#allocation7 + $0x164] sm:$0xf]  ;;  %v7905_v60 = vld [vmem:[#allocation7 + $0x154] sm:$0xf] }
 0x3cf   :  { %v4635_v36 = vmul.f32 %v8585_v19, %v8558_v14  ;;  %7993 = vtanh.f32 %v4657_v3  ;;  %v4488_v15 = vpop.f32.mrf.mxu0  ;;  %v4474_v24 = vadd.f32 %v4473_v17, %v4461_v47  ;;  %v7925_v17 = vld [vmem:[#allocation7 + $0x1f4] sm:$0xf]  ;;  %vm4640_vm3 = vweird.f32 %v8585_v19  ;;  %4933 = vmatpush.bf16.msrb.mxu3 %v7330_v41  ;;  %v7265_v47 = vld [vmem:[#allocation7 + $0x170] sm:$0xf]  ;;  %v7305_v41 = vld [vmem:[#allocation7 + $0x1c0] sm:$0xf] }
 0x3d0   :  { %v7334_v56 = vor.u32 %v7925_v17, %v7331_v43  ;;  %vm8636_vm7 = vmor %vm4639_vm5, %vm4640_vm3  ;;  %v4628_v5 = vand.u32 2147483647, %v8572_v21  ;;  %v7266_v50 = vor.u32 %v7910_v0, %v7265_v47  ;;  %v4585_v28 = vsel %vm8606_vm2, %v8596_v51, %v4580_v40  ;;  %v7920_v17 = vld [vmem:[#allocation7 + $0x1c4] sm:$0xf0]  ;;  %v7917_v29 = vld [vmem:[#allocation7 + $0x1b4] sm:$0xf] }
 0x3d1   :  { %v4636_v30 = vsub.f32 1.0, %v4635_v36  ;;  %v4656_v45 = vadd.f32 %v4652_v35, %v4474_v24  ;;  %v7321_v35 = vld [vmem:[#allocation7 + $0x1e0] sm:$0xf]  ;;  %v7267_v36 = vld [vmem:[#allocation7 + $0x178] sm:$0xf0]  ;;  %v136_v24 = vperm.slane %v8563_v53, 0  ;;  %vm4624_vm10 = vweird.f32 %v8572_v21 }
 0x3d2   :  { %v7322_v33 = vor.u32 %v7924_v48, %v7321_v35  ;;  %4959 = vmatpush.bf16.msra.mxu1 %v7334_v56  ;;  %4920 = vmatpush.bf16.msrb.mxu2 %v7266_v50  ;;  %v4631_v53 = vor.u32 1.1754944e-38, %v4630_v13  ;;  %v7258_v7 = vor.u32 %v7908_v34, %v7257_v11  ;;  %vm4629_vm12 = vcmp.eq.f32.partialorder %v4628_v5, 8.507059e+37  ;;  %v7919_v56 = vld [vmem:[#allocation7 + $0x1c4] sm:$0xf]  ;;  %v7299_v48 = vld [vmem:[#allocation7 + $0x1b8] sm:$0xf0] }
 0x3d3   :  { %v4637_v46 = vmul.f32 %v8585_v19, %v4636_v30  ;;  %7995 = vtanh.f32 %v4656_v45  ;;  %v7315_v30 = vld [vmem:[#allocation7 + $0x1d8] sm:$0xf0]  ;;  %v7262_v45 = vor.u32 %v7907_v37, %v7259_v20  ;;  %v7310_v16 = vor.u32 %v7919_v56, %v7307_v57  ;;  %v7241_v40 = vld [vmem:[#allocation7 + $0x140] sm:$0xf]  ;;  %v7916_v5 = vld [vmem:[#allocation7 + $0x1a4] sm:$0xf0] }
 0x3d4   :  { %v8617_v55 = vpop.eup %7991  ;;  %v4462_v2 = vpop.f32.mrf.mxu2  ;;  %4934 = vmatpush.bf16.msrb.mxu3 %v7322_v33  ;;  %v7318_v51 = vor.u32 %v7921_v61, %v7315_v30  ;;  %v7904_v33 = vld [vmem:[#allocation7 + $0x144] sm:$0xf0]  ;;  %v7915_v50 = vld [vmem:[#allocation7 + $0x1a4] sm:$0xf]  ;;  %v7235_v61 = vld [vmem:[#allocation7 + $0x138] sm:$0xf0] }
 0x3d5   :  { %v7994_v63 = vpop.eup %7993  ;;  %v4620_v38 = vmul.f32 %v8617_v55, %v8572_v21  ;;  %v4638_v1 = vadd.f32 %v8585_v19, %v4637_v46  ;;  %vm4625_vm9 = vweird.f32 %v8617_v55  ;;  %v7306_v46 = vor.u32 %v7920_v17, %v7305_v41  ;;  %v7918_v2 = vld [vmem:[#allocation7 + $0x1b4] sm:$0xf0]  ;;  %v7900_v11 = vld [vmem:[#allocation7 + $0x124] sm:$0xf0] }
 0x3d6   :  { %v4710_v42 = vmul.f32 %v7994_v63, %v4600_v52  ;;  %4960 = vmatpush.bf16.msra.mxu1 %v7326_v10  ;;  %vm4626_vm11 = vmor %vm4624_vm10, %vm4625_vm9  ;;  %4921 = vmatpush.bf16.msrb.mxu2 %v7258_v7  ;;  %v7251_v63 = vld [vmem:[#allocation7 + $0x158] sm:$0xf0]  ;;  %v7242_v13 = vor.u32 %v7904_v33, %v7241_v40  ;;  %v7243_v10 = vld [vmem:[#allocation7 + $0x148] sm:$0xf0] }
 0x3d7   :  { %v4621_v4 = vsub.f32 1.0, %v4620_v38  ;;  %v4642_v14 = vsel %vm8636_vm7, %v8585_v19, %v4638_v1  ;;  %v7270_v19 = vor.u32 %v7909_v18, %v7267_v36  ;;  %v7254_v52 = vor.u32 %v7905_v60, %v7251_v63  ;;  %v7297_v1 = vld [vmem:[#allocation7 + $0x1b0] sm:$0xf]  ;;  %v7227_v7 = vld [vmem:[#allocation7 + $0x128] sm:$0xf0] }
 0x3d8   :  { %v4647_v44 = vsel %vm4644_vm8, %v4646_v58, %v4642_v14  ;;  %4935 = vmatpush.bf16.msrb.mxu3 %v7314_v25  ;;  %v7249_v58 = vld [vmem:[#allocation7 + $0x150] sm:$0xf]  ;;  %v7298_v35 = vor.u32 %v7918_v2, %v7297_v1  ;;  %v7903_v14 = vld [vmem:[#allocation7 + $0x144] sm:$0xf]  ;;  %v4663_v25 = vperm.slane %v8665_v59, 0 }
 0x3d9   :  { %v4622_v15 = vmul.f32 %v8617_v55, %v4621_v4  ;;  %v4708_v8 = vmul.f32 %v4647_v44, %v137_v27  ;;  %v7996_v49 = vpop.eup %7995  ;;  %4946 = vmatpush.bf16.msra.mxu0 %v7270_v19  ;;  %v4664_v4 = vperm.slane %v8665_v59, 1  ;;  %v7246_v0 = vor.u32 %v7903_v14, %v7243_v10  ;;  %v7289_v44 = vld [vmem:[#allocation7 + $0x1a0] sm:$0xf]  ;;  %v7902_v19 = vld [vmem:[#allocation7 + $0x134] sm:$0xf0] }
 0x3da   :  { %v4709_v31 = vmul.f32 %v7996_v49, %v4585_v28  ;;  %4961 = vmatpush.bf16.msra.mxu1 %v7318_v51  ;;  %v7290_v36 = vor.u32 %v7916_v5, %v7289_v44  ;;  %v7899_v51 = vld [vmem:[#allocation7 + $0x124] sm:$0xf]  ;;  %v4752_v10 = vld [vmem:[#allocation8 + $0x12] ss:$8 sm:$0x3] }
 0x3db   :  { %v8658_v39 = vadd.f32 %v4710_v42, %v4708_v8  ;;  %v4623_v27 = vadd.f32 %v8617_v55, %v4622_v15  ;;  %v7302_v42 = vor.u32 %v7917_v29, %v7299_v48  ;;  %v7291_v15 = vld [vmem:[#allocation7 + $0x1a8] sm:$0xf0]  ;;  %v7233_v8 = vld [vmem:[#allocation7 + $0x130] sm:$0xf] }
 0x3dc   :  { %4936 = vmatpush.bf16.msrb.mxu3 %v7306_v46  ;;  %v7234_v22 = vor.u32 %v7902_v19, %v7233_v8 }
 0x3dd   :  { %4979 = vst [vmem:[#allocation12 + $0x38] sm:$0xff] %v8658_v39  ;;  %v4627_v21 = vsel %vm4626_vm11, %v8617_v55, %v4623_v27  ;;  %4947 = vmatpush.bf16.msra.mxu0 %v7262_v45  ;;  %v7250_v55 = vor.u32 %v7906_v62, %v7249_v58 }
 0x3de   :  { %v4632_v43 = vsel %vm4629_vm12, %v4631_v53, %v4627_v21  ;;  %4962 = vmatpush.bf16.msra.mxu1 %v7310_v16  ;;  %v7230_v21 = vor.u32 %v7899_v51, %v7227_v7 }
 0x3df   :  { %v4707_v26 = vmul.f32 %v4632_v43, %v136_v24  ;;  %4922 = vmatpush.bf16.msrb.mxu2 %v7250_v55  ;;  %v7238_v24 = vor.u32 %v7901_v23, %v7235_v61 }
 0x3e0   :  { %v4551_v12 = vpop.f32.mrf.mxu1  ;;  %4937 = vmatpush.bf16.msrb.mxu3 %v7298_v35 }
 0x3e1   :  { %v8667_v38 = vadd.f32 %v4709_v31, %v4707_v26  ;;  %4948 = vmatpush.bf16.msra.mxu0 %v7254_v52  ;;  %v7225_v31 = vld [vmem:[#allocation7 + $0x120] sm:$0xf] }
 0x3e2   :  { %4963 = vmatpush.bf16.msra.mxu1 %v7302_v42  ;;  %v7226_v53 = vor.u32 %v7900_v11, %v7225_v31 }
 0x3e3   :  { %4978 = vst [vmem:[#allocation12 + $0x30] sm:$0xff] %v8667_v38  ;;  %4923 = vmatpush.bf16.msrb.mxu2 %v7242_v13 }
 0x3e4   :  { %4938 = vmatpush.bf16.msrb.mxu3 %v7290_v36  ;;  %v4754_v36 = vperm.slane %v4752_v10, 0 }
 0x3e5   :  { %4949 = vmatpush.bf16.msra.mxu0 %v7246_v0 }
 0x3e6   :  { %v4525_v6 = vpop.f32.mrf.mxu3  ;;  %v4538_v3 = vpop.f32.mrf.mxu0 }
 0x3e7   :  { %v4539_v9 = vadd.f32 %v4538_v3, %v8330_v32  ;;  %v7294_v32 = vor.u32 %v7915_v50, %v7291_v15  ;;  %4924 = vmatpush.bf16.msrb.mxu2 %v7234_v22 }
 0x3e8   :  { %v4553_v47 = vpop.f32.mrf.mxu1 }
 0x3e9   :  { %v4552_v18 = vadd.f32 %v4551_v12, %v4539_v9  ;;  %4964 = vmatpush.bf16.msra.mxu1 %v7294_v32  ;;  %4950 = vmatpush.bf16.msra.mxu0 %v7238_v24  ;;  %v4755_v47 = vperm.slane %v4752_v10, 1 }
 0x3eb   :  { %v4668_v49 = vadd.f32 %v4664_v4, %v4552_v18  ;;  %4925 = vmatpush.bf16.msrb.mxu2 %v7226_v53 }
 0x3ec   :  { %v4512_v28 = vpop.f32.mrf.mxu2 }
 0x3ed   :  { %v7222_v30 = vmul.f32 -1.442695, %v4668_v49  ;;  %v4513_v27 = vadd.f32 %v4512_v28, %v8322_v54  ;;  %4951 = vmatpush.bf16.msra.mxu0 %v7230_v21 }
 0x3ee   :  { %v4527_v34 = vpop.f32.mrf.mxu3  ;;  %v4540_v37 = vpop.f32.mrf.mxu0 }
 0x3ef   :  { %7997 = vpow2.f32 %v7222_v30  ;;  %v4526_v20 = vadd.f32 %v4525_v6, %v4513_v27 }
 0x3f1   :  { %v4667_v12 = vadd.f32 %v4663_v25, %v4526_v20 }
 0x3f3   :  { %v7221_v45 = vmul.f32 -1.442695, %v4667_v12 }
 0x3f4   :  { %v4514_v41 = vpop.f32.mrf.mxu2 }
 0x3f5   :  { %v7998_v54 = vpop.eup %7997  ;;  %7999 = vpow2.f32 %v7221_v45 }
 0x3f6   :  { %v4676_v17 = vadd.f32 1.0, %v7998_v54 }
 0x3f8   :  { %8001 = vrcp.f32 %v4676_v17  ;;  %v4703_v16 = vand.u32 2147483648, %v4676_v17  ;;  %v4701_v62 = vand.u32 2147483647, %v4676_v17  ;;  %vm4697_vm14 = vweird.f32 %v4676_v17 }
 0x3fa   :  { %v4704_v63 = vor.u32 1.1754944e-38, %v4703_v16  ;;  %vm4702_vm0 = vcmp.eq.f32.partialorder %v4701_v62, 8.507059e+37 }
 0x3fb   :  { %v8000_v43 = vpop.eup %7999 }
 0x3fc   :  { %v4675_v46 = vadd.f32 1.0, %v8000_v43 }
 0x3fe   :  { %v8002_v56 = vpop.eup %8001  ;;  %8003 = vrcp.f32 %v4675_v46  ;;  %v4688_v29 = vand.u32 2147483648, %v4675_v46  ;;  %v4686_v6 = vand.u32 2147483647, %v4675_v46  ;;  %vm4682_vm2 = vweird.f32 %v4675_v46 }
 0x3ff   :  { %v4693_v57 = vmul.f32 %v8002_v56, %v4676_v17  ;;  %8005 = vtanh.f32 %v8658_v39  ;;  %vm4698_vm13 = vweird.f32 %v8002_v56 }
 0x400   :  { %vm4699_vm15 = vmor %vm4697_vm14, %vm4698_vm13  ;;  %8007 = vtanh.f32 %v8667_v38  ;;  %v4689_v40 = vor.u32 1.1754944e-38, %v4688_v29  ;;  %vm4687_vm4 = vcmp.eq.f32.partialorder %v4686_v6, 8.507059e+37 }
 0x401   :  { %v4694_v26 = vsub.f32 1.0, %v4693_v57 }
 0x403   :  { %v4695_v58 = vmul.f32 %v8002_v56, %v4694_v26 }
 0x404   :  { %v8004_v60 = vpop.eup %8003 }
 0x405   :  { %v4678_v59 = vmul.f32 %v8004_v60, %v4675_v46  ;;  %v4696_v55 = vadd.f32 %v8002_v56, %v4695_v58  ;;  %v8006_v2 = vpop.eup %8005  ;;  %vm4683_vm1 = vweird.f32 %v8004_v60 }
 0x406   :  { %vm4684_vm3 = vmor %vm4682_vm2, %vm4683_vm1  ;;  %v8008_v9 = vpop.eup %8007 }
 0x407   :  { %v4679_v52 = vsub.f32 1.0, %v4678_v59  ;;  %v4700_v1 = vsel %vm4699_vm15, %v8002_v56, %v4696_v55 }
 0x408   :  { %v4705_v35 = vsel %vm4702_vm0, %v4704_v63, %v4700_v1 }
 0x409   :  { %v4680_v48 = vmul.f32 %v8004_v60, %v4679_v52  ;;  %v4716_v39 = vmul.f32 %v8006_v2, %v4705_v35 }
 0x40b   :  { %v4718_v3 = vpack.c.bf16 %v4716_v39, %v4716_v39  ;;  %4975 = vst [vmem:[#allocation12 + $0x18] sm:$0xff] %v4716_v39  ;;  %v4681_v42 = vadd.f32 %v8004_v60, %v4680_v48 }
 0x40d   :  { %4939 = vmatmul.bf16.vlgmr.msrb.gmra.mxu3 %v4718_v3  ;;  %4965 = vmatmul.bf16.vlgmr.msra.gmra.mxu1 %v4718_v3  ;;  %v4685_v33 = vsel %vm4684_vm3, %v8004_v60, %v4681_v42 }
 0x40e   :  { %v4690_v4 = vsel %vm4687_vm4, %v4689_v40, %v4685_v33 }
 0x40f   :  { %v4715_v13 = vmul.f32 %v8008_v9, %v4690_v4 }
 0x411   :  { %v4717_v38 = vpack.c.bf16 %v4715_v13, %v4715_v13  ;;  %4974 = vst [vmem:[#allocation12 + $0x10] sm:$0xff] %v4715_v13 }
 0x412   :  { %5003 = dma.vmem_to_hbm [thread:$0]  %s4996_s4, 1024, %s4998_s28, [#allocation13], %s8191_s9, %s8191_s9, %s8192_s10  }
 0x413   :  { %4926 = vmatmul.bf16.vlgmr.msrb.gmra.mxu2 %v4717_v38  ;;  %4952 = vmatmul.bf16.vlgmr.msra.gmra.mxu0 %v4717_v38 }
 0x48a   :  { %v4966_v14 = vpop.f32.mrf.mxu1 }
 0x490   :  { %v4940_v0 = vpop.f32.mrf.mxu3  ;;  %v4953_v44 = vpop.f32.mrf.mxu0 }
 0x491   :  { %v4954_v5 = vadd.f32 %v4953_v44, %v4755_v47 }
 0x492   :  { %v4968_v50 = vpop.f32.mrf.mxu1 }
 0x493   :  { %v4967_v18 = vadd.f32 %v4966_v14, %v4954_v5 }
 0x495   :  { %4971 = vst [vmem:[#allocation11 + $0x8] sm:$0xff] %v4967_v18 }
 0x496   :  { %v4927_v15 = vpop.f32.mrf.mxu2 }
 0x497   :  { %v4928_v8 = vadd.f32 %v4927_v15, %v4754_v36 }
 0x498   :  { %v4942_v19 = vpop.f32.mrf.mxu3  ;;  %v4955_v32 = vpop.f32.mrf.mxu0 }
 0x499   :  { %v4941_v22 = vadd.f32 %v4940_v0, %v4928_v8 }
 0x49b   :  { %4970 = vst [vmem:[#allocation11] sm:$0xff] %v4941_v22 }
 0x49c   :  { %4990 = dma.vmem_to_hbm [thread:$0]  %s4986_s30, 256, %s4988_s8, [#allocation4]  }
 0x49e   :  { %v4929_v23 = vpop.f32.mrf.mxu2 }
 0x49f   :  { %8183 = dma.done.wait [#allocation4], 256  }
 0x4a0   :  { %8184 = vsyncadd [#allocation4], 4294967040 }
 0x4a1   :  { %8185 = dma.done.wait [#allocation13], 1024  }
 0x4a2   :  { %8186 = vsyncadd [#allocation13], 4294966272 }
 0x4a3   :  { %5012 = vsyncpa [#allocation3], 1 }
 0x4a4   :  { %5013 = vsyncpa [#allocation6], 1 }
 0x4a5   :  { %5014 = vsyncpa [#allocation9], 1 }
 0x4a6   :  { %5015 = vsyncpa [#allocation4], 1 }
 0x4a7   :  { %5016 = vsyncpa [#allocation13], 1 }

</bundles_post_ra>
